<compile_context>
chip_gen: v7x
topology: tpu7x:2x2x1
jax: 0.10.0
libtpu: 0.0.40
codegen_flags: <defaults>
</compile_context>

<pallas_src>
import functools
import math

import jax
import jax.numpy as jnp
from jax import lax
from jax.experimental import pallas as pl
from jax.experimental.pallas import tpu as pltpu

SUBLANE = 8
LANE = 128


# ----------------------------- Pallas kernel -------------------------------


def _bilstm_crf_kernel(
    T, B, H,                                    # static (closed over via partial)
    x_ref,                                      # [T*B, E]        (time-major, batch padded)
    wih0f_ref, whh0f_ref, b0f_ref,              # layer0 fwd: [E,4H], [H,4H], [1,4H]
    wih0b_ref, whh0b_ref, b0b_ref,              # layer0 bwd
    wih1f_ref, whh1f_ref, b1f_ref,              # layer1 fwd: [2H,4H], [H,4H], [1,4H]
    wih1b_ref, whh1b_ref, b1b_ref,              # layer1 bwd
    wcls_ref, bcls_ref,                         # [2H, Cp], [1, Cp]
    out_ref,                                    # [T*B, Cp]
    gxf, gxb,                                   # VMEM [T*B, 4H] hoisted input gates
    hf_all, hb_all,                             # VMEM [T*B, H]  per-time hidden (both layers reuse)
    hf, cf, hb, cb,                             # VMEM [B, H]    recurrent carries
):
    f32 = jnp.float32

    def cell(gates, c_prev):
        # Full-width nonlinearities on the whole [B, 4H] vreg (EUP slot), then
        # slice i/f/g/o (PyTorch gate order) for the state update.
        sig = jax.nn.sigmoid(gates)
        tng = jnp.tanh(gates)
        i_g = sig[:, 0 * H:1 * H]
        f_g = sig[:, 1 * H:2 * H]
        g_g = tng[:, 2 * H:3 * H]
        o_g = sig[:, 3 * H:4 * H]
        c_new = f_g * c_prev + i_g * g_g
        h_new = o_g * jnp.tanh(c_new)
        return h_new, c_new

    def run_layer(whhf_ref, whhb_ref):
        hf[...] = jnp.zeros_like(hf)
        cf[...] = jnp.zeros_like(cf)
        hb[...] = jnp.zeros_like(hb)
        cb[...] = jnp.zeros_like(cb)

        def step(t, carry):
            row_f = pl.multiple_of(t * B, B)
            row_b = pl.multiple_of((T - 1 - t) * B, B)
            # forward direction: consumes original time t
            g_f = gxf[pl.ds(row_f, B), :] + jnp.dot(
                hf[...], whhf_ref[...], preferred_element_type=f32)
            h_new, c_new = cell(g_f, cf[...])
            hf[...] = h_new
            cf[...] = c_new
            hf_all[pl.ds(row_f, B), :] = h_new
            # backward direction: consumes original time T-1-t (reversal is
            # pure index arithmetic; output lands at its original time slot)
            g_b = gxb[pl.ds(row_b, B), :] + jnp.dot(
                hb[...], whhb_ref[...], preferred_element_type=f32)
            hb_new, cb_new = cell(g_b, cb[...])
            hb[...] = hb_new
            cb[...] = cb_new
            hb_all[pl.ds(row_b, B), :] = hb_new
            return carry

        lax.fori_loop(0, T, step, 0, unroll=True)

    # ---- layer 0: hoisted input projection (one big MXU matmul per dir) ----
    x = x_ref[...]
    gxf[...] = jnp.dot(x, wih0f_ref[...], preferred_element_type=f32) + b0f_ref[...]
    gxb[...] = jnp.dot(x, wih0b_ref[...], preferred_element_type=f32) + b0b_ref[...]
    run_layer(whh0f_ref, whh0b_ref)

    # ---- layer 1: input is [h_fwd | h_bwd]; do the concat as split matmuls ----
    h0f = hf_all[...]
    h0b = hb_all[...]
    gxf[...] = (jnp.dot(h0f, wih1f_ref[0:H, :], preferred_element_type=f32)
                + jnp.dot(h0b, wih1f_ref[H:2 * H, :], preferred_element_type=f32)
                + b1f_ref[...])
    gxb[...] = (jnp.dot(h0f, wih1b_ref[0:H, :], preferred_element_type=f32)
                + jnp.dot(h0b, wih1b_ref[H:2 * H, :], preferred_element_type=f32)
                + b1b_ref[...])
    run_layer(whh1f_ref, whh1b_ref)

    # ---- classifier epilogue: single dense 128-lane output store ----
    out_ref[...] = (jnp.dot(hf_all[...], wcls_ref[0:H, :], preferred_element_type=f32)
                    + jnp.dot(hb_all[...], wcls_ref[H:2 * H, :], preferred_element_type=f32)
                    + bcls_ref[...])


# ----------------------------- JAX wrappers --------------------------------


def prepare_params(raw):
    """One-time weight prep: transpose to [in,4H], combine biases, pad classifier."""
    def prep_dir(p):
        w_ih, w_hh, b_ih, b_hh = p
        return (jnp.transpose(w_ih).astype(jnp.float32),          # [in, 4H]
                jnp.transpose(w_hh).astype(jnp.float32),          # [H, 4H]
                (b_ih + b_hh)[None, :].astype(jnp.float32))       # [1, 4H]

    C = raw["cls_b"].shape[0]
    C_pad = ((C + LANE - 1) // LANE) * LANE
    w_cls_t = jnp.transpose(raw["cls_w"]).astype(jnp.float32)     # [2H, C]
    w_cls = jnp.pad(w_cls_t, ((0, 0), (0, C_pad - C)))            # lane-pad to 128
    b_cls = jnp.pad(raw["cls_b"].astype(jnp.float32), (0, C_pad - C))[None, :]

    return {
        "embedding": raw["embedding"].astype(jnp.float32),
        "l0_f": prep_dir(raw["l0_f"]), "l0_b": prep_dir(raw["l0_b"]),
        "l1_f": prep_dir(raw["l1_f"]), "l1_b": prep_dir(raw["l1_b"]),
        "cls_w": w_cls, "cls_b": b_cls,
        "num_classes": C,
    }


def bilstm_crf_forward(prep, input_ids, input_mask=None, labels=None):
    """Mirrors BiLstmCrf.forward((input_ids, input_mask)) with labels=None."""
    # input_mask unused: matches nn.LSTM without pack_padded_sequence.
    del input_mask
    assert labels is None  # CRF path not implemented (see TODO at top)

    B, T = input_ids.shape
    H = prep["l0_f"][1].shape[0]
    C = prep["num_classes"]
    C_pad = prep["cls_b"].shape[1]
    B_pad = ((B + SUBLANE - 1) // SUBLANE) * SUBLANE   # sublane-dense batch

    # embedding gather (glue, plain JAX)
    emb = jnp.take(prep["embedding"], input_ids, axis=0)            # [B, T, E]
    E = emb.shape[-1]
    x = jnp.transpose(emb, (1, 0, 2))                               # [T, B, E]
    x = jnp.pad(x, ((0, 0), (0, B_pad - B), (0, 0)))                # [T, Bp, E]
    x2d = x.reshape(T * B_pad, E).astype(jnp.float32)               # [T*Bp, E]

    kernel = functools.partial(_bilstm_crf_kernel, T, B_pad, H)
    scores = pl.pallas_call(
        kernel,
        out_shape=jax.ShapeDtypeStruct((T * B_pad, C_pad), jnp.float32),
        scratch_shapes=[
            pltpu.VMEM((T * B_pad, 4 * H), jnp.float32),   # gates_x fwd
            pltpu.VMEM((T * B_pad, 4 * H), jnp.float32),   # gates_x bwd
            pltpu.VMEM((T * B_pad, H), jnp.float32),       # per-time fwd hidden
            pltpu.VMEM((T * B_pad, H), jnp.float32),       # per-time bwd hidden
            pltpu.VMEM((B_pad, H), jnp.float32),           # h fwd carry
            pltpu.VMEM((B_pad, H), jnp.float32),           # c fwd carry
            pltpu.VMEM((B_pad, H), jnp.float32),           # h bwd carry
            pltpu.VMEM((B_pad, H), jnp.float32),           # c bwd carry
        ],
    )(x2d,
      *prep["l0_f"], *prep["l0_b"], *prep["l1_f"], *prep["l1_b"],
      prep["cls_w"], prep["cls_b"])

    scores = scores.reshape(T, B_pad, C_pad)[:, :B, :C]             # strip padding
    return jnp.transpose(scores, (1, 0, 2))                         # [B, T, C]


# ----------------------------- pure-JAX reference ---------------------------


def _reference_forward(raw, input_ids):
    emb = jnp.take(raw["embedding"], input_ids, axis=0)
    x = jnp.transpose(emb, (1, 0, 2)).astype(jnp.float32)           # [T, B, E]

    def lstm_dir(x_tbe, p):
        w_ih, w_hh, b_ih, b_hh = [a.astype(jnp.float32) for a in p]
        Bq = x_tbe.shape[1]
        Hq = w_hh.shape[1]

        def step(carry, x_t):
            h, c = carry
            g = x_t @ w_ih.T + h @ w_hh.T + b_ih + b_hh
            i, f, gg, o = jnp.split(g, 4, axis=-1)
            c = jax.nn.sigmoid(f) * c + jax.nn.sigmoid(i) * jnp.tanh(gg)
            h = jax.nn.sigmoid(o) * jnp.tanh(c)
            return (h, c), h

        z = jnp.zeros((Bq, Hq), jnp.float32)
        _, hs = lax.scan(step, (z, z), x_tbe)
        return hs

    def bidir(x_tbe, pf, pb):
        h_f = lstm_dir(x_tbe, pf)
        h_b = jnp.flip(lstm_dir(jnp.flip(x_tbe, 0), pb), 0)
        return jnp.concatenate([h_f, h_b], axis=-1)

    x1 = bidir(x, raw["l0_f"], raw["l0_b"])
    x2 = bidir(x1, raw["l1_f"], raw["l1_b"])
    out = x2 @ raw["cls_w"].T.astype(jnp.float32) + raw["cls_b"].astype(jnp.float32)
    return jnp.transpose(out, (1, 0, 2))                            # [B, T, C]


# ----------------------------- param init ----------------------------------


def init_params(key, n_vocab, emb_size, hidden_size, num_classes):
    keys = jax.random.split(key, 32)
    ki = iter(keys)

    def unif(k, shape, bound):
        return jax.random.uniform(k, shape, jnp.float32, -bound, bound)

    H = hidden_size
    kH = 1.0 / math.sqrt(H)

    def lstm_dir(in_size):
        return (
            unif(next(ki), (4 * H, in_size), kH),   # w_ih
            unif(next(ki), (4 * H, H), kH),          # w_hh
            unif(next(ki), (4 * H,), kH),            # b_ih
            unif(next(ki), (4 * H,), kH),            # b_hh
        )

    kC = 1.0 / math.sqrt(2 * H)
    return {
        "embedding": jax.random.normal(next(ki), (n_vocab, emb_size), jnp.float32),
        "l0_f": lstm_dir(emb_size),
        "l0_b": lstm_dir(emb_size),
        "l1_f": lstm_dir(2 * H),
        "l1_b": lstm_dir(2 * H),
        "cls_w": unif(next(ki), (num_classes, 2 * H), kC),
        "cls_b": unif(next(ki), (num_classes,), kC),
    }


# ----------------------------- main -----------------------------------------


if __name__ == "__main__":
    N_VOCAB = 50
    EMB = 32          # config.embedding_size
    HID = 32          # config.hidden_size
    NUM_CLASSES = 5   # config.num_classes
    B, T = 2, 8

    key = jax.random.PRNGKey(0)
    k_param, k_ids = jax.random.split(key)

    raw_params = init_params(k_param, N_VOCAB, EMB, HID, NUM_CLASSES)
    prep_params = prepare_params(raw_params)
    input_ids = jax.random.randint(k_ids, (B, T), 0, N_VOCAB, dtype=jnp.int32)
    input_mask = jnp.ones((B, T), dtype=jnp.int32)

    tag_scores = bilstm_crf_forward(prep_params, input_ids, input_mask)
    tag_scores = jax.block_until_ready(tag_scores)

    assert tag_scores.shape == (B, T, NUM_CLASSES), tag_scores.shape
    assert tag_scores.dtype == jnp.float32
    assert bool(jnp.all(jnp.isfinite(tag_scores)))

    ref = jax.block_until_ready(_reference_forward(raw_params, input_ids))
    assert bool(jnp.allclose(tag_scores, ref, atol=1e-4, rtol=1e-4)), (
        float(jnp.max(jnp.abs(tag_scores - ref))))

    print("KERNEL_OK")
</pallas_src>

<mosaic_0001>
module attributes {stable_mosaic.version = 11 : i64} {
  func.func @_bilstm_crf_kernel(%arg0: memref<64x32xf32, #tpu.memory_space<vmem>>, %arg1: memref<32x128xf32, #tpu.memory_space<vmem>>, %arg2: memref<32x128xf32, #tpu.memory_space<vmem>>, %arg3: memref<1x128xf32, #tpu.memory_space<vmem>>, %arg4: memref<32x128xf32, #tpu.memory_space<vmem>>, %arg5: memref<32x128xf32, #tpu.memory_space<vmem>>, %arg6: memref<1x128xf32, #tpu.memory_space<vmem>>, %arg7: memref<64x128xf32, #tpu.memory_space<vmem>>, %arg8: memref<32x128xf32, #tpu.memory_space<vmem>>, %arg9: memref<1x128xf32, #tpu.memory_space<vmem>>, %arg10: memref<64x128xf32, #tpu.memory_space<vmem>>, %arg11: memref<32x128xf32, #tpu.memory_space<vmem>>, %arg12: memref<1x128xf32, #tpu.memory_space<vmem>>, %arg13: memref<64x128xf32, #tpu.memory_space<vmem>>, %arg14: memref<1x128xf32, #tpu.memory_space<vmem>>, %arg15: memref<64x128xf32, #tpu.memory_space<vmem>>, %arg16: memref<64x128xf32, #tpu.memory_space<vmem>>, %arg17: memref<64x128xf32, #tpu.memory_space<vmem>>, %arg18: memref<64x32xf32, #tpu.memory_space<vmem>>, %arg19: memref<64x32xf32, #tpu.memory_space<vmem>>, %arg20: memref<8x32xf32, #tpu.memory_space<vmem>>, %arg21: memref<8x32xf32, #tpu.memory_space<vmem>>, %arg22: memref<8x32xf32, #tpu.memory_space<vmem>>, %arg23: memref<8x32xf32, #tpu.memory_space<vmem>>) attributes {dimension_semantics = [], scalar_prefetch = 0 : i64, scratch_operands = 8 : i64, tpu.core_type = #tpu.core_type<tc>} {
    %c0 = arith.constant 0 : index
    %c0_0 = arith.constant 0 : index
    %0 = vector.load %arg0[%c0, %c0_0] : memref<64x32xf32, #tpu.memory_space<vmem>>, vector<64x32xf32>
    %c0_1 = arith.constant 0 : index
    %c0_2 = arith.constant 0 : index
    %1 = vector.load %arg1[%c0_1, %c0_2] : memref<32x128xf32, #tpu.memory_space<vmem>>, vector<32x128xf32>
    %cst = arith.constant dense<0.000000e+00> : vector<64x128xf32>
    %2 = tpu.matmul %0, %1, %cst {dimension_numbers = #tpu.dot_dimension_numbers<[1], [0], [0], [1], [0, 0, 1, 1], [], []>} : vector<64x32xf32>, vector<32x128xf32>, vector<64x128xf32> -> vector<64x128xf32>
    %c0_3 = arith.constant 0 : index
    %c0_4 = arith.constant 0 : index
    %3 = vector.load %arg3[%c0_3, %c0_4] : memref<1x128xf32, #tpu.memory_space<vmem>>, vector<1x128xf32>
    %4 = vector.broadcast %3 : vector<1x128xf32> to vector<64x128xf32>
    %5 = arith.addf %2, %4 : vector<64x128xf32>
    %c0_5 = arith.constant 0 : index
    %c0_6 = arith.constant 0 : index
    %6 = vector.load %arg16[%c0_5, %c0_6] : memref<64x128xf32, #tpu.memory_space<vmem>>, vector<64x128xf32>
    tpu.vector_store %arg16[%c0_5, %c0_6], %5 {strides = array<i32>} : memref<64x128xf32, #tpu.memory_space<vmem>>, vector<64x128xf32>,
    %c0_7 = arith.constant 0 : index
    %c0_8 = arith.constant 0 : index
    %7 = vector.load %arg4[%c0_7, %c0_8] : memref<32x128xf32, #tpu.memory_space<vmem>>, vector<32x128xf32>
    %cst_9 = arith.constant dense<0.000000e+00> : vector<64x128xf32>
    %8 = tpu.matmul %0, %7, %cst_9 {dimension_numbers = #tpu.dot_dimension_numbers<[1], [0], [0], [1], [0, 0, 1, 1], [], []>} : vector<64x32xf32>, vector<32x128xf32>, vector<64x128xf32> -> vector<64x128xf32>
    %c0_10 = arith.constant 0 : index
    %c0_11 = arith.constant 0 : index
    %9 = vector.load %arg6[%c0_10, %c0_11] : memref<1x128xf32, #tpu.memory_space<vmem>>, vector<1x128xf32>
    %10 = vector.broadcast %9 : vector<1x128xf32> to vector<64x128xf32>
    %11 = arith.addf %8, %10 : vector<64x128xf32>
    %c0_12 = arith.constant 0 : index
    %c0_13 = arith.constant 0 : index
    %12 = vector.load %arg17[%c0_12, %c0_13] : memref<64x128xf32, #tpu.memory_space<vmem>>, vector<64x128xf32>
    tpu.vector_store %arg17[%c0_12, %c0_13], %11 {strides = array<i32>} : memref<64x128xf32, #tpu.memory_space<vmem>>, vector<64x128xf32>,
    %cst_14 = arith.constant 0.000000e+00 : f32
    %13 = vector.broadcast %cst_14 : f32 to vector<8x32xf32>
    %c0_15 = arith.constant 0 : index
    %c0_16 = arith.constant 0 : index
    %14 = vector.load %arg20[%c0_15, %c0_16] : memref<8x32xf32, #tpu.memory_space<vmem>>, vector<8x32xf32>
    tpu.vector_store %arg20[%c0_15, %c0_16], %13 {strides = array<i32>} : memref<8x32xf32, #tpu.memory_space<vmem>>, vector<8x32xf32>,
    %cst_17 = arith.constant 0.000000e+00 : f32
    %15 = vector.broadcast %cst_17 : f32 to vector<8x32xf32>
    %c0_18 = arith.constant 0 : index
    %c0_19 = arith.constant 0 : index
    %16 = vector.load %arg21[%c0_18, %c0_19] : memref<8x32xf32, #tpu.memory_space<vmem>>, vector<8x32xf32>
    tpu.vector_store %arg21[%c0_18, %c0_19], %15 {strides = array<i32>} : memref<8x32xf32, #tpu.memory_space<vmem>>, vector<8x32xf32>,
    %cst_20 = arith.constant 0.000000e+00 : f32
    %17 = vector.broadcast %cst_20 : f32 to vector<8x32xf32>
    %c0_21 = arith.constant 0 : index
    %c0_22 = arith.constant 0 : index
    %18 = vector.load %arg22[%c0_21, %c0_22] : memref<8x32xf32, #tpu.memory_space<vmem>>, vector<8x32xf32>
    tpu.vector_store %arg22[%c0_21, %c0_22], %17 {strides = array<i32>} : memref<8x32xf32, #tpu.memory_space<vmem>>, vector<8x32xf32>,
    %cst_23 = arith.constant 0.000000e+00 : f32
    %19 = vector.broadcast %cst_23 : f32 to vector<8x32xf32>
    %c0_24 = arith.constant 0 : index
    %c0_25 = arith.constant 0 : index
    %20 = vector.load %arg23[%c0_24, %c0_25] : memref<8x32xf32, #tpu.memory_space<vmem>>, vector<8x32xf32>
    tpu.vector_store %arg23[%c0_24, %c0_25], %19 {strides = array<i32>} : memref<8x32xf32, #tpu.memory_space<vmem>>, vector<8x32xf32>,
    %c0_i32 = arith.constant 0 : i32
    %c8_i32 = arith.constant 8 : i32
    %21 = arith.muli %c0_i32, %c8_i32 : i32
    %22 = tpu.assume_multiple %21, 8 : i32
    %c7_i32 = arith.constant 7 : i32
    %23 = arith.subi %c7_i32, %c0_i32 : i32
    %c8_i32_26 = arith.constant 8 : i32
    %24 = arith.muli %23, %c8_i32_26 : i32
    %25 = tpu.assume_multiple %24, 8 : i32
    %26 = arith.index_cast %22 : i32 to index
    %c0_27 = arith.constant 0 : index
    %27 = vector.load %arg16[%26, %c0_27] : memref<64x128xf32, #tpu.memory_space<vmem>>, vector<8x128xf32>
    %c0_28 = arith.constant 0 : index
    %c0_29 = arith.constant 0 : index
    %28 = vector.load %arg20[%c0_28, %c0_29] : memref<8x32xf32, #tpu.memory_space<vmem>>, vector<8x32xf32>
    %c0_30 = arith.constant 0 : index
    %c0_31 = arith.constant 0 : index
    %29 = vector.load %arg2[%c0_30, %c0_31] : memref<32x128xf32, #tpu.memory_space<vmem>>, vector<32x128xf32>
    %cst_32 = arith.constant dense<0.000000e+00> : vector<8x128xf32>
    %30 = tpu.matmul %28, %29, %cst_32 {dimension_numbers = #tpu.dot_dimension_numbers<[1], [0], [0], [1], [0, 0, 1, 1], [], []>} : vector<8x32xf32>, vector<32x128xf32>, vector<8x128xf32> -> vector<8x128xf32>
    %31 = arith.addf %27, %30 : vector<8x128xf32>
    %c0_33 = arith.constant 0 : index
    %c0_34 = arith.constant 0 : index
    %32 = vector.load %arg21[%c0_33, %c0_34] : memref<8x32xf32, #tpu.memory_space<vmem>>, vector<8x32xf32>
    %33 = arith.negf %31 : vector<8x128xf32>
    %34 = math.exp %33 : vector<8x128xf32>
    %cst_35 = arith.constant 1.000000e+00 : f32
    %35 = vector.broadcast %cst_35 : f32 to vector<8x128xf32>
    %36 = arith.addf %35, %34 : vector<8x128xf32>
    %37 = arith.divf %35, %36 : vector<8x128xf32>
    %38 = math.tanh %31 : vector<8x128xf32>
    %39 = vector.extract_strided_slice %37 {offsets = [0, 0], sizes = [8, 32], strides = [1, 1]} : vector<8x128xf32> to vector<8x32xf32>
    %40 = vector.extract_strided_slice %37 {offsets = [0, 32], sizes = [8, 32], strides = [1, 1]} : vector<8x128xf32> to vector<8x32xf32>
    %41 = vector.extract_strided_slice %38 {offsets = [0, 64], sizes = [8, 32], strides = [1, 1]} : vector<8x128xf32> to vector<8x32xf32>
    %42 = vector.extract_strided_slice %37 {offsets = [0, 96], sizes = [8, 32], strides = [1, 1]} : vector<8x128xf32> to vector<8x32xf32>
    %43 = arith.mulf %40, %32 : vector<8x32xf32>
    %44 = arith.mulf %39, %41 : vector<8x32xf32>
    %45 = arith.addf %43, %44 : vector<8x32xf32>
    %46 = math.tanh %45 : vector<8x32xf32>
    %47 = arith.mulf %42, %46 : vector<8x32xf32>
    %c0_36 = arith.constant 0 : index
    %c0_37 = arith.constant 0 : index
    %48 = vector.load %arg20[%c0_36, %c0_37] : memref<8x32xf32, #tpu.memory_space<vmem>>, vector<8x32xf32>
    tpu.vector_store %arg20[%c0_36, %c0_37], %47 {strides = array<i32>} : memref<8x32xf32, #tpu.memory_space<vmem>>, vector<8x32xf32>,
    %c0_38 = arith.constant 0 : index
    %c0_39 = arith.constant 0 : index
    %49 = vector.load %arg21[%c0_38, %c0_39] : memref<8x32xf32, #tpu.memory_space<vmem>>, vector<8x32xf32>
    tpu.vector_store %arg21[%c0_38, %c0_39], %45 {strides = array<i32>} : memref<8x32xf32, #tpu.memory_space<vmem>>, vector<8x32xf32>,
    %50 = arith.index_cast %22 : i32 to index
    %c0_40 = arith.constant 0 : index
    %51 = vector.load %arg18[%50, %c0_40] : memref<64x32xf32, #tpu.memory_space<vmem>>, vector<8x32xf32>
    tpu.vector_store %arg18[%50, %c0_40], %47 {strides = array<i32>} : memref<64x32xf32, #tpu.memory_space<vmem>>, vector<8x32xf32>,
    %52 = arith.index_cast %25 : i32 to index
    %c0_41 = arith.constant 0 : index
    %53 = vector.load %arg17[%52, %c0_41] : memref<64x128xf32, #tpu.memory_space<vmem>>, vector<8x128xf32>
    %c0_42 = arith.constant 0 : index
    %c0_43 = arith.constant 0 : index
    %54 = vector.load %arg22[%c0_42, %c0_43] : memref<8x32xf32, #tpu.memory_space<vmem>>, vector<8x32xf32>
    %c0_44 = arith.constant 0 : index
    %c0_45 = arith.constant 0 : index
    %55 = vector.load %arg5[%c0_44, %c0_45] : memref<32x128xf32, #tpu.memory_space<vmem>>, vector<32x128xf32>
    %cst_46 = arith.constant dense<0.000000e+00> : vector<8x128xf32>
    %56 = tpu.matmul %54, %55, %cst_46 {dimension_numbers = #tpu.dot_dimension_numbers<[1], [0], [0], [1], [0, 0, 1, 1], [], []>} : vector<8x32xf32>, vector<32x128xf32>, vector<8x128xf32> -> vector<8x128xf32>
    %57 = arith.addf %53, %56 : vector<8x128xf32>
    %c0_47 = arith.constant 0 : index
    %c0_48 = arith.constant 0 : index
    %58 = vector.load %arg23[%c0_47, %c0_48] : memref<8x32xf32, #tpu.memory_space<vmem>>, vector<8x32xf32>
    %59 = arith.negf %57 : vector<8x128xf32>
    %60 = math.exp %59 : vector<8x128xf32>
    %cst_49 = arith.constant 1.000000e+00 : f32
    %61 = vector.broadcast %cst_49 : f32 to vector<8x128xf32>
    %62 = arith.addf %61, %60 : vector<8x128xf32>
    %63 = arith.divf %61, %62 : vector<8x128xf32>
    %64 = math.tanh %57 : vector<8x128xf32>
    %65 = vector.extract_strided_slice %63 {offsets = [0, 0], sizes = [8, 32], strides = [1, 1]} : vector<8x128xf32> to vector<8x32xf32>
    %66 = vector.extract_strided_slice %63 {offsets = [0, 32], sizes = [8, 32], strides = [1, 1]} : vector<8x128xf32> to vector<8x32xf32>
    %67 = vector.extract_strided_slice %64 {offsets = [0, 64], sizes = [8, 32], strides = [1, 1]} : vector<8x128xf32> to vector<8x32xf32>
    %68 = vector.extract_strided_slice %63 {offsets = [0, 96], sizes = [8, 32], strides = [1, 1]} : vector<8x128xf32> to vector<8x32xf32>
    %69 = arith.mulf %66, %58 : vector<8x32xf32>
    %70 = arith.mulf %65, %67 : vector<8x32xf32>
    %71 = arith.addf %69, %70 : vector<8x32xf32>
    %72 = math.tanh %71 : vector<8x32xf32>
    %73 = arith.mulf %68, %72 : vector<8x32xf32>
    %c0_50 = arith.constant 0 : index
    %c0_51 = arith.constant 0 : index
    %74 = vector.load %arg22[%c0_50, %c0_51] : memref<8x32xf32, #tpu.memory_space<vmem>>, vector<8x32xf32>
    tpu.vector_store %arg22[%c0_50, %c0_51], %73 {strides = array<i32>} : memref<8x32xf32, #tpu.memory_space<vmem>>, vector<8x32xf32>,
    %c0_52 = arith.constant 0 : index
    %c0_53 = arith.constant 0 : index
    %75 = vector.load %arg23[%c0_52, %c0_53] : memref<8x32xf32, #tpu.memory_space<vmem>>, vector<8x32xf32>
    tpu.vector_store %arg23[%c0_52, %c0_53], %71 {strides = array<i32>} : memref<8x32xf32, #tpu.memory_space<vmem>>, vector<8x32xf32>,
    %76 = arith.index_cast %25 : i32 to index
    %c0_54 = arith.constant 0 : index
    %77 = vector.load %arg19[%76, %c0_54] : memref<64x32xf32, #tpu.memory_space<vmem>>, vector<8x32xf32>
    tpu.vector_store %arg19[%76, %c0_54], %73 {strides = array<i32>} : memref<64x32xf32, #tpu.memory_space<vmem>>, vector<8x32xf32>,
    %c1_i32 = arith.constant 1 : i32
    %c8_i32_55 = arith.constant 8 : i32
    %78 = arith.muli %c1_i32, %c8_i32_55 : i32
    %79 = tpu.assume_multiple %78, 8 : i32
    %c7_i32_56 = arith.constant 7 : i32
    %80 = arith.subi %c7_i32_56, %c1_i32 : i32
    %c8_i32_57 = arith.constant 8 : i32
    %81 = arith.muli %80, %c8_i32_57 : i32
    %82 = tpu.assume_multiple %81, 8 : i32
    %83 = arith.index_cast %79 : i32 to index
    %c0_58 = arith.constant 0 : index
    %84 = vector.load %arg16[%83, %c0_58] : memref<64x128xf32, #tpu.memory_space<vmem>>, vector<8x128xf32>
    %c0_59 = arith.constant 0 : index
    %c0_60 = arith.constant 0 : index
    %85 = vector.load %arg20[%c0_59, %c0_60] : memref<8x32xf32, #tpu.memory_space<vmem>>, vector<8x32xf32>
    %c0_61 = arith.constant 0 : index
    %c0_62 = arith.constant 0 : index
    %86 = vector.load %arg2[%c0_61, %c0_62] : memref<32x128xf32, #tpu.memory_space<vmem>>, vector<32x128xf32>
    %cst_63 = arith.constant dense<0.000000e+00> : vector<8x128xf32>
    %87 = tpu.matmul %85, %86, %cst_63 {dimension_numbers = #tpu.dot_dimension_numbers<[1], [0], [0], [1], [0, 0, 1, 1], [], []>} : vector<8x32xf32>, vector<32x128xf32>, vector<8x128xf32> -> vector<8x128xf32>
    %88 = arith.addf %84, %87 : vector<8x128xf32>
    %c0_64 = arith.constant 0 : index
    %c0_65 = arith.constant 0 : index
    %89 = vector.load %arg21[%c0_64, %c0_65] : memref<8x32xf32, #tpu.memory_space<vmem>>, vector<8x32xf32>
    %90 = arith.negf %88 : vector<8x128xf32>
    %91 = math.exp %90 : vector<8x128xf32>
    %cst_66 = arith.constant 1.000000e+00 : f32
    %92 = vector.broadcast %cst_66 : f32 to vector<8x128xf32>
    %93 = arith.addf %92, %91 : vector<8x128xf32>
    %94 = arith.divf %92, %93 : vector<8x128xf32>
    %95 = math.tanh %88 : vector<8x128xf32>
    %96 = vector.extract_strided_slice %94 {offsets = [0, 0], sizes = [8, 32], strides = [1, 1]} : vector<8x128xf32> to vector<8x32xf32>
    %97 = vector.extract_strided_slice %94 {offsets = [0, 32], sizes = [8, 32], strides = [1, 1]} : vector<8x128xf32> to vector<8x32xf32>
    %98 = vector.extract_strided_slice %95 {offsets = [0, 64], sizes = [8, 32], strides = [1, 1]} : vector<8x128xf32> to vector<8x32xf32>
    %99 = vector.extract_strided_slice %94 {offsets = [0, 96], sizes = [8, 32], strides = [1, 1]} : vector<8x128xf32> to vector<8x32xf32>
    %100 = arith.mulf %97, %89 : vector<8x32xf32>
    %101 = arith.mulf %96, %98 : vector<8x32xf32>
    %102 = arith.addf %100, %101 : vector<8x32xf32>
    %103 = math.tanh %102 : vector<8x32xf32>
    %104 = arith.mulf %99, %103 : vector<8x32xf32>
    %c0_67 = arith.constant 0 : index
    %c0_68 = arith.constant 0 : index
    %105 = vector.load %arg20[%c0_67, %c0_68] : memref<8x32xf32, #tpu.memory_space<vmem>>, vector<8x32xf32>
    tpu.vector_store %arg20[%c0_67, %c0_68], %104 {strides = array<i32>} : memref<8x32xf32, #tpu.memory_space<vmem>>, vector<8x32xf32>,
    %c0_69 = arith.constant 0 : index
    %c0_70 = arith.constant 0 : index
    %106 = vector.load %arg21[%c0_69, %c0_70] : memref<8x32xf32, #tpu.memory_space<vmem>>, vector<8x32xf32>
    tpu.vector_store %arg21[%c0_69, %c0_70], %102 {strides = array<i32>} : memref<8x32xf32, #tpu.memory_space<vmem>>, vector<8x32xf32>,
    %107 = arith.index_cast %79 : i32 to index
    %c0_71 = arith.constant 0 : index
    %108 = vector.load %arg18[%107, %c0_71] : memref<64x32xf32, #tpu.memory_space<vmem>>, vector<8x32xf32>
    tpu.vector_store %arg18[%107, %c0_71], %104 {strides = array<i32>} : memref<64x32xf32, #tpu.memory_space<vmem>>, vector<8x32xf32>,
    %109 = arith.index_cast %82 : i32 to index
    %c0_72 = arith.constant 0 : index
    %110 = vector.load %arg17[%109, %c0_72] : memref<64x128xf32, #tpu.memory_space<vmem>>, vector<8x128xf32>
    %c0_73 = arith.constant 0 : index
    %c0_74 = arith.constant 0 : index
    %111 = vector.load %arg22[%c0_73, %c0_74] : memref<8x32xf32, #tpu.memory_space<vmem>>, vector<8x32xf32>
    %c0_75 = arith.constant 0 : index
    %c0_76 = arith.constant 0 : index
    %112 = vector.load %arg5[%c0_75, %c0_76] : memref<32x128xf32, #tpu.memory_space<vmem>>, vector<32x128xf32>
    %cst_77 = arith.constant dense<0.000000e+00> : vector<8x128xf32>
    %113 = tpu.matmul %111, %112, %cst_77 {dimension_numbers = #tpu.dot_dimension_numbers<[1], [0], [0], [1], [0, 0, 1, 1], [], []>} : vector<8x32xf32>, vector<32x128xf32>, vector<8x128xf32> -> vector<8x128xf32>
    %114 = arith.addf %110, %113 : vector<8x128xf32>
    %c0_78 = arith.constant 0 : index
    %c0_79 = arith.constant 0 : index
    %115 = vector.load %arg23[%c0_78, %c0_79] : memref<8x32xf32, #tpu.memory_space<vmem>>, vector<8x32xf32>
    %116 = arith.negf %114 : vector<8x128xf32>
    %117 = math.exp %116 : vector<8x128xf32>
    %cst_80 = arith.constant 1.000000e+00 : f32
    %118 = vector.broadcast %cst_80 : f32 to vector<8x128xf32>
    %119 = arith.addf %118, %117 : vector<8x128xf32>
    %120 = arith.divf %118, %119 : vector<8x128xf32>
    %121 = math.tanh %114 : vector<8x128xf32>
    %122 = vector.extract_strided_slice %120 {offsets = [0, 0], sizes = [8, 32], strides = [1, 1]} : vector<8x128xf32> to vector<8x32xf32>
    %123 = vector.extract_strided_slice %120 {offsets = [0, 32], sizes = [8, 32], strides = [1, 1]} : vector<8x128xf32> to vector<8x32xf32>
    %124 = vector.extract_strided_slice %121 {offsets = [0, 64], sizes = [8, 32], strides = [1, 1]} : vector<8x128xf32> to vector<8x32xf32>
    %125 = vector.extract_strided_slice %120 {offsets = [0, 96], sizes = [8, 32], strides = [1, 1]} : vector<8x128xf32> to vector<8x32xf32>
    %126 = arith.mulf %123, %115 : vector<8x32xf32>
    %127 = arith.mulf %122, %124 : vector<8x32xf32>
    %128 = arith.addf %126, %127 : vector<8x32xf32>
    %129 = math.tanh %128 : vector<8x32xf32>
    %130 = arith.mulf %125, %129 : vector<8x32xf32>
    %c0_81 = arith.constant 0 : index
    %c0_82 = arith.constant 0 : index
    %131 = vector.load %arg22[%c0_81, %c0_82] : memref<8x32xf32, #tpu.memory_space<vmem>>, vector<8x32xf32>
    tpu.vector_store %arg22[%c0_81, %c0_82], %130 {strides = array<i32>} : memref<8x32xf32, #tpu.memory_space<vmem>>, vector<8x32xf32>,
    %c0_83 = arith.constant 0 : index
    %c0_84 = arith.constant 0 : index
    %132 = vector.load %arg23[%c0_83, %c0_84] : memref<8x32xf32, #tpu.memory_space<vmem>>, vector<8x32xf32>
    tpu.vector_store %arg23[%c0_83, %c0_84], %128 {strides = array<i32>} : memref<8x32xf32, #tpu.memory_space<vmem>>, vector<8x32xf32>,
    %133 = arith.index_cast %82 : i32 to index
    %c0_85 = arith.constant 0 : index
    %134 = vector.load %arg19[%133, %c0_85] : memref<64x32xf32, #tpu.memory_space<vmem>>, vector<8x32xf32>
    tpu.vector_store %arg19[%133, %c0_85], %130 {strides = array<i32>} : memref<64x32xf32, #tpu.memory_space<vmem>>, vector<8x32xf32>,
    %c2_i32 = arith.constant 2 : i32
    %c8_i32_86 = arith.constant 8 : i32
    %135 = arith.muli %c2_i32, %c8_i32_86 : i32
    %136 = tpu.assume_multiple %135, 8 : i32
    %c7_i32_87 = arith.constant 7 : i32
    %137 = arith.subi %c7_i32_87, %c2_i32 : i32
    %c8_i32_88 = arith.constant 8 : i32
    %138 = arith.muli %137, %c8_i32_88 : i32
    %139 = tpu.assume_multiple %138, 8 : i32
    %140 = arith.index_cast %136 : i32 to index
    %c0_89 = arith.constant 0 : index
    %141 = vector.load %arg16[%140, %c0_89] : memref<64x128xf32, #tpu.memory_space<vmem>>, vector<8x128xf32>
    %c0_90 = arith.constant 0 : index
    %c0_91 = arith.constant 0 : index
    %142 = vector.load %arg20[%c0_90, %c0_91] : memref<8x32xf32, #tpu.memory_space<vmem>>, vector<8x32xf32>
    %c0_92 = arith.constant 0 : index
    %c0_93 = arith.constant 0 : index
    %143 = vector.load %arg2[%c0_92, %c0_93] : memref<32x128xf32, #tpu.memory_space<vmem>>, vector<32x128xf32>
    %cst_94 = arith.constant dense<0.000000e+00> : vector<8x128xf32>
    %144 = tpu.matmul %142, %143, %cst_94 {dimension_numbers = #tpu.dot_dimension_numbers<[1], [0], [0], [1], [0, 0, 1, 1], [], []>} : vector<8x32xf32>, vector<32x128xf32>, vector<8x128xf32> -> vector<8x128xf32>
    %145 = arith.addf %141, %144 : vector<8x128xf32>
    %c0_95 = arith.constant 0 : index
    %c0_96 = arith.constant 0 : index
    %146 = vector.load %arg21[%c0_95, %c0_96] : memref<8x32xf32, #tpu.memory_space<vmem>>, vector<8x32xf32>
    %147 = arith.negf %145 : vector<8x128xf32>
    %148 = math.exp %147 : vector<8x128xf32>
    %cst_97 = arith.constant 1.000000e+00 : f32
    %149 = vector.broadcast %cst_97 : f32 to vector<8x128xf32>
    %150 = arith.addf %149, %148 : vector<8x128xf32>
    %151 = arith.divf %149, %150 : vector<8x128xf32>
    %152 = math.tanh %145 : vector<8x128xf32>
    %153 = vector.extract_strided_slice %151 {offsets = [0, 0], sizes = [8, 32], strides = [1, 1]} : vector<8x128xf32> to vector<8x32xf32>
    %154 = vector.extract_strided_slice %151 {offsets = [0, 32], sizes = [8, 32], strides = [1, 1]} : vector<8x128xf32> to vector<8x32xf32>
    %155 = vector.extract_strided_slice %152 {offsets = [0, 64], sizes = [8, 32], strides = [1, 1]} : vector<8x128xf32> to vector<8x32xf32>
    %156 = vector.extract_strided_slice %151 {offsets = [0, 96], sizes = [8, 32], strides = [1, 1]} : vector<8x128xf32> to vector<8x32xf32>
    %157 = arith.mulf %154, %146 : vector<8x32xf32>
    %158 = arith.mulf %153, %155 : vector<8x32xf32>
    %159 = arith.addf %157, %158 : vector<8x32xf32>
    %160 = math.tanh %159 : vector<8x32xf32>
    %161 = arith.mulf %156, %160 : vector<8x32xf32>
    %c0_98 = arith.constant 0 : index
    %c0_99 = arith.constant 0 : index
    %162 = vector.load %arg20[%c0_98, %c0_99] : memref<8x32xf32, #tpu.memory_space<vmem>>, vector<8x32xf32>
    tpu.vector_store %arg20[%c0_98, %c0_99], %161 {strides = array<i32>} : memref<8x32xf32, #tpu.memory_space<vmem>>, vector<8x32xf32>,
    %c0_100 = arith.constant 0 : index
    %c0_101 = arith.constant 0 : index
    %163 = vector.load %arg21[%c0_100, %c0_101] : memref<8x32xf32, #tpu.memory_space<vmem>>, vector<8x32xf32>
    tpu.vector_store %arg21[%c0_100, %c0_101], %159 {strides = array<i32>} : memref<8x32xf32, #tpu.memory_space<vmem>>, vector<8x32xf32>,
    %164 = arith.index_cast %136 : i32 to index
    %c0_102 = arith.constant 0 : index
    %165 = vector.load %arg18[%164, %c0_102] : memref<64x32xf32, #tpu.memory_space<vmem>>, vector<8x32xf32>
    tpu.vector_store %arg18[%164, %c0_102], %161 {strides = array<i32>} : memref<64x32xf32, #tpu.memory_space<vmem>>, vector<8x32xf32>,
    %166 = arith.index_cast %139 : i32 to index
    %c0_103 = arith.constant 0 : index
    %167 = vector.load %arg17[%166, %c0_103] : memref<64x128xf32, #tpu.memory_space<vmem>>, vector<8x128xf32>
    %c0_104 = arith.constant 0 : index
    %c0_105 = arith.constant 0 : index
    %168 = vector.load %arg22[%c0_104, %c0_105] : memref<8x32xf32, #tpu.memory_space<vmem>>, vector<8x32xf32>
    %c0_106 = arith.constant 0 : index
    %c0_107 = arith.constant 0 : index
    %169 = vector.load %arg5[%c0_106, %c0_107] : memref<32x128xf32, #tpu.memory_space<vmem>>, vector<32x128xf32>
    %cst_108 = arith.constant dense<0.000000e+00> : vector<8x128xf32>
    %170 = tpu.matmul %168, %169, %cst_108 {dimension_numbers = #tpu.dot_dimension_numbers<[1], [0], [0], [1], [0, 0, 1, 1], [], []>} : vector<8x32xf32>, vector<32x128xf32>, vector<8x128xf32> -> vector<8x128xf32>
    %171 = arith.addf %167, %170 : vector<8x128xf32>
    %c0_109 = arith.constant 0 : index
    %c0_110 = arith.constant 0 : index
    %172 = vector.load %arg23[%c0_109, %c0_110] : memref<8x32xf32, #tpu.memory_space<vmem>>, vector<8x32xf32>
    %173 = arith.negf %171 : vector<8x128xf32>
    %174 = math.exp %173 : vector<8x128xf32>
    %cst_111 = arith.constant 1.000000e+00 : f32
    %175 = vector.broadcast %cst_111 : f32 to vector<8x128xf32>
    %176 = arith.addf %175, %174 : vector<8x128xf32>
    %177 = arith.divf %175, %176 : vector<8x128xf32>
    %178 = math.tanh %171 : vector<8x128xf32>
    %179 = vector.extract_strided_slice %177 {offsets = [0, 0], sizes = [8, 32], strides = [1, 1]} : vector<8x128xf32> to vector<8x32xf32>
    %180 = vector.extract_strided_slice %177 {offsets = [0, 32], sizes = [8, 32], strides = [1, 1]} : vector<8x128xf32> to vector<8x32xf32>
    %181 = vector.extract_strided_slice %178 {offsets = [0, 64], sizes = [8, 32], strides = [1, 1]} : vector<8x128xf32> to vector<8x32xf32>
    %182 = vector.extract_strided_slice %177 {offsets = [0, 96], sizes = [8, 32], strides = [1, 1]} : vector<8x128xf32> to vector<8x32xf32>
    %183 = arith.mulf %180, %172 : vector<8x32xf32>
    %184 = arith.mulf %179, %181 : vector<8x32xf32>
    %185 = arith.addf %183, %184 : vector<8x32xf32>
    %186 = math.tanh %185 : vector<8x32xf32>
    %187 = arith.mulf %182, %186 : vector<8x32xf32>
    %c0_112 = arith.constant 0 : index
    %c0_113 = arith.constant 0 : index
    %188 = vector.load %arg22[%c0_112, %c0_113] : memref<8x32xf32, #tpu.memory_space<vmem>>, vector<8x32xf32>
    tpu.vector_store %arg22[%c0_112, %c0_113], %187 {strides = array<i32>} : memref<8x32xf32, #tpu.memory_space<vmem>>, vector<8x32xf32>,
    %c0_114 = arith.constant 0 : index
    %c0_115 = arith.constant 0 : index
    %189 = vector.load %arg23[%c0_114, %c0_115] : memref<8x32xf32, #tpu.memory_space<vmem>>, vector<8x32xf32>
    tpu.vector_store %arg23[%c0_114, %c0_115], %185 {strides = array<i32>} : memref<8x32xf32, #tpu.memory_space<vmem>>, vector<8x32xf32>,
    %190 = arith.index_cast %139 : i32 to index
    %c0_116 = arith.constant 0 : index
    %191 = vector.load %arg19[%190, %c0_116] : memref<64x32xf32, #tpu.memory_space<vmem>>, vector<8x32xf32>
    tpu.vector_store %arg19[%190, %c0_116], %187 {strides = array<i32>} : memref<64x32xf32, #tpu.memory_space<vmem>>, vector<8x32xf32>,
    %c3_i32 = arith.constant 3 : i32
    %c8_i32_117 = arith.constant 8 : i32
    %192 = arith.muli %c3_i32, %c8_i32_117 : i32
    %193 = tpu.assume_multiple %192, 8 : i32
    %c7_i32_118 = arith.constant 7 : i32
    %194 = arith.subi %c7_i32_118, %c3_i32 : i32
    %c8_i32_119 = arith.constant 8 : i32
    %195 = arith.muli %194, %c8_i32_119 : i32
    %196 = tpu.assume_multiple %195, 8 : i32
    %197 = arith.index_cast %193 : i32 to index
    %c0_120 = arith.constant 0 : index
    %198 = vector.load %arg16[%197, %c0_120] : memref<64x128xf32, #tpu.memory_space<vmem>>, vector<8x128xf32>
    %c0_121 = arith.constant 0 : index
    %c0_122 = arith.constant 0 : index
    %199 = vector.load %arg20[%c0_121, %c0_122] : memref<8x32xf32, #tpu.memory_space<vmem>>, vector<8x32xf32>
    %c0_123 = arith.constant 0 : index
    %c0_124 = arith.constant 0 : index
    %200 = vector.load %arg2[%c0_123, %c0_124] : memref<32x128xf32, #tpu.memory_space<vmem>>, vector<32x128xf32>
    %cst_125 = arith.constant dense<0.000000e+00> : vector<8x128xf32>
    %201 = tpu.matmul %199, %200, %cst_125 {dimension_numbers = #tpu.dot_dimension_numbers<[1], [0], [0], [1], [0, 0, 1, 1], [], []>} : vector<8x32xf32>, vector<32x128xf32>, vector<8x128xf32> -> vector<8x128xf32>
    %202 = arith.addf %198, %201 : vector<8x128xf32>
    %c0_126 = arith.constant 0 : index
    %c0_127 = arith.constant 0 : index
    %203 = vector.load %arg21[%c0_126, %c0_127] : memref<8x32xf32, #tpu.memory_space<vmem>>, vector<8x32xf32>
    %204 = arith.negf %202 : vector<8x128xf32>
    %205 = math.exp %204 : vector<8x128xf32>
    %cst_128 = arith.constant 1.000000e+00 : f32
    %206 = vector.broadcast %cst_128 : f32 to vector<8x128xf32>
    %207 = arith.addf %206, %205 : vector<8x128xf32>
    %208 = arith.divf %206, %207 : vector<8x128xf32>
    %209 = math.tanh %202 : vector<8x128xf32>
    %210 = vector.extract_strided_slice %208 {offsets = [0, 0], sizes = [8, 32], strides = [1, 1]} : vector<8x128xf32> to vector<8x32xf32>
    %211 = vector.extract_strided_slice %208 {offsets = [0, 32], sizes = [8, 32], strides = [1, 1]} : vector<8x128xf32> to vector<8x32xf32>
    %212 = vector.extract_strided_slice %209 {offsets = [0, 64], sizes = [8, 32], strides = [1, 1]} : vector<8x128xf32> to vector<8x32xf32>
    %213 = vector.extract_strided_slice %208 {offsets = [0, 96], sizes = [8, 32], strides = [1, 1]} : vector<8x128xf32> to vector<8x32xf32>
    %214 = arith.mulf %211, %203 : vector<8x32xf32>
    %215 = arith.mulf %210, %212 : vector<8x32xf32>
    %216 = arith.addf %214, %215 : vector<8x32xf32>
    %217 = math.tanh %216 : vector<8x32xf32>
    %218 = arith.mulf %213, %217 : vector<8x32xf32>
    %c0_129 = arith.constant 0 : index
    %c0_130 = arith.constant 0 : index
    %219 = vector.load %arg20[%c0_129, %c0_130] : memref<8x32xf32, #tpu.memory_space<vmem>>, vector<8x32xf32>
    tpu.vector_store %arg20[%c0_129, %c0_130], %218 {strides = array<i32>} : memref<8x32xf32, #tpu.memory_space<vmem>>, vector<8x32xf32>,
    %c0_131 = arith.constant 0 : index
    %c0_132 = arith.constant 0 : index
    %220 = vector.load %arg21[%c0_131, %c0_132] : memref<8x32xf32, #tpu.memory_space<vmem>>, vector<8x32xf32>
    tpu.vector_store %arg21[%c0_131, %c0_132], %216 {strides = array<i32>} : memref<8x32xf32, #tpu.memory_space<vmem>>, vector<8x32xf32>,
    %221 = arith.index_cast %193 : i32 to index
    %c0_133 = arith.constant 0 : index
    %222 = vector.load %arg18[%221, %c0_133] : memref<64x32xf32, #tpu.memory_space<vmem>>, vector<8x32xf32>
    tpu.vector_store %arg18[%221, %c0_133], %218 {strides = array<i32>} : memref<64x32xf32, #tpu.memory_space<vmem>>, vector<8x32xf32>,
    %223 = arith.index_cast %196 : i32 to index
    %c0_134 = arith.constant 0 : index
    %224 = vector.load %arg17[%223, %c0_134] : memref<64x128xf32, #tpu.memory_space<vmem>>, vector<8x128xf32>
    %c0_135 = arith.constant 0 : index
    %c0_136 = arith.constant 0 : index
    %225 = vector.load %arg22[%c0_135, %c0_136] : memref<8x32xf32, #tpu.memory_space<vmem>>, vector<8x32xf32>
    %c0_137 = arith.constant 0 : index
    %c0_138 = arith.constant 0 : index
    %226 = vector.load %arg5[%c0_137, %c0_138] : memref<32x128xf32, #tpu.memory_space<vmem>>, vector<32x128xf32>
    %cst_139 = arith.constant dense<0.000000e+00> : vector<8x128xf32>
    %227 = tpu.matmul %225, %226, %cst_139 {dimension_numbers = #tpu.dot_dimension_numbers<[1], [0], [0], [1], [0, 0, 1, 1], [], []>} : vector<8x32xf32>, vector<32x128xf32>, vector<8x128xf32> -> vector<8x128xf32>
    %228 = arith.addf %224, %227 : vector<8x128xf32>
    %c0_140 = arith.constant 0 : index
    %c0_141 = arith.constant 0 : index
    %229 = vector.load %arg23[%c0_140, %c0_141] : memref<8x32xf32, #tpu.memory_space<vmem>>, vector<8x32xf32>
    %230 = arith.negf %228 : vector<8x128xf32>
    %231 = math.exp %230 : vector<8x128xf32>
    %cst_142 = arith.constant 1.000000e+00 : f32
    %232 = vector.broadcast %cst_142 : f32 to vector<8x128xf32>
    %233 = arith.addf %232, %231 : vector<8x128xf32>
    %234 = arith.divf %232, %233 : vector<8x128xf32>
    %235 = math.tanh %228 : vector<8x128xf32>
    %236 = vector.extract_strided_slice %234 {offsets = [0, 0], sizes = [8, 32], strides = [1, 1]} : vector<8x128xf32> to vector<8x32xf32>
    %237 = vector.extract_strided_slice %234 {offsets = [0, 32], sizes = [8, 32], strides = [1, 1]} : vector<8x128xf32> to vector<8x32xf32>
    %238 = vector.extract_strided_slice %235 {offsets = [0, 64], sizes = [8, 32], strides = [1, 1]} : vector<8x128xf32> to vector<8x32xf32>
    %239 = vector.extract_strided_slice %234 {offsets = [0, 96], sizes = [8, 32], strides = [1, 1]} : vector<8x128xf32> to vector<8x32xf32>
    %240 = arith.mulf %237, %229 : vector<8x32xf32>
    %241 = arith.mulf %236, %238 : vector<8x32xf32>
    %242 = arith.addf %240, %241 : vector<8x32xf32>
    %243 = math.tanh %242 : vector<8x32xf32>
    %244 = arith.mulf %239, %243 : vector<8x32xf32>
    %c0_143 = arith.constant 0 : index
    %c0_144 = arith.constant 0 : index
    %245 = vector.load %arg22[%c0_143, %c0_144] : memref<8x32xf32, #tpu.memory_space<vmem>>, vector<8x32xf32>
    tpu.vector_store %arg22[%c0_143, %c0_144], %244 {strides = array<i32>} : memref<8x32xf32, #tpu.memory_space<vmem>>, vector<8x32xf32>,
    %c0_145 = arith.constant 0 : index
    %c0_146 = arith.constant 0 : index
    %246 = vector.load %arg23[%c0_145, %c0_146] : memref<8x32xf32, #tpu.memory_space<vmem>>, vector<8x32xf32>
    tpu.vector_store %arg23[%c0_145, %c0_146], %242 {strides = array<i32>} : memref<8x32xf32, #tpu.memory_space<vmem>>, vector<8x32xf32>,
    %247 = arith.index_cast %196 : i32 to index
    %c0_147 = arith.constant 0 : index
    %248 = vector.load %arg19[%247, %c0_147] : memref<64x32xf32, #tpu.memory_space<vmem>>, vector<8x32xf32>
    tpu.vector_store %arg19[%247, %c0_147], %244 {strides = array<i32>} : memref<64x32xf32, #tpu.memory_space<vmem>>, vector<8x32xf32>,
    %c4_i32 = arith.constant 4 : i32
    %c8_i32_148 = arith.constant 8 : i32
    %249 = arith.muli %c4_i32, %c8_i32_148 : i32
    %250 = tpu.assume_multiple %249, 8 : i32
    %c7_i32_149 = arith.constant 7 : i32
    %251 = arith.subi %c7_i32_149, %c4_i32 : i32
    %c8_i32_150 = arith.constant 8 : i32
    %252 = arith.muli %251, %c8_i32_150 : i32
    %253 = tpu.assume_multiple %252, 8 : i32
    %254 = arith.index_cast %250 : i32 to index
    %c0_151 = arith.constant 0 : index
    %255 = vector.load %arg16[%254, %c0_151] : memref<64x128xf32, #tpu.memory_space<vmem>>, vector<8x128xf32>
    %c0_152 = arith.constant 0 : index
    %c0_153 = arith.constant 0 : index
    %256 = vector.load %arg20[%c0_152, %c0_153] : memref<8x32xf32, #tpu.memory_space<vmem>>, vector<8x32xf32>
    %c0_154 = arith.constant 0 : index
    %c0_155 = arith.constant 0 : index
    %257 = vector.load %arg2[%c0_154, %c0_155] : memref<32x128xf32, #tpu.memory_space<vmem>>, vector<32x128xf32>
    %cst_156 = arith.constant dense<0.000000e+00> : vector<8x128xf32>
    %258 = tpu.matmul %256, %257, %cst_156 {dimension_numbers = #tpu.dot_dimension_numbers<[1], [0], [0], [1], [0, 0, 1, 1], [], []>} : vector<8x32xf32>, vector<32x128xf32>, vector<8x128xf32> -> vector<8x128xf32>
    %259 = arith.addf %255, %258 : vector<8x128xf32>
    %c0_157 = arith.constant 0 : index
    %c0_158 = arith.constant 0 : index
    %260 = vector.load %arg21[%c0_157, %c0_158] : memref<8x32xf32, #tpu.memory_space<vmem>>, vector<8x32xf32>
    %261 = arith.negf %259 : vector<8x128xf32>
    %262 = math.exp %261 : vector<8x128xf32>
    %cst_159 = arith.constant 1.000000e+00 : f32
    %263 = vector.broadcast %cst_159 : f32 to vector<8x128xf32>
    %264 = arith.addf %263, %262 : vector<8x128xf32>
    %265 = arith.divf %263, %264 : vector<8x128xf32>
    %266 = math.tanh %259 : vector<8x128xf32>
    %267 = vector.extract_strided_slice %265 {offsets = [0, 0], sizes = [8, 32], strides = [1, 1]} : vector<8x128xf32> to vector<8x32xf32>
    %268 = vector.extract_strided_slice %265 {offsets = [0, 32], sizes = [8, 32], strides = [1, 1]} : vector<8x128xf32> to vector<8x32xf32>
    %269 = vector.extract_strided_slice %266 {offsets = [0, 64], sizes = [8, 32], strides = [1, 1]} : vector<8x128xf32> to vector<8x32xf32>
    %270 = vector.extract_strided_slice %265 {offsets = [0, 96], sizes = [8, 32], strides = [1, 1]} : vector<8x128xf32> to vector<8x32xf32>
    %271 = arith.mulf %268, %260 : vector<8x32xf32>
    %272 = arith.mulf %267, %269 : vector<8x32xf32>
    %273 = arith.addf %271, %272 : vector<8x32xf32>
    %274 = math.tanh %273 : vector<8x32xf32>
    %275 = arith.mulf %270, %274 : vector<8x32xf32>
    %c0_160 = arith.constant 0 : index
    %c0_161 = arith.constant 0 : index
    %276 = vector.load %arg20[%c0_160, %c0_161] : memref<8x32xf32, #tpu.memory_space<vmem>>, vector<8x32xf32>
    tpu.vector_store %arg20[%c0_160, %c0_161], %275 {strides = array<i32>} : memref<8x32xf32, #tpu.memory_space<vmem>>, vector<8x32xf32>,
    %c0_162 = arith.constant 0 : index
    %c0_163 = arith.constant 0 : index
    %277 = vector.load %arg21[%c0_162, %c0_163] : memref<8x32xf32, #tpu.memory_space<vmem>>, vector<8x32xf32>
    tpu.vector_store %arg21[%c0_162, %c0_163], %273 {strides = array<i32>} : memref<8x32xf32, #tpu.memory_space<vmem>>, vector<8x32xf32>,
    %278 = arith.index_cast %250 : i32 to index
    %c0_164 = arith.constant 0 : index
    %279 = vector.load %arg18[%278, %c0_164] : memref<64x32xf32, #tpu.memory_space<vmem>>, vector<8x32xf32>
    tpu.vector_store %arg18[%278, %c0_164], %275 {strides = array<i32>} : memref<64x32xf32, #tpu.memory_space<vmem>>, vector<8x32xf32>,
    %280 = arith.index_cast %253 : i32 to index
    %c0_165 = arith.constant 0 : index
    %281 = vector.load %arg17[%280, %c0_165] : memref<64x128xf32, #tpu.memory_space<vmem>>, vector<8x128xf32>
    %c0_166 = arith.constant 0 : index
    %c0_167 = arith.constant 0 : index
    %282 = vector.load %arg22[%c0_166, %c0_167] : memref<8x32xf32, #tpu.memory_space<vmem>>, vector<8x32xf32>
    %c0_168 = arith.constant 0 : index
    %c0_169 = arith.constant 0 : index
    %283 = vector.load %arg5[%c0_168, %c0_169] : memref<32x128xf32, #tpu.memory_space<vmem>>, vector<32x128xf32>
    %cst_170 = arith.constant dense<0.000000e+00> : vector<8x128xf32>
    %284 = tpu.matmul %282, %283, %cst_170 {dimension_numbers = #tpu.dot_dimension_numbers<[1], [0], [0], [1], [0, 0, 1, 1], [], []>} : vector<8x32xf32>, vector<32x128xf32>, vector<8x128xf32> -> vector<8x128xf32>
    %285 = arith.addf %281, %284 : vector<8x128xf32>
    %c0_171 = arith.constant 0 : index
    %c0_172 = arith.constant 0 : index
    %286 = vector.load %arg23[%c0_171, %c0_172] : memref<8x32xf32, #tpu.memory_space<vmem>>, vector<8x32xf32>
    %287 = arith.negf %285 : vector<8x128xf32>
    %288 = math.exp %287 : vector<8x128xf32>
    %cst_173 = arith.constant 1.000000e+00 : f32
    %289 = vector.broadcast %cst_173 : f32 to vector<8x128xf32>
    %290 = arith.addf %289, %288 : vector<8x128xf32>
    %291 = arith.divf %289, %290 : vector<8x128xf32>
    %292 = math.tanh %285 : vector<8x128xf32>
    %293 = vector.extract_strided_slice %291 {offsets = [0, 0], sizes = [8, 32], strides = [1, 1]} : vector<8x128xf32> to vector<8x32xf32>
    %294 = vector.extract_strided_slice %291 {offsets = [0, 32], sizes = [8, 32], strides = [1, 1]} : vector<8x128xf32> to vector<8x32xf32>
    %295 = vector.extract_strided_slice %292 {offsets = [0, 64], sizes = [8, 32], strides = [1, 1]} : vector<8x128xf32> to vector<8x32xf32>
    %296 = vector.extract_strided_slice %291 {offsets = [0, 96], sizes = [8, 32], strides = [1, 1]} : vector<8x128xf32> to vector<8x32xf32>
    %297 = arith.mulf %294, %286 : vector<8x32xf32>
    %298 = arith.mulf %293, %295 : vector<8x32xf32>
    %299 = arith.addf %297, %298 : vector<8x32xf32>
    %300 = math.tanh %299 : vector<8x32xf32>
    %301 = arith.mulf %296, %300 : vector<8x32xf32>
    %c0_174 = arith.constant 0 : index
    %c0_175 = arith.constant 0 : index
    %302 = vector.load %arg22[%c0_174, %c0_175] : memref<8x32xf32, #tpu.memory_space<vmem>>, vector<8x32xf32>
    tpu.vector_store %arg22[%c0_174, %c0_175], %301 {strides = array<i32>} : memref<8x32xf32, #tpu.memory_space<vmem>>, vector<8x32xf32>,
    %c0_176 = arith.constant 0 : index
    %c0_177 = arith.constant 0 : index
    %303 = vector.load %arg23[%c0_176, %c0_177] : memref<8x32xf32, #tpu.memory_space<vmem>>, vector<8x32xf32>
    tpu.vector_store %arg23[%c0_176, %c0_177], %299 {strides = array<i32>} : memref<8x32xf32, #tpu.memory_space<vmem>>, vector<8x32xf32>,
    %304 = arith.index_cast %253 : i32 to index
    %c0_178 = arith.constant 0 : index
    %305 = vector.load %arg19[%304, %c0_178] : memref<64x32xf32, #tpu.memory_space<vmem>>, vector<8x32xf32>
    tpu.vector_store %arg19[%304, %c0_178], %301 {strides = array<i32>} : memref<64x32xf32, #tpu.memory_space<vmem>>, vector<8x32xf32>,
    %c5_i32 = arith.constant 5 : i32
    %c8_i32_179 = arith.constant 8 : i32
    %306 = arith.muli %c5_i32, %c8_i32_179 : i32
    %307 = tpu.assume_multiple %306, 8 : i32
    %c7_i32_180 = arith.constant 7 : i32
    %308 = arith.subi %c7_i32_180, %c5_i32 : i32
    %c8_i32_181 = arith.constant 8 : i32
    %309 = arith.muli %308, %c8_i32_181 : i32
    %310 = tpu.assume_multiple %309, 8 : i32
    %311 = arith.index_cast %307 : i32 to index
    %c0_182 = arith.constant 0 : index
    %312 = vector.load %arg16[%311, %c0_182] : memref<64x128xf32, #tpu.memory_space<vmem>>, vector<8x128xf32>
    %c0_183 = arith.constant 0 : index
    %c0_184 = arith.constant 0 : index
    %313 = vector.load %arg20[%c0_183, %c0_184] : memref<8x32xf32, #tpu.memory_space<vmem>>, vector<8x32xf32>
    %c0_185 = arith.constant 0 : index
    %c0_186 = arith.constant 0 : index
    %314 = vector.load %arg2[%c0_185, %c0_186] : memref<32x128xf32, #tpu.memory_space<vmem>>, vector<32x128xf32>
    %cst_187 = arith.constant dense<0.000000e+00> : vector<8x128xf32>
    %315 = tpu.matmul %313, %314, %cst_187 {dimension_numbers = #tpu.dot_dimension_numbers<[1], [0], [0], [1], [0, 0, 1, 1], [], []>} : vector<8x32xf32>, vector<32x128xf32>, vector<8x128xf32> -> vector<8x128xf32>
    %316 = arith.addf %312, %315 : vector<8x128xf32>
    %c0_188 = arith.constant 0 : index
    %c0_189 = arith.constant 0 : index
    %317 = vector.load %arg21[%c0_188, %c0_189] : memref<8x32xf32, #tpu.memory_space<vmem>>, vector<8x32xf32>
    %318 = arith.negf %316 : vector<8x128xf32>
    %319 = math.exp %318 : vector<8x128xf32>
    %cst_190 = arith.constant 1.000000e+00 : f32
    %320 = vector.broadcast %cst_190 : f32 to vector<8x128xf32>
    %321 = arith.addf %320, %319 : vector<8x128xf32>
    %322 = arith.divf %320, %321 : vector<8x128xf32>
    %323 = math.tanh %316 : vector<8x128xf32>
    %324 = vector.extract_strided_slice %322 {offsets = [0, 0], sizes = [8, 32], strides = [1, 1]} : vector<8x128xf32> to vector<8x32xf32>
    %325 = vector.extract_strided_slice %322 {offsets = [0, 32], sizes = [8, 32], strides = [1, 1]} : vector<8x128xf32> to vector<8x32xf32>
    %326 = vector.extract_strided_slice %323 {offsets = [0, 64], sizes = [8, 32], strides = [1, 1]} : vector<8x128xf32> to vector<8x32xf32>
    %327 = vector.extract_strided_slice %322 {offsets = [0, 96], sizes = [8, 32], strides = [1, 1]} : vector<8x128xf32> to vector<8x32xf32>
    %328 = arith.mulf %325, %317 : vector<8x32xf32>
    %329 = arith.mulf %324, %326 : vector<8x32xf32>
    %330 = arith.addf %328, %329 : vector<8x32xf32>
    %331 = math.tanh %330 : vector<8x32xf32>
    %332 = arith.mulf %327, %331 : vector<8x32xf32>
    %c0_191 = arith.constant 0 : index
    %c0_192 = arith.constant 0 : index
    %333 = vector.load %arg20[%c0_191, %c0_192] : memref<8x32xf32, #tpu.memory_space<vmem>>, vector<8x32xf32>
    tpu.vector_store %arg20[%c0_191, %c0_192], %332 {strides = array<i32>} : memref<8x32xf32, #tpu.memory_space<vmem>>, vector<8x32xf32>,
    %c0_193 = arith.constant 0 : index
    %c0_194 = arith.constant 0 : index
    %334 = vector.load %arg21[%c0_193, %c0_194] : memref<8x32xf32, #tpu.memory_space<vmem>>, vector<8x32xf32>
    tpu.vector_store %arg21[%c0_193, %c0_194], %330 {strides = array<i32>} : memref<8x32xf32, #tpu.memory_space<vmem>>, vector<8x32xf32>,
    %335 = arith.index_cast %307 : i32 to index
    %c0_195 = arith.constant 0 : index
    %336 = vector.load %arg18[%335, %c0_195] : memref<64x32xf32, #tpu.memory_space<vmem>>, vector<8x32xf32>
    tpu.vector_store %arg18[%335, %c0_195], %332 {strides = array<i32>} : memref<64x32xf32, #tpu.memory_space<vmem>>, vector<8x32xf32>,
    %337 = arith.index_cast %310 : i32 to index
    %c0_196 = arith.constant 0 : index
    %338 = vector.load %arg17[%337, %c0_196] : memref<64x128xf32, #tpu.memory_space<vmem>>, vector<8x128xf32>
    %c0_197 = arith.constant 0 : index
    %c0_198 = arith.constant 0 : index
    %339 = vector.load %arg22[%c0_197, %c0_198] : memref<8x32xf32, #tpu.memory_space<vmem>>, vector<8x32xf32>
    %c0_199 = arith.constant 0 : index
    %c0_200 = arith.constant 0 : index
    %340 = vector.load %arg5[%c0_199, %c0_200] : memref<32x128xf32, #tpu.memory_space<vmem>>, vector<32x128xf32>
    %cst_201 = arith.constant dense<0.000000e+00> : vector<8x128xf32>
    %341 = tpu.matmul %339, %340, %cst_201 {dimension_numbers = #tpu.dot_dimension_numbers<[1], [0], [0], [1], [0, 0, 1, 1], [], []>} : vector<8x32xf32>, vector<32x128xf32>, vector<8x128xf32> -> vector<8x128xf32>
    %342 = arith.addf %338, %341 : vector<8x128xf32>
    %c0_202 = arith.constant 0 : index
    %c0_203 = arith.constant 0 : index
    %343 = vector.load %arg23[%c0_202, %c0_203] : memref<8x32xf32, #tpu.memory_space<vmem>>, vector<8x32xf32>
    %344 = arith.negf %342 : vector<8x128xf32>
    %345 = math.exp %344 : vector<8x128xf32>
    %cst_204 = arith.constant 1.000000e+00 : f32
    %346 = vector.broadcast %cst_204 : f32 to vector<8x128xf32>
    %347 = arith.addf %346, %345 : vector<8x128xf32>
    %348 = arith.divf %346, %347 : vector<8x128xf32>
    %349 = math.tanh %342 : vector<8x128xf32>
    %350 = vector.extract_strided_slice %348 {offsets = [0, 0], sizes = [8, 32], strides = [1, 1]} : vector<8x128xf32> to vector<8x32xf32>
    %351 = vector.extract_strided_slice %348 {offsets = [0, 32], sizes = [8, 32], strides = [1, 1]} : vector<8x128xf32> to vector<8x32xf32>
    %352 = vector.extract_strided_slice %349 {offsets = [0, 64], sizes = [8, 32], strides = [1, 1]} : vector<8x128xf32> to vector<8x32xf32>
    %353 = vector.extract_strided_slice %348 {offsets = [0, 96], sizes = [8, 32], strides = [1, 1]} : vector<8x128xf32> to vector<8x32xf32>
    %354 = arith.mulf %351, %343 : vector<8x32xf32>
    %355 = arith.mulf %350, %352 : vector<8x32xf32>
    %356 = arith.addf %354, %355 : vector<8x32xf32>
    %357 = math.tanh %356 : vector<8x32xf32>
    %358 = arith.mulf %353, %357 : vector<8x32xf32>
    %c0_205 = arith.constant 0 : index
    %c0_206 = arith.constant 0 : index
    %359 = vector.load %arg22[%c0_205, %c0_206] : memref<8x32xf32, #tpu.memory_space<vmem>>, vector<8x32xf32>
    tpu.vector_store %arg22[%c0_205, %c0_206], %358 {strides = array<i32>} : memref<8x32xf32, #tpu.memory_space<vmem>>, vector<8x32xf32>,
    %c0_207 = arith.constant 0 : index
    %c0_208 = arith.constant 0 : index
    %360 = vector.load %arg23[%c0_207, %c0_208] : memref<8x32xf32, #tpu.memory_space<vmem>>, vector<8x32xf32>
    tpu.vector_store %arg23[%c0_207, %c0_208], %356 {strides = array<i32>} : memref<8x32xf32, #tpu.memory_space<vmem>>, vector<8x32xf32>,
    %361 = arith.index_cast %310 : i32 to index
    %c0_209 = arith.constant 0 : index
    %362 = vector.load %arg19[%361, %c0_209] : memref<64x32xf32, #tpu.memory_space<vmem>>, vector<8x32xf32>
    tpu.vector_store %arg19[%361, %c0_209], %358 {strides = array<i32>} : memref<64x32xf32, #tpu.memory_space<vmem>>, vector<8x32xf32>,
    %c6_i32 = arith.constant 6 : i32
    %c8_i32_210 = arith.constant 8 : i32
    %363 = arith.muli %c6_i32, %c8_i32_210 : i32
    %364 = tpu.assume_multiple %363, 8 : i32
    %c7_i32_211 = arith.constant 7 : i32
    %365 = arith.subi %c7_i32_211, %c6_i32 : i32
    %c8_i32_212 = arith.constant 8 : i32
    %366 = arith.muli %365, %c8_i32_212 : i32
    %367 = tpu.assume_multiple %366, 8 : i32
    %368 = arith.index_cast %364 : i32 to index
    %c0_213 = arith.constant 0 : index
    %369 = vector.load %arg16[%368, %c0_213] : memref<64x128xf32, #tpu.memory_space<vmem>>, vector<8x128xf32>
    %c0_214 = arith.constant 0 : index
    %c0_215 = arith.constant 0 : index
    %370 = vector.load %arg20[%c0_214, %c0_215] : memref<8x32xf32, #tpu.memory_space<vmem>>, vector<8x32xf32>
    %c0_216 = arith.constant 0 : index
    %c0_217 = arith.constant 0 : index
    %371 = vector.load %arg2[%c0_216, %c0_217] : memref<32x128xf32, #tpu.memory_space<vmem>>, vector<32x128xf32>
    %cst_218 = arith.constant dense<0.000000e+00> : vector<8x128xf32>
    %372 = tpu.matmul %370, %371, %cst_218 {dimension_numbers = #tpu.dot_dimension_numbers<[1], [0], [0], [1], [0, 0, 1, 1], [], []>} : vector<8x32xf32>, vector<32x128xf32>, vector<8x128xf32> -> vector<8x128xf32>
    %373 = arith.addf %369, %372 : vector<8x128xf32>
    %c0_219 = arith.constant 0 : index
    %c0_220 = arith.constant 0 : index
    %374 = vector.load %arg21[%c0_219, %c0_220] : memref<8x32xf32, #tpu.memory_space<vmem>>, vector<8x32xf32>
    %375 = arith.negf %373 : vector<8x128xf32>
    %376 = math.exp %375 : vector<8x128xf32>
    %cst_221 = arith.constant 1.000000e+00 : f32
    %377 = vector.broadcast %cst_221 : f32 to vector<8x128xf32>
    %378 = arith.addf %377, %376 : vector<8x128xf32>
    %379 = arith.divf %377, %378 : vector<8x128xf32>
    %380 = math.tanh %373 : vector<8x128xf32>
    %381 = vector.extract_strided_slice %379 {offsets = [0, 0], sizes = [8, 32], strides = [1, 1]} : vector<8x128xf32> to vector<8x32xf32>
    %382 = vector.extract_strided_slice %379 {offsets = [0, 32], sizes = [8, 32], strides = [1, 1]} : vector<8x128xf32> to vector<8x32xf32>
    %383 = vector.extract_strided_slice %380 {offsets = [0, 64], sizes = [8, 32], strides = [1, 1]} : vector<8x128xf32> to vector<8x32xf32>
    %384 = vector.extract_strided_slice %379 {offsets = [0, 96], sizes = [8, 32], strides = [1, 1]} : vector<8x128xf32> to vector<8x32xf32>
    %385 = arith.mulf %382, %374 : vector<8x32xf32>
    %386 = arith.mulf %381, %383 : vector<8x32xf32>
    %387 = arith.addf %385, %386 : vector<8x32xf32>
    %388 = math.tanh %387 : vector<8x32xf32>
    %389 = arith.mulf %384, %388 : vector<8x32xf32>
    %c0_222 = arith.constant 0 : index
    %c0_223 = arith.constant 0 : index
    %390 = vector.load %arg20[%c0_222, %c0_223] : memref<8x32xf32, #tpu.memory_space<vmem>>, vector<8x32xf32>
    tpu.vector_store %arg20[%c0_222, %c0_223], %389 {strides = array<i32>} : memref<8x32xf32, #tpu.memory_space<vmem>>, vector<8x32xf32>,
    %c0_224 = arith.constant 0 : index
    %c0_225 = arith.constant 0 : index
    %391 = vector.load %arg21[%c0_224, %c0_225] : memref<8x32xf32, #tpu.memory_space<vmem>>, vector<8x32xf32>
    tpu.vector_store %arg21[%c0_224, %c0_225], %387 {strides = array<i32>} : memref<8x32xf32, #tpu.memory_space<vmem>>, vector<8x32xf32>,
    %392 = arith.index_cast %364 : i32 to index
    %c0_226 = arith.constant 0 : index
    %393 = vector.load %arg18[%392, %c0_226] : memref<64x32xf32, #tpu.memory_space<vmem>>, vector<8x32xf32>
    tpu.vector_store %arg18[%392, %c0_226], %389 {strides = array<i32>} : memref<64x32xf32, #tpu.memory_space<vmem>>, vector<8x32xf32>,
    %394 = arith.index_cast %367 : i32 to index
    %c0_227 = arith.constant 0 : index
    %395 = vector.load %arg17[%394, %c0_227] : memref<64x128xf32, #tpu.memory_space<vmem>>, vector<8x128xf32>
    %c0_228 = arith.constant 0 : index
    %c0_229 = arith.constant 0 : index
    %396 = vector.load %arg22[%c0_228, %c0_229] : memref<8x32xf32, #tpu.memory_space<vmem>>, vector<8x32xf32>
    %c0_230 = arith.constant 0 : index
    %c0_231 = arith.constant 0 : index
    %397 = vector.load %arg5[%c0_230, %c0_231] : memref<32x128xf32, #tpu.memory_space<vmem>>, vector<32x128xf32>
    %cst_232 = arith.constant dense<0.000000e+00> : vector<8x128xf32>
    %398 = tpu.matmul %396, %397, %cst_232 {dimension_numbers = #tpu.dot_dimension_numbers<[1], [0], [0], [1], [0, 0, 1, 1], [], []>} : vector<8x32xf32>, vector<32x128xf32>, vector<8x128xf32> -> vector<8x128xf32>
    %399 = arith.addf %395, %398 : vector<8x128xf32>
    %c0_233 = arith.constant 0 : index
    %c0_234 = arith.constant 0 : index
    %400 = vector.load %arg23[%c0_233, %c0_234] : memref<8x32xf32, #tpu.memory_space<vmem>>, vector<8x32xf32>
    %401 = arith.negf %399 : vector<8x128xf32>
    %402 = math.exp %401 : vector<8x128xf32>
    %cst_235 = arith.constant 1.000000e+00 : f32
    %403 = vector.broadcast %cst_235 : f32 to vector<8x128xf32>
    %404 = arith.addf %403, %402 : vector<8x128xf32>
    %405 = arith.divf %403, %404 : vector<8x128xf32>
    %406 = math.tanh %399 : vector<8x128xf32>
    %407 = vector.extract_strided_slice %405 {offsets = [0, 0], sizes = [8, 32], strides = [1, 1]} : vector<8x128xf32> to vector<8x32xf32>
    %408 = vector.extract_strided_slice %405 {offsets = [0, 32], sizes = [8, 32], strides = [1, 1]} : vector<8x128xf32> to vector<8x32xf32>
    %409 = vector.extract_strided_slice %406 {offsets = [0, 64], sizes = [8, 32], strides = [1, 1]} : vector<8x128xf32> to vector<8x32xf32>
    %410 = vector.extract_strided_slice %405 {offsets = [0, 96], sizes = [8, 32], strides = [1, 1]} : vector<8x128xf32> to vector<8x32xf32>
    %411 = arith.mulf %408, %400 : vector<8x32xf32>
    %412 = arith.mulf %407, %409 : vector<8x32xf32>
    %413 = arith.addf %411, %412 : vector<8x32xf32>
    %414 = math.tanh %413 : vector<8x32xf32>
    %415 = arith.mulf %410, %414 : vector<8x32xf32>
    %c0_236 = arith.constant 0 : index
    %c0_237 = arith.constant 0 : index
    %416 = vector.load %arg22[%c0_236, %c0_237] : memref<8x32xf32, #tpu.memory_space<vmem>>, vector<8x32xf32>
    tpu.vector_store %arg22[%c0_236, %c0_237], %415 {strides = array<i32>} : memref<8x32xf32, #tpu.memory_space<vmem>>, vector<8x32xf32>,
    %c0_238 = arith.constant 0 : index
    %c0_239 = arith.constant 0 : index
    %417 = vector.load %arg23[%c0_238, %c0_239] : memref<8x32xf32, #tpu.memory_space<vmem>>, vector<8x32xf32>
    tpu.vector_store %arg23[%c0_238, %c0_239], %413 {strides = array<i32>} : memref<8x32xf32, #tpu.memory_space<vmem>>, vector<8x32xf32>,
    %418 = arith.index_cast %367 : i32 to index
    %c0_240 = arith.constant 0 : index
    %419 = vector.load %arg19[%418, %c0_240] : memref<64x32xf32, #tpu.memory_space<vmem>>, vector<8x32xf32>
    tpu.vector_store %arg19[%418, %c0_240], %415 {strides = array<i32>} : memref<64x32xf32, #tpu.memory_space<vmem>>, vector<8x32xf32>,
    %c7_i32_241 = arith.constant 7 : i32
    %c8_i32_242 = arith.constant 8 : i32
    %420 = arith.muli %c7_i32_241, %c8_i32_242 : i32
    %421 = tpu.assume_multiple %420, 8 : i32
    %c7_i32_243 = arith.constant 7 : i32
    %422 = arith.subi %c7_i32_243, %c7_i32_241 : i32
    %c8_i32_244 = arith.constant 8 : i32
    %423 = arith.muli %422, %c8_i32_244 : i32
    %424 = tpu.assume_multiple %423, 8 : i32
    %425 = arith.index_cast %421 : i32 to index
    %c0_245 = arith.constant 0 : index
    %426 = vector.load %arg16[%425, %c0_245] : memref<64x128xf32, #tpu.memory_space<vmem>>, vector<8x128xf32>
    %c0_246 = arith.constant 0 : index
    %c0_247 = arith.constant 0 : index
    %427 = vector.load %arg20[%c0_246, %c0_247] : memref<8x32xf32, #tpu.memory_space<vmem>>, vector<8x32xf32>
    %c0_248 = arith.constant 0 : index
    %c0_249 = arith.constant 0 : index
    %428 = vector.load %arg2[%c0_248, %c0_249] : memref<32x128xf32, #tpu.memory_space<vmem>>, vector<32x128xf32>
    %cst_250 = arith.constant dense<0.000000e+00> : vector<8x128xf32>
    %429 = tpu.matmul %427, %428, %cst_250 {dimension_numbers = #tpu.dot_dimension_numbers<[1], [0], [0], [1], [0, 0, 1, 1], [], []>} : vector<8x32xf32>, vector<32x128xf32>, vector<8x128xf32> -> vector<8x128xf32>
    %430 = arith.addf %426, %429 : vector<8x128xf32>
    %c0_251 = arith.constant 0 : index
    %c0_252 = arith.constant 0 : index
    %431 = vector.load %arg21[%c0_251, %c0_252] : memref<8x32xf32, #tpu.memory_space<vmem>>, vector<8x32xf32>
    %432 = arith.negf %430 : vector<8x128xf32>
    %433 = math.exp %432 : vector<8x128xf32>
    %cst_253 = arith.constant 1.000000e+00 : f32
    %434 = vector.broadcast %cst_253 : f32 to vector<8x128xf32>
    %435 = arith.addf %434, %433 : vector<8x128xf32>
    %436 = arith.divf %434, %435 : vector<8x128xf32>
    %437 = math.tanh %430 : vector<8x128xf32>
    %438 = vector.extract_strided_slice %436 {offsets = [0, 0], sizes = [8, 32], strides = [1, 1]} : vector<8x128xf32> to vector<8x32xf32>
    %439 = vector.extract_strided_slice %436 {offsets = [0, 32], sizes = [8, 32], strides = [1, 1]} : vector<8x128xf32> to vector<8x32xf32>
    %440 = vector.extract_strided_slice %437 {offsets = [0, 64], sizes = [8, 32], strides = [1, 1]} : vector<8x128xf32> to vector<8x32xf32>
    %441 = vector.extract_strided_slice %436 {offsets = [0, 96], sizes = [8, 32], strides = [1, 1]} : vector<8x128xf32> to vector<8x32xf32>
    %442 = arith.mulf %439, %431 : vector<8x32xf32>
    %443 = arith.mulf %438, %440 : vector<8x32xf32>
    %444 = arith.addf %442, %443 : vector<8x32xf32>
    %445 = math.tanh %444 : vector<8x32xf32>
    %446 = arith.mulf %441, %445 : vector<8x32xf32>
    %c0_254 = arith.constant 0 : index
    %c0_255 = arith.constant 0 : index
    %447 = vector.load %arg20[%c0_254, %c0_255] : memref<8x32xf32, #tpu.memory_space<vmem>>, vector<8x32xf32>
    tpu.vector_store %arg20[%c0_254, %c0_255], %446 {strides = array<i32>} : memref<8x32xf32, #tpu.memory_space<vmem>>, vector<8x32xf32>,
    %c0_256 = arith.constant 0 : index
    %c0_257 = arith.constant 0 : index
    %448 = vector.load %arg21[%c0_256, %c0_257] : memref<8x32xf32, #tpu.memory_space<vmem>>, vector<8x32xf32>
    tpu.vector_store %arg21[%c0_256, %c0_257], %444 {strides = array<i32>} : memref<8x32xf32, #tpu.memory_space<vmem>>, vector<8x32xf32>,
    %449 = arith.index_cast %421 : i32 to index
    %c0_258 = arith.constant 0 : index
    %450 = vector.load %arg18[%449, %c0_258] : memref<64x32xf32, #tpu.memory_space<vmem>>, vector<8x32xf32>
    tpu.vector_store %arg18[%449, %c0_258], %446 {strides = array<i32>} : memref<64x32xf32, #tpu.memory_space<vmem>>, vector<8x32xf32>,
    %451 = arith.index_cast %424 : i32 to index
    %c0_259 = arith.constant 0 : index
    %452 = vector.load %arg17[%451, %c0_259] : memref<64x128xf32, #tpu.memory_space<vmem>>, vector<8x128xf32>
    %c0_260 = arith.constant 0 : index
    %c0_261 = arith.constant 0 : index
    %453 = vector.load %arg22[%c0_260, %c0_261] : memref<8x32xf32, #tpu.memory_space<vmem>>, vector<8x32xf32>
    %c0_262 = arith.constant 0 : index
    %c0_263 = arith.constant 0 : index
    %454 = vector.load %arg5[%c0_262, %c0_263] : memref<32x128xf32, #tpu.memory_space<vmem>>, vector<32x128xf32>
    %cst_264 = arith.constant dense<0.000000e+00> : vector<8x128xf32>
    %455 = tpu.matmul %453, %454, %cst_264 {dimension_numbers = #tpu.dot_dimension_numbers<[1], [0], [0], [1], [0, 0, 1, 1], [], []>} : vector<8x32xf32>, vector<32x128xf32>, vector<8x128xf32> -> vector<8x128xf32>
    %456 = arith.addf %452, %455 : vector<8x128xf32>
    %c0_265 = arith.constant 0 : index
    %c0_266 = arith.constant 0 : index
    %457 = vector.load %arg23[%c0_265, %c0_266] : memref<8x32xf32, #tpu.memory_space<vmem>>, vector<8x32xf32>
    %458 = arith.negf %456 : vector<8x128xf32>
    %459 = math.exp %458 : vector<8x128xf32>
    %cst_267 = arith.constant 1.000000e+00 : f32
    %460 = vector.broadcast %cst_267 : f32 to vector<8x128xf32>
    %461 = arith.addf %460, %459 : vector<8x128xf32>
    %462 = arith.divf %460, %461 : vector<8x128xf32>
    %463 = math.tanh %456 : vector<8x128xf32>
    %464 = vector.extract_strided_slice %462 {offsets = [0, 0], sizes = [8, 32], strides = [1, 1]} : vector<8x128xf32> to vector<8x32xf32>
    %465 = vector.extract_strided_slice %462 {offsets = [0, 32], sizes = [8, 32], strides = [1, 1]} : vector<8x128xf32> to vector<8x32xf32>
    %466 = vector.extract_strided_slice %463 {offsets = [0, 64], sizes = [8, 32], strides = [1, 1]} : vector<8x128xf32> to vector<8x32xf32>
    %467 = vector.extract_strided_slice %462 {offsets = [0, 96], sizes = [8, 32], strides = [1, 1]} : vector<8x128xf32> to vector<8x32xf32>
    %468 = arith.mulf %465, %457 : vector<8x32xf32>
    %469 = arith.mulf %464, %466 : vector<8x32xf32>
    %470 = arith.addf %468, %469 : vector<8x32xf32>
    %471 = math.tanh %470 : vector<8x32xf32>
    %472 = arith.mulf %467, %471 : vector<8x32xf32>
    %c0_268 = arith.constant 0 : index
    %c0_269 = arith.constant 0 : index
    %473 = vector.load %arg22[%c0_268, %c0_269] : memref<8x32xf32, #tpu.memory_space<vmem>>, vector<8x32xf32>
    tpu.vector_store %arg22[%c0_268, %c0_269], %472 {strides = array<i32>} : memref<8x32xf32, #tpu.memory_space<vmem>>, vector<8x32xf32>,
    %c0_270 = arith.constant 0 : index
    %c0_271 = arith.constant 0 : index
    %474 = vector.load %arg23[%c0_270, %c0_271] : memref<8x32xf32, #tpu.memory_space<vmem>>, vector<8x32xf32>
    tpu.vector_store %arg23[%c0_270, %c0_271], %470 {strides = array<i32>} : memref<8x32xf32, #tpu.memory_space<vmem>>, vector<8x32xf32>,
    %475 = arith.index_cast %424 : i32 to index
    %c0_272 = arith.constant 0 : index
    %476 = vector.load %arg19[%475, %c0_272] : memref<64x32xf32, #tpu.memory_space<vmem>>, vector<8x32xf32>
    tpu.vector_store %arg19[%475, %c0_272], %472 {strides = array<i32>} : memref<64x32xf32, #tpu.memory_space<vmem>>, vector<8x32xf32>,
    %c8_i32_273 = arith.constant 8 : i32
    %c0_274 = arith.constant 0 : index
    %c0_275 = arith.constant 0 : index
    %477 = vector.load %arg18[%c0_274, %c0_275] : memref<64x32xf32, #tpu.memory_space<vmem>>, vector<64x32xf32>
    %c0_276 = arith.constant 0 : index
    %c0_277 = arith.constant 0 : index
    %478 = vector.load %arg19[%c0_276, %c0_277] : memref<64x32xf32, #tpu.memory_space<vmem>>, vector<64x32xf32>
    %c0_278 = arith.constant 0 : index
    %c0_279 = arith.constant 0 : index
    %479 = vector.load %arg7[%c0_278, %c0_279] : memref<64x128xf32, #tpu.memory_space<vmem>>, vector<32x128xf32>
    %cst_280 = arith.constant dense<0.000000e+00> : vector<64x128xf32>
    %480 = tpu.matmul %477, %479, %cst_280 {dimension_numbers = #tpu.dot_dimension_numbers<[1], [0], [0], [1], [0, 0, 1, 1], [], []>} : vector<64x32xf32>, vector<32x128xf32>, vector<64x128xf32> -> vector<64x128xf32>
    %c32 = arith.constant 32 : index
    %c0_281 = arith.constant 0 : index
    %481 = vector.load %arg7[%c32, %c0_281] : memref<64x128xf32, #tpu.memory_space<vmem>>, vector<32x128xf32>
    %cst_282 = arith.constant dense<0.000000e+00> : vector<64x128xf32>
    %482 = tpu.matmul %478, %481, %cst_282 {dimension_numbers = #tpu.dot_dimension_numbers<[1], [0], [0], [1], [0, 0, 1, 1], [], []>} : vector<64x32xf32>, vector<32x128xf32>, vector<64x128xf32> -> vector<64x128xf32>
    %483 = arith.addf %480, %482 : vector<64x128xf32>
    %c0_283 = arith.constant 0 : index
    %c0_284 = arith.constant 0 : index
    %484 = vector.load %arg9[%c0_283, %c0_284] : memref<1x128xf32, #tpu.memory_space<vmem>>, vector<1x128xf32>
    %485 = vector.broadcast %484 : vector<1x128xf32> to vector<64x128xf32>
    %486 = arith.addf %483, %485 : vector<64x128xf32>
    %c0_285 = arith.constant 0 : index
    %c0_286 = arith.constant 0 : index
    %487 = vector.load %arg16[%c0_285, %c0_286] : memref<64x128xf32, #tpu.memory_space<vmem>>, vector<64x128xf32>
    tpu.vector_store %arg16[%c0_285, %c0_286], %486 {strides = array<i32>} : memref<64x128xf32, #tpu.memory_space<vmem>>, vector<64x128xf32>,
    %c0_287 = arith.constant 0 : index
    %c0_288 = arith.constant 0 : index
    %488 = vector.load %arg10[%c0_287, %c0_288] : memref<64x128xf32, #tpu.memory_space<vmem>>, vector<32x128xf32>
    %cst_289 = arith.constant dense<0.000000e+00> : vector<64x128xf32>
    %489 = tpu.matmul %477, %488, %cst_289 {dimension_numbers = #tpu.dot_dimension_numbers<[1], [0], [0], [1], [0, 0, 1, 1], [], []>} : vector<64x32xf32>, vector<32x128xf32>, vector<64x128xf32> -> vector<64x128xf32>
    %c32_290 = arith.constant 32 : index
    %c0_291 = arith.constant 0 : index
    %490 = vector.load %arg10[%c32_290, %c0_291] : memref<64x128xf32, #tpu.memory_space<vmem>>, vector<32x128xf32>
    %cst_292 = arith.constant dense<0.000000e+00> : vector<64x128xf32>
    %491 = tpu.matmul %478, %490, %cst_292 {dimension_numbers = #tpu.dot_dimension_numbers<[1], [0], [0], [1], [0, 0, 1, 1], [], []>} : vector<64x32xf32>, vector<32x128xf32>, vector<64x128xf32> -> vector<64x128xf32>
    %492 = arith.addf %489, %491 : vector<64x128xf32>
    %c0_293 = arith.constant 0 : index
    %c0_294 = arith.constant 0 : index
    %493 = vector.load %arg12[%c0_293, %c0_294] : memref<1x128xf32, #tpu.memory_space<vmem>>, vector<1x128xf32>
    %494 = vector.broadcast %493 : vector<1x128xf32> to vector<64x128xf32>
    %495 = arith.addf %492, %494 : vector<64x128xf32>
    %c0_295 = arith.constant 0 : index
    %c0_296 = arith.constant 0 : index
    %496 = vector.load %arg17[%c0_295, %c0_296] : memref<64x128xf32, #tpu.memory_space<vmem>>, vector<64x128xf32>
    tpu.vector_store %arg17[%c0_295, %c0_296], %495 {strides = array<i32>} : memref<64x128xf32, #tpu.memory_space<vmem>>, vector<64x128xf32>,
    %cst_297 = arith.constant 0.000000e+00 : f32
    %497 = vector.broadcast %cst_297 : f32 to vector<8x32xf32>
    %c0_298 = arith.constant 0 : index
    %c0_299 = arith.constant 0 : index
    %498 = vector.load %arg20[%c0_298, %c0_299] : memref<8x32xf32, #tpu.memory_space<vmem>>, vector<8x32xf32>
    tpu.vector_store %arg20[%c0_298, %c0_299], %497 {strides = array<i32>} : memref<8x32xf32, #tpu.memory_space<vmem>>, vector<8x32xf32>,
    %cst_300 = arith.constant 0.000000e+00 : f32
    %499 = vector.broadcast %cst_300 : f32 to vector<8x32xf32>
    %c0_301 = arith.constant 0 : index
    %c0_302 = arith.constant 0 : index
    %500 = vector.load %arg21[%c0_301, %c0_302] : memref<8x32xf32, #tpu.memory_space<vmem>>, vector<8x32xf32>
    tpu.vector_store %arg21[%c0_301, %c0_302], %499 {strides = array<i32>} : memref<8x32xf32, #tpu.memory_space<vmem>>, vector<8x32xf32>,
    %cst_303 = arith.constant 0.000000e+00 : f32
    %501 = vector.broadcast %cst_303 : f32 to vector<8x32xf32>
    %c0_304 = arith.constant 0 : index
    %c0_305 = arith.constant 0 : index
    %502 = vector.load %arg22[%c0_304, %c0_305] : memref<8x32xf32, #tpu.memory_space<vmem>>, vector<8x32xf32>
    tpu.vector_store %arg22[%c0_304, %c0_305], %501 {strides = array<i32>} : memref<8x32xf32, #tpu.memory_space<vmem>>, vector<8x32xf32>,
    %cst_306 = arith.constant 0.000000e+00 : f32
    %503 = vector.broadcast %cst_306 : f32 to vector<8x32xf32>
    %c0_307 = arith.constant 0 : index
    %c0_308 = arith.constant 0 : index
    %504 = vector.load %arg23[%c0_307, %c0_308] : memref<8x32xf32, #tpu.memory_space<vmem>>, vector<8x32xf32>
    tpu.vector_store %arg23[%c0_307, %c0_308], %503 {strides = array<i32>} : memref<8x32xf32, #tpu.memory_space<vmem>>, vector<8x32xf32>,
    %c0_i32_309 = arith.constant 0 : i32
    %c8_i32_310 = arith.constant 8 : i32
    %505 = arith.muli %c0_i32_309, %c8_i32_310 : i32
    %506 = tpu.assume_multiple %505, 8 : i32
    %c7_i32_311 = arith.constant 7 : i32
    %507 = arith.subi %c7_i32_311, %c0_i32_309 : i32
    %c8_i32_312 = arith.constant 8 : i32
    %508 = arith.muli %507, %c8_i32_312 : i32
    %509 = tpu.assume_multiple %508, 8 : i32
    %510 = arith.index_cast %506 : i32 to index
    %c0_313 = arith.constant 0 : index
    %511 = vector.load %arg16[%510, %c0_313] : memref<64x128xf32, #tpu.memory_space<vmem>>, vector<8x128xf32>
    %c0_314 = arith.constant 0 : index
    %c0_315 = arith.constant 0 : index
    %512 = vector.load %arg20[%c0_314, %c0_315] : memref<8x32xf32, #tpu.memory_space<vmem>>, vector<8x32xf32>
    %c0_316 = arith.constant 0 : index
    %c0_317 = arith.constant 0 : index
    %513 = vector.load %arg8[%c0_316, %c0_317] : memref<32x128xf32, #tpu.memory_space<vmem>>, vector<32x128xf32>
    %cst_318 = arith.constant dense<0.000000e+00> : vector<8x128xf32>
    %514 = tpu.matmul %512, %513, %cst_318 {dimension_numbers = #tpu.dot_dimension_numbers<[1], [0], [0], [1], [0, 0, 1, 1], [], []>} : vector<8x32xf32>, vector<32x128xf32>, vector<8x128xf32> -> vector<8x128xf32>
    %515 = arith.addf %511, %514 : vector<8x128xf32>
    %c0_319 = arith.constant 0 : index
    %c0_320 = arith.constant 0 : index
    %516 = vector.load %arg21[%c0_319, %c0_320] : memref<8x32xf32, #tpu.memory_space<vmem>>, vector<8x32xf32>
    %517 = arith.negf %515 : vector<8x128xf32>
    %518 = math.exp %517 : vector<8x128xf32>
    %cst_321 = arith.constant 1.000000e+00 : f32
    %519 = vector.broadcast %cst_321 : f32 to vector<8x128xf32>
    %520 = arith.addf %519, %518 : vector<8x128xf32>
    %521 = arith.divf %519, %520 : vector<8x128xf32>
    %522 = math.tanh %515 : vector<8x128xf32>
    %523 = vector.extract_strided_slice %521 {offsets = [0, 0], sizes = [8, 32], strides = [1, 1]} : vector<8x128xf32> to vector<8x32xf32>
    %524 = vector.extract_strided_slice %521 {offsets = [0, 32], sizes = [8, 32], strides = [1, 1]} : vector<8x128xf32> to vector<8x32xf32>
    %525 = vector.extract_strided_slice %522 {offsets = [0, 64], sizes = [8, 32], strides = [1, 1]} : vector<8x128xf32> to vector<8x32xf32>
    %526 = vector.extract_strided_slice %521 {offsets = [0, 96], sizes = [8, 32], strides = [1, 1]} : vector<8x128xf32> to vector<8x32xf32>
    %527 = arith.mulf %524, %516 : vector<8x32xf32>
    %528 = arith.mulf %523, %525 : vector<8x32xf32>
    %529 = arith.addf %527, %528 : vector<8x32xf32>
    %530 = math.tanh %529 : vector<8x32xf32>
    %531 = arith.mulf %526, %530 : vector<8x32xf32>
    %c0_322 = arith.constant 0 : index
    %c0_323 = arith.constant 0 : index
    %532 = vector.load %arg20[%c0_322, %c0_323] : memref<8x32xf32, #tpu.memory_space<vmem>>, vector<8x32xf32>
    tpu.vector_store %arg20[%c0_322, %c0_323], %531 {strides = array<i32>} : memref<8x32xf32, #tpu.memory_space<vmem>>, vector<8x32xf32>,
    %c0_324 = arith.constant 0 : index
    %c0_325 = arith.constant 0 : index
    %533 = vector.load %arg21[%c0_324, %c0_325] : memref<8x32xf32, #tpu.memory_space<vmem>>, vector<8x32xf32>
    tpu.vector_store %arg21[%c0_324, %c0_325], %529 {strides = array<i32>} : memref<8x32xf32, #tpu.memory_space<vmem>>, vector<8x32xf32>,
    %534 = arith.index_cast %506 : i32 to index
    %c0_326 = arith.constant 0 : index
    %535 = vector.load %arg18[%534, %c0_326] : memref<64x32xf32, #tpu.memory_space<vmem>>, vector<8x32xf32>
    tpu.vector_store %arg18[%534, %c0_326], %531 {strides = array<i32>} : memref<64x32xf32, #tpu.memory_space<vmem>>, vector<8x32xf32>,
    %536 = arith.index_cast %509 : i32 to index
    %c0_327 = arith.constant 0 : index
    %537 = vector.load %arg17[%536, %c0_327] : memref<64x128xf32, #tpu.memory_space<vmem>>, vector<8x128xf32>
    %c0_328 = arith.constant 0 : index
    %c0_329 = arith.constant 0 : index
    %538 = vector.load %arg22[%c0_328, %c0_329] : memref<8x32xf32, #tpu.memory_space<vmem>>, vector<8x32xf32>
    %c0_330 = arith.constant 0 : index
    %c0_331 = arith.constant 0 : index
    %539 = vector.load %arg11[%c0_330, %c0_331] : memref<32x128xf32, #tpu.memory_space<vmem>>, vector<32x128xf32>
    %cst_332 = arith.constant dense<0.000000e+00> : vector<8x128xf32>
    %540 = tpu.matmul %538, %539, %cst_332 {dimension_numbers = #tpu.dot_dimension_numbers<[1], [0], [0], [1], [0, 0, 1, 1], [], []>} : vector<8x32xf32>, vector<32x128xf32>, vector<8x128xf32> -> vector<8x128xf32>
    %541 = arith.addf %537, %540 : vector<8x128xf32>
    %c0_333 = arith.constant 0 : index
    %c0_334 = arith.constant 0 : index
    %542 = vector.load %arg23[%c0_333, %c0_334] : memref<8x32xf32, #tpu.memory_space<vmem>>, vector<8x32xf32>
    %543 = arith.negf %541 : vector<8x128xf32>
    %544 = math.exp %543 : vector<8x128xf32>
    %cst_335 = arith.constant 1.000000e+00 : f32
    %545 = vector.broadcast %cst_335 : f32 to vector<8x128xf32>
    %546 = arith.addf %545, %544 : vector<8x128xf32>
    %547 = arith.divf %545, %546 : vector<8x128xf32>
    %548 = math.tanh %541 : vector<8x128xf32>
    %549 = vector.extract_strided_slice %547 {offsets = [0, 0], sizes = [8, 32], strides = [1, 1]} : vector<8x128xf32> to vector<8x32xf32>
    %550 = vector.extract_strided_slice %547 {offsets = [0, 32], sizes = [8, 32], strides = [1, 1]} : vector<8x128xf32> to vector<8x32xf32>
    %551 = vector.extract_strided_slice %548 {offsets = [0, 64], sizes = [8, 32], strides = [1, 1]} : vector<8x128xf32> to vector<8x32xf32>
    %552 = vector.extract_strided_slice %547 {offsets = [0, 96], sizes = [8, 32], strides = [1, 1]} : vector<8x128xf32> to vector<8x32xf32>
    %553 = arith.mulf %550, %542 : vector<8x32xf32>
    %554 = arith.mulf %549, %551 : vector<8x32xf32>
    %555 = arith.addf %553, %554 : vector<8x32xf32>
    %556 = math.tanh %555 : vector<8x32xf32>
    %557 = arith.mulf %552, %556 : vector<8x32xf32>
    %c0_336 = arith.constant 0 : index
    %c0_337 = arith.constant 0 : index
    %558 = vector.load %arg22[%c0_336, %c0_337] : memref<8x32xf32, #tpu.memory_space<vmem>>, vector<8x32xf32>
    tpu.vector_store %arg22[%c0_336, %c0_337], %557 {strides = array<i32>} : memref<8x32xf32, #tpu.memory_space<vmem>>, vector<8x32xf32>,
    %c0_338 = arith.constant 0 : index
    %c0_339 = arith.constant 0 : index
    %559 = vector.load %arg23[%c0_338, %c0_339] : memref<8x32xf32, #tpu.memory_space<vmem>>, vector<8x32xf32>
    tpu.vector_store %arg23[%c0_338, %c0_339], %555 {strides = array<i32>} : memref<8x32xf32, #tpu.memory_space<vmem>>, vector<8x32xf32>,
    %560 = arith.index_cast %509 : i32 to index
    %c0_340 = arith.constant 0 : index
    %561 = vector.load %arg19[%560, %c0_340] : memref<64x32xf32, #tpu.memory_space<vmem>>, vector<8x32xf32>
    tpu.vector_store %arg19[%560, %c0_340], %557 {strides = array<i32>} : memref<64x32xf32, #tpu.memory_space<vmem>>, vector<8x32xf32>,
    %c1_i32_341 = arith.constant 1 : i32
    %c8_i32_342 = arith.constant 8 : i32
    %562 = arith.muli %c1_i32_341, %c8_i32_342 : i32
    %563 = tpu.assume_multiple %562, 8 : i32
    %c7_i32_343 = arith.constant 7 : i32
    %564 = arith.subi %c7_i32_343, %c1_i32_341 : i32
    %c8_i32_344 = arith.constant 8 : i32
    %565 = arith.muli %564, %c8_i32_344 : i32
    %566 = tpu.assume_multiple %565, 8 : i32
    %567 = arith.index_cast %563 : i32 to index
    %c0_345 = arith.constant 0 : index
    %568 = vector.load %arg16[%567, %c0_345] : memref<64x128xf32, #tpu.memory_space<vmem>>, vector<8x128xf32>
    %c0_346 = arith.constant 0 : index
    %c0_347 = arith.constant 0 : index
    %569 = vector.load %arg20[%c0_346, %c0_347] : memref<8x32xf32, #tpu.memory_space<vmem>>, vector<8x32xf32>
    %c0_348 = arith.constant 0 : index
    %c0_349 = arith.constant 0 : index
    %570 = vector.load %arg8[%c0_348, %c0_349] : memref<32x128xf32, #tpu.memory_space<vmem>>, vector<32x128xf32>
    %cst_350 = arith.constant dense<0.000000e+00> : vector<8x128xf32>
    %571 = tpu.matmul %569, %570, %cst_350 {dimension_numbers = #tpu.dot_dimension_numbers<[1], [0], [0], [1], [0, 0, 1, 1], [], []>} : vector<8x32xf32>, vector<32x128xf32>, vector<8x128xf32> -> vector<8x128xf32>
    %572 = arith.addf %568, %571 : vector<8x128xf32>
    %c0_351 = arith.constant 0 : index
    %c0_352 = arith.constant 0 : index
    %573 = vector.load %arg21[%c0_351, %c0_352] : memref<8x32xf32, #tpu.memory_space<vmem>>, vector<8x32xf32>
    %574 = arith.negf %572 : vector<8x128xf32>
    %575 = math.exp %574 : vector<8x128xf32>
    %cst_353 = arith.constant 1.000000e+00 : f32
    %576 = vector.broadcast %cst_353 : f32 to vector<8x128xf32>
    %577 = arith.addf %576, %575 : vector<8x128xf32>
    %578 = arith.divf %576, %577 : vector<8x128xf32>
    %579 = math.tanh %572 : vector<8x128xf32>
    %580 = vector.extract_strided_slice %578 {offsets = [0, 0], sizes = [8, 32], strides = [1, 1]} : vector<8x128xf32> to vector<8x32xf32>
    %581 = vector.extract_strided_slice %578 {offsets = [0, 32], sizes = [8, 32], strides = [1, 1]} : vector<8x128xf32> to vector<8x32xf32>
    %582 = vector.extract_strided_slice %579 {offsets = [0, 64], sizes = [8, 32], strides = [1, 1]} : vector<8x128xf32> to vector<8x32xf32>
    %583 = vector.extract_strided_slice %578 {offsets = [0, 96], sizes = [8, 32], strides = [1, 1]} : vector<8x128xf32> to vector<8x32xf32>
    %584 = arith.mulf %581, %573 : vector<8x32xf32>
    %585 = arith.mulf %580, %582 : vector<8x32xf32>
    %586 = arith.addf %584, %585 : vector<8x32xf32>
    %587 = math.tanh %586 : vector<8x32xf32>
    %588 = arith.mulf %583, %587 : vector<8x32xf32>
    %c0_354 = arith.constant 0 : index
    %c0_355 = arith.constant 0 : index
    %589 = vector.load %arg20[%c0_354, %c0_355] : memref<8x32xf32, #tpu.memory_space<vmem>>, vector<8x32xf32>
    tpu.vector_store %arg20[%c0_354, %c0_355], %588 {strides = array<i32>} : memref<8x32xf32, #tpu.memory_space<vmem>>, vector<8x32xf32>,
    %c0_356 = arith.constant 0 : index
    %c0_357 = arith.constant 0 : index
    %590 = vector.load %arg21[%c0_356, %c0_357] : memref<8x32xf32, #tpu.memory_space<vmem>>, vector<8x32xf32>
    tpu.vector_store %arg21[%c0_356, %c0_357], %586 {strides = array<i32>} : memref<8x32xf32, #tpu.memory_space<vmem>>, vector<8x32xf32>,
    %591 = arith.index_cast %563 : i32 to index
    %c0_358 = arith.constant 0 : index
    %592 = vector.load %arg18[%591, %c0_358] : memref<64x32xf32, #tpu.memory_space<vmem>>, vector<8x32xf32>
    tpu.vector_store %arg18[%591, %c0_358], %588 {strides = array<i32>} : memref<64x32xf32, #tpu.memory_space<vmem>>, vector<8x32xf32>,
    %593 = arith.index_cast %566 : i32 to index
    %c0_359 = arith.constant 0 : index
    %594 = vector.load %arg17[%593, %c0_359] : memref<64x128xf32, #tpu.memory_space<vmem>>, vector<8x128xf32>
    %c0_360 = arith.constant 0 : index
    %c0_361 = arith.constant 0 : index
    %595 = vector.load %arg22[%c0_360, %c0_361] : memref<8x32xf32, #tpu.memory_space<vmem>>, vector<8x32xf32>
    %c0_362 = arith.constant 0 : index
    %c0_363 = arith.constant 0 : index
    %596 = vector.load %arg11[%c0_362, %c0_363] : memref<32x128xf32, #tpu.memory_space<vmem>>, vector<32x128xf32>
    %cst_364 = arith.constant dense<0.000000e+00> : vector<8x128xf32>
    %597 = tpu.matmul %595, %596, %cst_364 {dimension_numbers = #tpu.dot_dimension_numbers<[1], [0], [0], [1], [0, 0, 1, 1], [], []>} : vector<8x32xf32>, vector<32x128xf32>, vector<8x128xf32> -> vector<8x128xf32>
    %598 = arith.addf %594, %597 : vector<8x128xf32>
    %c0_365 = arith.constant 0 : index
    %c0_366 = arith.constant 0 : index
    %599 = vector.load %arg23[%c0_365, %c0_366] : memref<8x32xf32, #tpu.memory_space<vmem>>, vector<8x32xf32>
    %600 = arith.negf %598 : vector<8x128xf32>
    %601 = math.exp %600 : vector<8x128xf32>
    %cst_367 = arith.constant 1.000000e+00 : f32
    %602 = vector.broadcast %cst_367 : f32 to vector<8x128xf32>
    %603 = arith.addf %602, %601 : vector<8x128xf32>
    %604 = arith.divf %602, %603 : vector<8x128xf32>
    %605 = math.tanh %598 : vector<8x128xf32>
    %606 = vector.extract_strided_slice %604 {offsets = [0, 0], sizes = [8, 32], strides = [1, 1]} : vector<8x128xf32> to vector<8x32xf32>
    %607 = vector.extract_strided_slice %604 {offsets = [0, 32], sizes = [8, 32], strides = [1, 1]} : vector<8x128xf32> to vector<8x32xf32>
    %608 = vector.extract_strided_slice %605 {offsets = [0, 64], sizes = [8, 32], strides = [1, 1]} : vector<8x128xf32> to vector<8x32xf32>
    %609 = vector.extract_strided_slice %604 {offsets = [0, 96], sizes = [8, 32], strides = [1, 1]} : vector<8x128xf32> to vector<8x32xf32>
    %610 = arith.mulf %607, %599 : vector<8x32xf32>
    %611 = arith.mulf %606, %608 : vector<8x32xf32>
    %612 = arith.addf %610, %611 : vector<8x32xf32>
    %613 = math.tanh %612 : vector<8x32xf32>
    %614 = arith.mulf %609, %613 : vector<8x32xf32>
    %c0_368 = arith.constant 0 : index
    %c0_369 = arith.constant 0 : index
    %615 = vector.load %arg22[%c0_368, %c0_369] : memref<8x32xf32, #tpu.memory_space<vmem>>, vector<8x32xf32>
    tpu.vector_store %arg22[%c0_368, %c0_369], %614 {strides = array<i32>} : memref<8x32xf32, #tpu.memory_space<vmem>>, vector<8x32xf32>,
    %c0_370 = arith.constant 0 : index
    %c0_371 = arith.constant 0 : index
    %616 = vector.load %arg23[%c0_370, %c0_371] : memref<8x32xf32, #tpu.memory_space<vmem>>, vector<8x32xf32>
    tpu.vector_store %arg23[%c0_370, %c0_371], %612 {strides = array<i32>} : memref<8x32xf32, #tpu.memory_space<vmem>>, vector<8x32xf32>,
    %617 = arith.index_cast %566 : i32 to index
    %c0_372 = arith.constant 0 : index
    %618 = vector.load %arg19[%617, %c0_372] : memref<64x32xf32, #tpu.memory_space<vmem>>, vector<8x32xf32>
    tpu.vector_store %arg19[%617, %c0_372], %614 {strides = array<i32>} : memref<64x32xf32, #tpu.memory_space<vmem>>, vector<8x32xf32>,
    %c2_i32_373 = arith.constant 2 : i32
    %c8_i32_374 = arith.constant 8 : i32
    %619 = arith.muli %c2_i32_373, %c8_i32_374 : i32
    %620 = tpu.assume_multiple %619, 8 : i32
    %c7_i32_375 = arith.constant 7 : i32
    %621 = arith.subi %c7_i32_375, %c2_i32_373 : i32
    %c8_i32_376 = arith.constant 8 : i32
    %622 = arith.muli %621, %c8_i32_376 : i32
    %623 = tpu.assume_multiple %622, 8 : i32
    %624 = arith.index_cast %620 : i32 to index
    %c0_377 = arith.constant 0 : index
    %625 = vector.load %arg16[%624, %c0_377] : memref<64x128xf32, #tpu.memory_space<vmem>>, vector<8x128xf32>
    %c0_378 = arith.constant 0 : index
    %c0_379 = arith.constant 0 : index
    %626 = vector.load %arg20[%c0_378, %c0_379] : memref<8x32xf32, #tpu.memory_space<vmem>>, vector<8x32xf32>
    %c0_380 = arith.constant 0 : index
    %c0_381 = arith.constant 0 : index
    %627 = vector.load %arg8[%c0_380, %c0_381] : memref<32x128xf32, #tpu.memory_space<vmem>>, vector<32x128xf32>
    %cst_382 = arith.constant dense<0.000000e+00> : vector<8x128xf32>
    %628 = tpu.matmul %626, %627, %cst_382 {dimension_numbers = #tpu.dot_dimension_numbers<[1], [0], [0], [1], [0, 0, 1, 1], [], []>} : vector<8x32xf32>, vector<32x128xf32>, vector<8x128xf32> -> vector<8x128xf32>
    %629 = arith.addf %625, %628 : vector<8x128xf32>
    %c0_383 = arith.constant 0 : index
    %c0_384 = arith.constant 0 : index
    %630 = vector.load %arg21[%c0_383, %c0_384] : memref<8x32xf32, #tpu.memory_space<vmem>>, vector<8x32xf32>
    %631 = arith.negf %629 : vector<8x128xf32>
    %632 = math.exp %631 : vector<8x128xf32>
    %cst_385 = arith.constant 1.000000e+00 : f32
    %633 = vector.broadcast %cst_385 : f32 to vector<8x128xf32>
    %634 = arith.addf %633, %632 : vector<8x128xf32>
    %635 = arith.divf %633, %634 : vector<8x128xf32>
    %636 = math.tanh %629 : vector<8x128xf32>
    %637 = vector.extract_strided_slice %635 {offsets = [0, 0], sizes = [8, 32], strides = [1, 1]} : vector<8x128xf32> to vector<8x32xf32>
    %638 = vector.extract_strided_slice %635 {offsets = [0, 32], sizes = [8, 32], strides = [1, 1]} : vector<8x128xf32> to vector<8x32xf32>
    %639 = vector.extract_strided_slice %636 {offsets = [0, 64], sizes = [8, 32], strides = [1, 1]} : vector<8x128xf32> to vector<8x32xf32>
    %640 = vector.extract_strided_slice %635 {offsets = [0, 96], sizes = [8, 32], strides = [1, 1]} : vector<8x128xf32> to vector<8x32xf32>
    %641 = arith.mulf %638, %630 : vector<8x32xf32>
    %642 = arith.mulf %637, %639 : vector<8x32xf32>
    %643 = arith.addf %641, %642 : vector<8x32xf32>
    %644 = math.tanh %643 : vector<8x32xf32>
    %645 = arith.mulf %640, %644 : vector<8x32xf32>
    %c0_386 = arith.constant 0 : index
    %c0_387 = arith.constant 0 : index
    %646 = vector.load %arg20[%c0_386, %c0_387] : memref<8x32xf32, #tpu.memory_space<vmem>>, vector<8x32xf32>
    tpu.vector_store %arg20[%c0_386, %c0_387], %645 {strides = array<i32>} : memref<8x32xf32, #tpu.memory_space<vmem>>, vector<8x32xf32>,
    %c0_388 = arith.constant 0 : index
    %c0_389 = arith.constant 0 : index
    %647 = vector.load %arg21[%c0_388, %c0_389] : memref<8x32xf32, #tpu.memory_space<vmem>>, vector<8x32xf32>
    tpu.vector_store %arg21[%c0_388, %c0_389], %643 {strides = array<i32>} : memref<8x32xf32, #tpu.memory_space<vmem>>, vector<8x32xf32>,
    %648 = arith.index_cast %620 : i32 to index
    %c0_390 = arith.constant 0 : index
    %649 = vector.load %arg18[%648, %c0_390] : memref<64x32xf32, #tpu.memory_space<vmem>>, vector<8x32xf32>
    tpu.vector_store %arg18[%648, %c0_390], %645 {strides = array<i32>} : memref<64x32xf32, #tpu.memory_space<vmem>>, vector<8x32xf32>,
    %650 = arith.index_cast %623 : i32 to index
    %c0_391 = arith.constant 0 : index
    %651 = vector.load %arg17[%650, %c0_391] : memref<64x128xf32, #tpu.memory_space<vmem>>, vector<8x128xf32>
    %c0_392 = arith.constant 0 : index
    %c0_393 = arith.constant 0 : index
    %652 = vector.load %arg22[%c0_392, %c0_393] : memref<8x32xf32, #tpu.memory_space<vmem>>, vector<8x32xf32>
    %c0_394 = arith.constant 0 : index
    %c0_395 = arith.constant 0 : index
    %653 = vector.load %arg11[%c0_394, %c0_395] : memref<32x128xf32, #tpu.memory_space<vmem>>, vector<32x128xf32>
    %cst_396 = arith.constant dense<0.000000e+00> : vector<8x128xf32>
    %654 = tpu.matmul %652, %653, %cst_396 {dimension_numbers = #tpu.dot_dimension_numbers<[1], [0], [0], [1], [0, 0, 1, 1], [], []>} : vector<8x32xf32>, vector<32x128xf32>, vector<8x128xf32> -> vector<8x128xf32>
    %655 = arith.addf %651, %654 : vector<8x128xf32>
    %c0_397 = arith.constant 0 : index
    %c0_398 = arith.constant 0 : index
    %656 = vector.load %arg23[%c0_397, %c0_398] : memref<8x32xf32, #tpu.memory_space<vmem>>, vector<8x32xf32>
    %657 = arith.negf %655 : vector<8x128xf32>
    %658 = math.exp %657 : vector<8x128xf32>
    %cst_399 = arith.constant 1.000000e+00 : f32
    %659 = vector.broadcast %cst_399 : f32 to vector<8x128xf32>
    %660 = arith.addf %659, %658 : vector<8x128xf32>
    %661 = arith.divf %659, %660 : vector<8x128xf32>
    %662 = math.tanh %655 : vector<8x128xf32>
    %663 = vector.extract_strided_slice %661 {offsets = [0, 0], sizes = [8, 32], strides = [1, 1]} : vector<8x128xf32> to vector<8x32xf32>
    %664 = vector.extract_strided_slice %661 {offsets = [0, 32], sizes = [8, 32], strides = [1, 1]} : vector<8x128xf32> to vector<8x32xf32>
    %665 = vector.extract_strided_slice %662 {offsets = [0, 64], sizes = [8, 32], strides = [1, 1]} : vector<8x128xf32> to vector<8x32xf32>
    %666 = vector.extract_strided_slice %661 {offsets = [0, 96], sizes = [8, 32], strides = [1, 1]} : vector<8x128xf32> to vector<8x32xf32>
    %667 = arith.mulf %664, %656 : vector<8x32xf32>
    %668 = arith.mulf %663, %665 : vector<8x32xf32>
    %669 = arith.addf %667, %668 : vector<8x32xf32>
    %670 = math.tanh %669 : vector<8x32xf32>
    %671 = arith.mulf %666, %670 : vector<8x32xf32>
    %c0_400 = arith.constant 0 : index
    %c0_401 = arith.constant 0 : index
    %672 = vector.load %arg22[%c0_400, %c0_401] : memref<8x32xf32, #tpu.memory_space<vmem>>, vector<8x32xf32>
    tpu.vector_store %arg22[%c0_400, %c0_401], %671 {strides = array<i32>} : memref<8x32xf32, #tpu.memory_space<vmem>>, vector<8x32xf32>,
    %c0_402 = arith.constant 0 : index
    %c0_403 = arith.constant 0 : index
    %673 = vector.load %arg23[%c0_402, %c0_403] : memref<8x32xf32, #tpu.memory_space<vmem>>, vector<8x32xf32>
    tpu.vector_store %arg23[%c0_402, %c0_403], %669 {strides = array<i32>} : memref<8x32xf32, #tpu.memory_space<vmem>>, vector<8x32xf32>,
    %674 = arith.index_cast %623 : i32 to index
    %c0_404 = arith.constant 0 : index
    %675 = vector.load %arg19[%674, %c0_404] : memref<64x32xf32, #tpu.memory_space<vmem>>, vector<8x32xf32>
    tpu.vector_store %arg19[%674, %c0_404], %671 {strides = array<i32>} : memref<64x32xf32, #tpu.memory_space<vmem>>, vector<8x32xf32>,
    %c3_i32_405 = arith.constant 3 : i32
    %c8_i32_406 = arith.constant 8 : i32
    %676 = arith.muli %c3_i32_405, %c8_i32_406 : i32
    %677 = tpu.assume_multiple %676, 8 : i32
    %c7_i32_407 = arith.constant 7 : i32
    %678 = arith.subi %c7_i32_407, %c3_i32_405 : i32
    %c8_i32_408 = arith.constant 8 : i32
    %679 = arith.muli %678, %c8_i32_408 : i32
    %680 = tpu.assume_multiple %679, 8 : i32
    %681 = arith.index_cast %677 : i32 to index
    %c0_409 = arith.constant 0 : index
    %682 = vector.load %arg16[%681, %c0_409] : memref<64x128xf32, #tpu.memory_space<vmem>>, vector<8x128xf32>
    %c0_410 = arith.constant 0 : index
    %c0_411 = arith.constant 0 : index
    %683 = vector.load %arg20[%c0_410, %c0_411] : memref<8x32xf32, #tpu.memory_space<vmem>>, vector<8x32xf32>
    %c0_412 = arith.constant 0 : index
    %c0_413 = arith.constant 0 : index
    %684 = vector.load %arg8[%c0_412, %c0_413] : memref<32x128xf32, #tpu.memory_space<vmem>>, vector<32x128xf32>
    %cst_414 = arith.constant dense<0.000000e+00> : vector<8x128xf32>
    %685 = tpu.matmul %683, %684, %cst_414 {dimension_numbers = #tpu.dot_dimension_numbers<[1], [0], [0], [1], [0, 0, 1, 1], [], []>} : vector<8x32xf32>, vector<32x128xf32>, vector<8x128xf32> -> vector<8x128xf32>
    %686 = arith.addf %682, %685 : vector<8x128xf32>
    %c0_415 = arith.constant 0 : index
    %c0_416 = arith.constant 0 : index
    %687 = vector.load %arg21[%c0_415, %c0_416] : memref<8x32xf32, #tpu.memory_space<vmem>>, vector<8x32xf32>
    %688 = arith.negf %686 : vector<8x128xf32>
    %689 = math.exp %688 : vector<8x128xf32>
    %cst_417 = arith.constant 1.000000e+00 : f32
    %690 = vector.broadcast %cst_417 : f32 to vector<8x128xf32>
    %691 = arith.addf %690, %689 : vector<8x128xf32>
    %692 = arith.divf %690, %691 : vector<8x128xf32>
    %693 = math.tanh %686 : vector<8x128xf32>
    %694 = vector.extract_strided_slice %692 {offsets = [0, 0], sizes = [8, 32], strides = [1, 1]} : vector<8x128xf32> to vector<8x32xf32>
    %695 = vector.extract_strided_slice %692 {offsets = [0, 32], sizes = [8, 32], strides = [1, 1]} : vector<8x128xf32> to vector<8x32xf32>
    %696 = vector.extract_strided_slice %693 {offsets = [0, 64], sizes = [8, 32], strides = [1, 1]} : vector<8x128xf32> to vector<8x32xf32>
    %697 = vector.extract_strided_slice %692 {offsets = [0, 96], sizes = [8, 32], strides = [1, 1]} : vector<8x128xf32> to vector<8x32xf32>
    %698 = arith.mulf %695, %687 : vector<8x32xf32>
    %699 = arith.mulf %694, %696 : vector<8x32xf32>
    %700 = arith.addf %698, %699 : vector<8x32xf32>
    %701 = math.tanh %700 : vector<8x32xf32>
    %702 = arith.mulf %697, %701 : vector<8x32xf32>
    %c0_418 = arith.constant 0 : index
    %c0_419 = arith.constant 0 : index
    %703 = vector.load %arg20[%c0_418, %c0_419] : memref<8x32xf32, #tpu.memory_space<vmem>>, vector<8x32xf32>
    tpu.vector_store %arg20[%c0_418, %c0_419], %702 {strides = array<i32>} : memref<8x32xf32, #tpu.memory_space<vmem>>, vector<8x32xf32>,
    %c0_420 = arith.constant 0 : index
    %c0_421 = arith.constant 0 : index
    %704 = vector.load %arg21[%c0_420, %c0_421] : memref<8x32xf32, #tpu.memory_space<vmem>>, vector<8x32xf32>
    tpu.vector_store %arg21[%c0_420, %c0_421], %700 {strides = array<i32>} : memref<8x32xf32, #tpu.memory_space<vmem>>, vector<8x32xf32>,
    %705 = arith.index_cast %677 : i32 to index
    %c0_422 = arith.constant 0 : index
    %706 = vector.load %arg18[%705, %c0_422] : memref<64x32xf32, #tpu.memory_space<vmem>>, vector<8x32xf32>
    tpu.vector_store %arg18[%705, %c0_422], %702 {strides = array<i32>} : memref<64x32xf32, #tpu.memory_space<vmem>>, vector<8x32xf32>,
    %707 = arith.index_cast %680 : i32 to index
    %c0_423 = arith.constant 0 : index
    %708 = vector.load %arg17[%707, %c0_423] : memref<64x128xf32, #tpu.memory_space<vmem>>, vector<8x128xf32>
    %c0_424 = arith.constant 0 : index
    %c0_425 = arith.constant 0 : index
    %709 = vector.load %arg22[%c0_424, %c0_425] : memref<8x32xf32, #tpu.memory_space<vmem>>, vector<8x32xf32>
    %c0_426 = arith.constant 0 : index
    %c0_427 = arith.constant 0 : index
    %710 = vector.load %arg11[%c0_426, %c0_427] : memref<32x128xf32, #tpu.memory_space<vmem>>, vector<32x128xf32>
    %cst_428 = arith.constant dense<0.000000e+00> : vector<8x128xf32>
    %711 = tpu.matmul %709, %710, %cst_428 {dimension_numbers = #tpu.dot_dimension_numbers<[1], [0], [0], [1], [0, 0, 1, 1], [], []>} : vector<8x32xf32>, vector<32x128xf32>, vector<8x128xf32> -> vector<8x128xf32>
    %712 = arith.addf %708, %711 : vector<8x128xf32>
    %c0_429 = arith.constant 0 : index
    %c0_430 = arith.constant 0 : index
    %713 = vector.load %arg23[%c0_429, %c0_430] : memref<8x32xf32, #tpu.memory_space<vmem>>, vector<8x32xf32>
    %714 = arith.negf %712 : vector<8x128xf32>
    %715 = math.exp %714 : vector<8x128xf32>
    %cst_431 = arith.constant 1.000000e+00 : f32
    %716 = vector.broadcast %cst_431 : f32 to vector<8x128xf32>
    %717 = arith.addf %716, %715 : vector<8x128xf32>
    %718 = arith.divf %716, %717 : vector<8x128xf32>
    %719 = math.tanh %712 : vector<8x128xf32>
    %720 = vector.extract_strided_slice %718 {offsets = [0, 0], sizes = [8, 32], strides = [1, 1]} : vector<8x128xf32> to vector<8x32xf32>
    %721 = vector.extract_strided_slice %718 {offsets = [0, 32], sizes = [8, 32], strides = [1, 1]} : vector<8x128xf32> to vector<8x32xf32>
    %722 = vector.extract_strided_slice %719 {offsets = [0, 64], sizes = [8, 32], strides = [1, 1]} : vector<8x128xf32> to vector<8x32xf32>
    %723 = vector.extract_strided_slice %718 {offsets = [0, 96], sizes = [8, 32], strides = [1, 1]} : vector<8x128xf32> to vector<8x32xf32>
    %724 = arith.mulf %721, %713 : vector<8x32xf32>
    %725 = arith.mulf %720, %722 : vector<8x32xf32>
    %726 = arith.addf %724, %725 : vector<8x32xf32>
    %727 = math.tanh %726 : vector<8x32xf32>
    %728 = arith.mulf %723, %727 : vector<8x32xf32>
    %c0_432 = arith.constant 0 : index
    %c0_433 = arith.constant 0 : index
    %729 = vector.load %arg22[%c0_432, %c0_433] : memref<8x32xf32, #tpu.memory_space<vmem>>, vector<8x32xf32>
    tpu.vector_store %arg22[%c0_432, %c0_433], %728 {strides = array<i32>} : memref<8x32xf32, #tpu.memory_space<vmem>>, vector<8x32xf32>,
    %c0_434 = arith.constant 0 : index
    %c0_435 = arith.constant 0 : index
    %730 = vector.load %arg23[%c0_434, %c0_435] : memref<8x32xf32, #tpu.memory_space<vmem>>, vector<8x32xf32>
    tpu.vector_store %arg23[%c0_434, %c0_435], %726 {strides = array<i32>} : memref<8x32xf32, #tpu.memory_space<vmem>>, vector<8x32xf32>,
    %731 = arith.index_cast %680 : i32 to index
    %c0_436 = arith.constant 0 : index
    %732 = vector.load %arg19[%731, %c0_436] : memref<64x32xf32, #tpu.memory_space<vmem>>, vector<8x32xf32>
    tpu.vector_store %arg19[%731, %c0_436], %728 {strides = array<i32>} : memref<64x32xf32, #tpu.memory_space<vmem>>, vector<8x32xf32>,
    %c4_i32_437 = arith.constant 4 : i32
    %c8_i32_438 = arith.constant 8 : i32
    %733 = arith.muli %c4_i32_437, %c8_i32_438 : i32
    %734 = tpu.assume_multiple %733, 8 : i32
    %c7_i32_439 = arith.constant 7 : i32
    %735 = arith.subi %c7_i32_439, %c4_i32_437 : i32
    %c8_i32_440 = arith.constant 8 : i32
    %736 = arith.muli %735, %c8_i32_440 : i32
    %737 = tpu.assume_multiple %736, 8 : i32
    %738 = arith.index_cast %734 : i32 to index
    %c0_441 = arith.constant 0 : index
    %739 = vector.load %arg16[%738, %c0_441] : memref<64x128xf32, #tpu.memory_space<vmem>>, vector<8x128xf32>
    %c0_442 = arith.constant 0 : index
    %c0_443 = arith.constant 0 : index
    %740 = vector.load %arg20[%c0_442, %c0_443] : memref<8x32xf32, #tpu.memory_space<vmem>>, vector<8x32xf32>
    %c0_444 = arith.constant 0 : index
    %c0_445 = arith.constant 0 : index
    %741 = vector.load %arg8[%c0_444, %c0_445] : memref<32x128xf32, #tpu.memory_space<vmem>>, vector<32x128xf32>
    %cst_446 = arith.constant dense<0.000000e+00> : vector<8x128xf32>
    %742 = tpu.matmul %740, %741, %cst_446 {dimension_numbers = #tpu.dot_dimension_numbers<[1], [0], [0], [1], [0, 0, 1, 1], [], []>} : vector<8x32xf32>, vector<32x128xf32>, vector<8x128xf32> -> vector<8x128xf32>
    %743 = arith.addf %739, %742 : vector<8x128xf32>
    %c0_447 = arith.constant 0 : index
    %c0_448 = arith.constant 0 : index
    %744 = vector.load %arg21[%c0_447, %c0_448] : memref<8x32xf32, #tpu.memory_space<vmem>>, vector<8x32xf32>
    %745 = arith.negf %743 : vector<8x128xf32>
    %746 = math.exp %745 : vector<8x128xf32>
    %cst_449 = arith.constant 1.000000e+00 : f32
    %747 = vector.broadcast %cst_449 : f32 to vector<8x128xf32>
    %748 = arith.addf %747, %746 : vector<8x128xf32>
    %749 = arith.divf %747, %748 : vector<8x128xf32>
    %750 = math.tanh %743 : vector<8x128xf32>
    %751 = vector.extract_strided_slice %749 {offsets = [0, 0], sizes = [8, 32], strides = [1, 1]} : vector<8x128xf32> to vector<8x32xf32>
    %752 = vector.extract_strided_slice %749 {offsets = [0, 32], sizes = [8, 32], strides = [1, 1]} : vector<8x128xf32> to vector<8x32xf32>
    %753 = vector.extract_strided_slice %750 {offsets = [0, 64], sizes = [8, 32], strides = [1, 1]} : vector<8x128xf32> to vector<8x32xf32>
    %754 = vector.extract_strided_slice %749 {offsets = [0, 96], sizes = [8, 32], strides = [1, 1]} : vector<8x128xf32> to vector<8x32xf32>
    %755 = arith.mulf %752, %744 : vector<8x32xf32>
    %756 = arith.mulf %751, %753 : vector<8x32xf32>
    %757 = arith.addf %755, %756 : vector<8x32xf32>
    %758 = math.tanh %757 : vector<8x32xf32>
    %759 = arith.mulf %754, %758 : vector<8x32xf32>
    %c0_450 = arith.constant 0 : index
    %c0_451 = arith.constant 0 : index
    %760 = vector.load %arg20[%c0_450, %c0_451] : memref<8x32xf32, #tpu.memory_space<vmem>>, vector<8x32xf32>
    tpu.vector_store %arg20[%c0_450, %c0_451], %759 {strides = array<i32>} : memref<8x32xf32, #tpu.memory_space<vmem>>, vector<8x32xf32>,
    %c0_452 = arith.constant 0 : index
    %c0_453 = arith.constant 0 : index
    %761 = vector.load %arg21[%c0_452, %c0_453] : memref<8x32xf32, #tpu.memory_space<vmem>>, vector<8x32xf32>
    tpu.vector_store %arg21[%c0_452, %c0_453], %757 {strides = array<i32>} : memref<8x32xf32, #tpu.memory_space<vmem>>, vector<8x32xf32>,
    %762 = arith.index_cast %734 : i32 to index
    %c0_454 = arith.constant 0 : index
    %763 = vector.load %arg18[%762, %c0_454] : memref<64x32xf32, #tpu.memory_space<vmem>>, vector<8x32xf32>
    tpu.vector_store %arg18[%762, %c0_454], %759 {strides = array<i32>} : memref<64x32xf32, #tpu.memory_space<vmem>>, vector<8x32xf32>,
    %764 = arith.index_cast %737 : i32 to index
    %c0_455 = arith.constant 0 : index
    %765 = vector.load %arg17[%764, %c0_455] : memref<64x128xf32, #tpu.memory_space<vmem>>, vector<8x128xf32>
    %c0_456 = arith.constant 0 : index
    %c0_457 = arith.constant 0 : index
    %766 = vector.load %arg22[%c0_456, %c0_457] : memref<8x32xf32, #tpu.memory_space<vmem>>, vector<8x32xf32>
    %c0_458 = arith.constant 0 : index
    %c0_459 = arith.constant 0 : index
    %767 = vector.load %arg11[%c0_458, %c0_459] : memref<32x128xf32, #tpu.memory_space<vmem>>, vector<32x128xf32>
    %cst_460 = arith.constant dense<0.000000e+00> : vector<8x128xf32>
    %768 = tpu.matmul %766, %767, %cst_460 {dimension_numbers = #tpu.dot_dimension_numbers<[1], [0], [0], [1], [0, 0, 1, 1], [], []>} : vector<8x32xf32>, vector<32x128xf32>, vector<8x128xf32> -> vector<8x128xf32>
    %769 = arith.addf %765, %768 : vector<8x128xf32>
    %c0_461 = arith.constant 0 : index
    %c0_462 = arith.constant 0 : index
    %770 = vector.load %arg23[%c0_461, %c0_462] : memref<8x32xf32, #tpu.memory_space<vmem>>, vector<8x32xf32>
    %771 = arith.negf %769 : vector<8x128xf32>
    %772 = math.exp %771 : vector<8x128xf32>
    %cst_463 = arith.constant 1.000000e+00 : f32
    %773 = vector.broadcast %cst_463 : f32 to vector<8x128xf32>
    %774 = arith.addf %773, %772 : vector<8x128xf32>
    %775 = arith.divf %773, %774 : vector<8x128xf32>
    %776 = math.tanh %769 : vector<8x128xf32>
    %777 = vector.extract_strided_slice %775 {offsets = [0, 0], sizes = [8, 32], strides = [1, 1]} : vector<8x128xf32> to vector<8x32xf32>
    %778 = vector.extract_strided_slice %775 {offsets = [0, 32], sizes = [8, 32], strides = [1, 1]} : vector<8x128xf32> to vector<8x32xf32>
    %779 = vector.extract_strided_slice %776 {offsets = [0, 64], sizes = [8, 32], strides = [1, 1]} : vector<8x128xf32> to vector<8x32xf32>
    %780 = vector.extract_strided_slice %775 {offsets = [0, 96], sizes = [8, 32], strides = [1, 1]} : vector<8x128xf32> to vector<8x32xf32>
    %781 = arith.mulf %778, %770 : vector<8x32xf32>
    %782 = arith.mulf %777, %779 : vector<8x32xf32>
    %783 = arith.addf %781, %782 : vector<8x32xf32>
    %784 = math.tanh %783 : vector<8x32xf32>
    %785 = arith.mulf %780, %784 : vector<8x32xf32>
    %c0_464 = arith.constant 0 : index
    %c0_465 = arith.constant 0 : index
    %786 = vector.load %arg22[%c0_464, %c0_465] : memref<8x32xf32, #tpu.memory_space<vmem>>, vector<8x32xf32>
    tpu.vector_store %arg22[%c0_464, %c0_465], %785 {strides = array<i32>} : memref<8x32xf32, #tpu.memory_space<vmem>>, vector<8x32xf32>,
    %c0_466 = arith.constant 0 : index
    %c0_467 = arith.constant 0 : index
    %787 = vector.load %arg23[%c0_466, %c0_467] : memref<8x32xf32, #tpu.memory_space<vmem>>, vector<8x32xf32>
    tpu.vector_store %arg23[%c0_466, %c0_467], %783 {strides = array<i32>} : memref<8x32xf32, #tpu.memory_space<vmem>>, vector<8x32xf32>,
    %788 = arith.index_cast %737 : i32 to index
    %c0_468 = arith.constant 0 : index
    %789 = vector.load %arg19[%788, %c0_468] : memref<64x32xf32, #tpu.memory_space<vmem>>, vector<8x32xf32>
    tpu.vector_store %arg19[%788, %c0_468], %785 {strides = array<i32>} : memref<64x32xf32, #tpu.memory_space<vmem>>, vector<8x32xf32>,
    %c5_i32_469 = arith.constant 5 : i32
    %c8_i32_470 = arith.constant 8 : i32
    %790 = arith.muli %c5_i32_469, %c8_i32_470 : i32
    %791 = tpu.assume_multiple %790, 8 : i32
    %c7_i32_471 = arith.constant 7 : i32
    %792 = arith.subi %c7_i32_471, %c5_i32_469 : i32
    %c8_i32_472 = arith.constant 8 : i32
    %793 = arith.muli %792, %c8_i32_472 : i32
    %794 = tpu.assume_multiple %793, 8 : i32
    %795 = arith.index_cast %791 : i32 to index
    %c0_473 = arith.constant 0 : index
    %796 = vector.load %arg16[%795, %c0_473] : memref<64x128xf32, #tpu.memory_space<vmem>>, vector<8x128xf32>
    %c0_474 = arith.constant 0 : index
    %c0_475 = arith.constant 0 : index
    %797 = vector.load %arg20[%c0_474, %c0_475] : memref<8x32xf32, #tpu.memory_space<vmem>>, vector<8x32xf32>
    %c0_476 = arith.constant 0 : index
    %c0_477 = arith.constant 0 : index
    %798 = vector.load %arg8[%c0_476, %c0_477] : memref<32x128xf32, #tpu.memory_space<vmem>>, vector<32x128xf32>
    %cst_478 = arith.constant dense<0.000000e+00> : vector<8x128xf32>
    %799 = tpu.matmul %797, %798, %cst_478 {dimension_numbers = #tpu.dot_dimension_numbers<[1], [0], [0], [1], [0, 0, 1, 1], [], []>} : vector<8x32xf32>, vector<32x128xf32>, vector<8x128xf32> -> vector<8x128xf32>
    %800 = arith.addf %796, %799 : vector<8x128xf32>
    %c0_479 = arith.constant 0 : index
    %c0_480 = arith.constant 0 : index
    %801 = vector.load %arg21[%c0_479, %c0_480] : memref<8x32xf32, #tpu.memory_space<vmem>>, vector<8x32xf32>
    %802 = arith.negf %800 : vector<8x128xf32>
    %803 = math.exp %802 : vector<8x128xf32>
    %cst_481 = arith.constant 1.000000e+00 : f32
    %804 = vector.broadcast %cst_481 : f32 to vector<8x128xf32>
    %805 = arith.addf %804, %803 : vector<8x128xf32>
    %806 = arith.divf %804, %805 : vector<8x128xf32>
    %807 = math.tanh %800 : vector<8x128xf32>
    %808 = vector.extract_strided_slice %806 {offsets = [0, 0], sizes = [8, 32], strides = [1, 1]} : vector<8x128xf32> to vector<8x32xf32>
    %809 = vector.extract_strided_slice %806 {offsets = [0, 32], sizes = [8, 32], strides = [1, 1]} : vector<8x128xf32> to vector<8x32xf32>
    %810 = vector.extract_strided_slice %807 {offsets = [0, 64], sizes = [8, 32], strides = [1, 1]} : vector<8x128xf32> to vector<8x32xf32>
    %811 = vector.extract_strided_slice %806 {offsets = [0, 96], sizes = [8, 32], strides = [1, 1]} : vector<8x128xf32> to vector<8x32xf32>
    %812 = arith.mulf %809, %801 : vector<8x32xf32>
    %813 = arith.mulf %808, %810 : vector<8x32xf32>
    %814 = arith.addf %812, %813 : vector<8x32xf32>
    %815 = math.tanh %814 : vector<8x32xf32>
    %816 = arith.mulf %811, %815 : vector<8x32xf32>
    %c0_482 = arith.constant 0 : index
    %c0_483 = arith.constant 0 : index
    %817 = vector.load %arg20[%c0_482, %c0_483] : memref<8x32xf32, #tpu.memory_space<vmem>>, vector<8x32xf32>
    tpu.vector_store %arg20[%c0_482, %c0_483], %816 {strides = array<i32>} : memref<8x32xf32, #tpu.memory_space<vmem>>, vector<8x32xf32>,
    %c0_484 = arith.constant 0 : index
    %c0_485 = arith.constant 0 : index
    %818 = vector.load %arg21[%c0_484, %c0_485] : memref<8x32xf32, #tpu.memory_space<vmem>>, vector<8x32xf32>
    tpu.vector_store %arg21[%c0_484, %c0_485], %814 {strides = array<i32>} : memref<8x32xf32, #tpu.memory_space<vmem>>, vector<8x32xf32>,
    %819 = arith.index_cast %791 : i32 to index
    %c0_486 = arith.constant 0 : index
    %820 = vector.load %arg18[%819, %c0_486] : memref<64x32xf32, #tpu.memory_space<vmem>>, vector<8x32xf32>
    tpu.vector_store %arg18[%819, %c0_486], %816 {strides = array<i32>} : memref<64x32xf32, #tpu.memory_space<vmem>>, vector<8x32xf32>,
    %821 = arith.index_cast %794 : i32 to index
    %c0_487 = arith.constant 0 : index
    %822 = vector.load %arg17[%821, %c0_487] : memref<64x128xf32, #tpu.memory_space<vmem>>, vector<8x128xf32>
    %c0_488 = arith.constant 0 : index
    %c0_489 = arith.constant 0 : index
    %823 = vector.load %arg22[%c0_488, %c0_489] : memref<8x32xf32, #tpu.memory_space<vmem>>, vector<8x32xf32>
    %c0_490 = arith.constant 0 : index
    %c0_491 = arith.constant 0 : index
    %824 = vector.load %arg11[%c0_490, %c0_491] : memref<32x128xf32, #tpu.memory_space<vmem>>, vector<32x128xf32>
    %cst_492 = arith.constant dense<0.000000e+00> : vector<8x128xf32>
    %825 = tpu.matmul %823, %824, %cst_492 {dimension_numbers = #tpu.dot_dimension_numbers<[1], [0], [0], [1], [0, 0, 1, 1], [], []>} : vector<8x32xf32>, vector<32x128xf32>, vector<8x128xf32> -> vector<8x128xf32>
    %826 = arith.addf %822, %825 : vector<8x128xf32>
    %c0_493 = arith.constant 0 : index
    %c0_494 = arith.constant 0 : index
    %827 = vector.load %arg23[%c0_493, %c0_494] : memref<8x32xf32, #tpu.memory_space<vmem>>, vector<8x32xf32>
    %828 = arith.negf %826 : vector<8x128xf32>
    %829 = math.exp %828 : vector<8x128xf32>
    %cst_495 = arith.constant 1.000000e+00 : f32
    %830 = vector.broadcast %cst_495 : f32 to vector<8x128xf32>
    %831 = arith.addf %830, %829 : vector<8x128xf32>
    %832 = arith.divf %830, %831 : vector<8x128xf32>
    %833 = math.tanh %826 : vector<8x128xf32>
    %834 = vector.extract_strided_slice %832 {offsets = [0, 0], sizes = [8, 32], strides = [1, 1]} : vector<8x128xf32> to vector<8x32xf32>
    %835 = vector.extract_strided_slice %832 {offsets = [0, 32], sizes = [8, 32], strides = [1, 1]} : vector<8x128xf32> to vector<8x32xf32>
    %836 = vector.extract_strided_slice %833 {offsets = [0, 64], sizes = [8, 32], strides = [1, 1]} : vector<8x128xf32> to vector<8x32xf32>
    %837 = vector.extract_strided_slice %832 {offsets = [0, 96], sizes = [8, 32], strides = [1, 1]} : vector<8x128xf32> to vector<8x32xf32>
    %838 = arith.mulf %835, %827 : vector<8x32xf32>
    %839 = arith.mulf %834, %836 : vector<8x32xf32>
    %840 = arith.addf %838, %839 : vector<8x32xf32>
    %841 = math.tanh %840 : vector<8x32xf32>
    %842 = arith.mulf %837, %841 : vector<8x32xf32>
    %c0_496 = arith.constant 0 : index
    %c0_497 = arith.constant 0 : index
    %843 = vector.load %arg22[%c0_496, %c0_497] : memref<8x32xf32, #tpu.memory_space<vmem>>, vector<8x32xf32>
    tpu.vector_store %arg22[%c0_496, %c0_497], %842 {strides = array<i32>} : memref<8x32xf32, #tpu.memory_space<vmem>>, vector<8x32xf32>,
    %c0_498 = arith.constant 0 : index
    %c0_499 = arith.constant 0 : index
    %844 = vector.load %arg23[%c0_498, %c0_499] : memref<8x32xf32, #tpu.memory_space<vmem>>, vector<8x32xf32>
    tpu.vector_store %arg23[%c0_498, %c0_499], %840 {strides = array<i32>} : memref<8x32xf32, #tpu.memory_space<vmem>>, vector<8x32xf32>,
    %845 = arith.index_cast %794 : i32 to index
    %c0_500 = arith.constant 0 : index
    %846 = vector.load %arg19[%845, %c0_500] : memref<64x32xf32, #tpu.memory_space<vmem>>, vector<8x32xf32>
    tpu.vector_store %arg19[%845, %c0_500], %842 {strides = array<i32>} : memref<64x32xf32, #tpu.memory_space<vmem>>, vector<8x32xf32>,
    %c6_i32_501 = arith.constant 6 : i32
    %c8_i32_502 = arith.constant 8 : i32
    %847 = arith.muli %c6_i32_501, %c8_i32_502 : i32
    %848 = tpu.assume_multiple %847, 8 : i32
    %c7_i32_503 = arith.constant 7 : i32
    %849 = arith.subi %c7_i32_503, %c6_i32_501 : i32
    %c8_i32_504 = arith.constant 8 : i32
    %850 = arith.muli %849, %c8_i32_504 : i32
    %851 = tpu.assume_multiple %850, 8 : i32
    %852 = arith.index_cast %848 : i32 to index
    %c0_505 = arith.constant 0 : index
    %853 = vector.load %arg16[%852, %c0_505] : memref<64x128xf32, #tpu.memory_space<vmem>>, vector<8x128xf32>
    %c0_506 = arith.constant 0 : index
    %c0_507 = arith.constant 0 : index
    %854 = vector.load %arg20[%c0_506, %c0_507] : memref<8x32xf32, #tpu.memory_space<vmem>>, vector<8x32xf32>
    %c0_508 = arith.constant 0 : index
    %c0_509 = arith.constant 0 : index
    %855 = vector.load %arg8[%c0_508, %c0_509] : memref<32x128xf32, #tpu.memory_space<vmem>>, vector<32x128xf32>
    %cst_510 = arith.constant dense<0.000000e+00> : vector<8x128xf32>
    %856 = tpu.matmul %854, %855, %cst_510 {dimension_numbers = #tpu.dot_dimension_numbers<[1], [0], [0], [1], [0, 0, 1, 1], [], []>} : vector<8x32xf32>, vector<32x128xf32>, vector<8x128xf32> -> vector<8x128xf32>
    %857 = arith.addf %853, %856 : vector<8x128xf32>
    %c0_511 = arith.constant 0 : index
    %c0_512 = arith.constant 0 : index
    %858 = vector.load %arg21[%c0_511, %c0_512] : memref<8x32xf32, #tpu.memory_space<vmem>>, vector<8x32xf32>
    %859 = arith.negf %857 : vector<8x128xf32>
    %860 = math.exp %859 : vector<8x128xf32>
    %cst_513 = arith.constant 1.000000e+00 : f32
    %861 = vector.broadcast %cst_513 : f32 to vector<8x128xf32>
    %862 = arith.addf %861, %860 : vector<8x128xf32>
    %863 = arith.divf %861, %862 : vector<8x128xf32>
    %864 = math.tanh %857 : vector<8x128xf32>
    %865 = vector.extract_strided_slice %863 {offsets = [0, 0], sizes = [8, 32], strides = [1, 1]} : vector<8x128xf32> to vector<8x32xf32>
    %866 = vector.extract_strided_slice %863 {offsets = [0, 32], sizes = [8, 32], strides = [1, 1]} : vector<8x128xf32> to vector<8x32xf32>
    %867 = vector.extract_strided_slice %864 {offsets = [0, 64], sizes = [8, 32], strides = [1, 1]} : vector<8x128xf32> to vector<8x32xf32>
    %868 = vector.extract_strided_slice %863 {offsets = [0, 96], sizes = [8, 32], strides = [1, 1]} : vector<8x128xf32> to vector<8x32xf32>
    %869 = arith.mulf %866, %858 : vector<8x32xf32>
    %870 = arith.mulf %865, %867 : vector<8x32xf32>
    %871 = arith.addf %869, %870 : vector<8x32xf32>
    %872 = math.tanh %871 : vector<8x32xf32>
    %873 = arith.mulf %868, %872 : vector<8x32xf32>
    %c0_514 = arith.constant 0 : index
    %c0_515 = arith.constant 0 : index
    %874 = vector.load %arg20[%c0_514, %c0_515] : memref<8x32xf32, #tpu.memory_space<vmem>>, vector<8x32xf32>
    tpu.vector_store %arg20[%c0_514, %c0_515], %873 {strides = array<i32>} : memref<8x32xf32, #tpu.memory_space<vmem>>, vector<8x32xf32>,
    %c0_516 = arith.constant 0 : index
    %c0_517 = arith.constant 0 : index
    %875 = vector.load %arg21[%c0_516, %c0_517] : memref<8x32xf32, #tpu.memory_space<vmem>>, vector<8x32xf32>
    tpu.vector_store %arg21[%c0_516, %c0_517], %871 {strides = array<i32>} : memref<8x32xf32, #tpu.memory_space<vmem>>, vector<8x32xf32>,
    %876 = arith.index_cast %848 : i32 to index
    %c0_518 = arith.constant 0 : index
    %877 = vector.load %arg18[%876, %c0_518] : memref<64x32xf32, #tpu.memory_space<vmem>>, vector<8x32xf32>
    tpu.vector_store %arg18[%876, %c0_518], %873 {strides = array<i32>} : memref<64x32xf32, #tpu.memory_space<vmem>>, vector<8x32xf32>,
    %878 = arith.index_cast %851 : i32 to index
    %c0_519 = arith.constant 0 : index
    %879 = vector.load %arg17[%878, %c0_519] : memref<64x128xf32, #tpu.memory_space<vmem>>, vector<8x128xf32>
    %c0_520 = arith.constant 0 : index
    %c0_521 = arith.constant 0 : index
    %880 = vector.load %arg22[%c0_520, %c0_521] : memref<8x32xf32, #tpu.memory_space<vmem>>, vector<8x32xf32>
    %c0_522 = arith.constant 0 : index
    %c0_523 = arith.constant 0 : index
    %881 = vector.load %arg11[%c0_522, %c0_523] : memref<32x128xf32, #tpu.memory_space<vmem>>, vector<32x128xf32>
    %cst_524 = arith.constant dense<0.000000e+00> : vector<8x128xf32>
    %882 = tpu.matmul %880, %881, %cst_524 {dimension_numbers = #tpu.dot_dimension_numbers<[1], [0], [0], [1], [0, 0, 1, 1], [], []>} : vector<8x32xf32>, vector<32x128xf32>, vector<8x128xf32> -> vector<8x128xf32>
    %883 = arith.addf %879, %882 : vector<8x128xf32>
    %c0_525 = arith.constant 0 : index
    %c0_526 = arith.constant 0 : index
    %884 = vector.load %arg23[%c0_525, %c0_526] : memref<8x32xf32, #tpu.memory_space<vmem>>, vector<8x32xf32>
    %885 = arith.negf %883 : vector<8x128xf32>
    %886 = math.exp %885 : vector<8x128xf32>
    %cst_527 = arith.constant 1.000000e+00 : f32
    %887 = vector.broadcast %cst_527 : f32 to vector<8x128xf32>
    %888 = arith.addf %887, %886 : vector<8x128xf32>
    %889 = arith.divf %887, %888 : vector<8x128xf32>
    %890 = math.tanh %883 : vector<8x128xf32>
    %891 = vector.extract_strided_slice %889 {offsets = [0, 0], sizes = [8, 32], strides = [1, 1]} : vector<8x128xf32> to vector<8x32xf32>
    %892 = vector.extract_strided_slice %889 {offsets = [0, 32], sizes = [8, 32], strides = [1, 1]} : vector<8x128xf32> to vector<8x32xf32>
    %893 = vector.extract_strided_slice %890 {offsets = [0, 64], sizes = [8, 32], strides = [1, 1]} : vector<8x128xf32> to vector<8x32xf32>
    %894 = vector.extract_strided_slice %889 {offsets = [0, 96], sizes = [8, 32], strides = [1, 1]} : vector<8x128xf32> to vector<8x32xf32>
    %895 = arith.mulf %892, %884 : vector<8x32xf32>
    %896 = arith.mulf %891, %893 : vector<8x32xf32>
    %897 = arith.addf %895, %896 : vector<8x32xf32>
    %898 = math.tanh %897 : vector<8x32xf32>
    %899 = arith.mulf %894, %898 : vector<8x32xf32>
    %c0_528 = arith.constant 0 : index
    %c0_529 = arith.constant 0 : index
    %900 = vector.load %arg22[%c0_528, %c0_529] : memref<8x32xf32, #tpu.memory_space<vmem>>, vector<8x32xf32>
    tpu.vector_store %arg22[%c0_528, %c0_529], %899 {strides = array<i32>} : memref<8x32xf32, #tpu.memory_space<vmem>>, vector<8x32xf32>,
    %c0_530 = arith.constant 0 : index
    %c0_531 = arith.constant 0 : index
    %901 = vector.load %arg23[%c0_530, %c0_531] : memref<8x32xf32, #tpu.memory_space<vmem>>, vector<8x32xf32>
    tpu.vector_store %arg23[%c0_530, %c0_531], %897 {strides = array<i32>} : memref<8x32xf32, #tpu.memory_space<vmem>>, vector<8x32xf32>,
    %902 = arith.index_cast %851 : i32 to index
    %c0_532 = arith.constant 0 : index
    %903 = vector.load %arg19[%902, %c0_532] : memref<64x32xf32, #tpu.memory_space<vmem>>, vector<8x32xf32>
    tpu.vector_store %arg19[%902, %c0_532], %899 {strides = array<i32>} : memref<64x32xf32, #tpu.memory_space<vmem>>, vector<8x32xf32>,
    %c7_i32_533 = arith.constant 7 : i32
    %c8_i32_534 = arith.constant 8 : i32
    %904 = arith.muli %c7_i32_533, %c8_i32_534 : i32
    %905 = tpu.assume_multiple %904, 8 : i32
    %c7_i32_535 = arith.constant 7 : i32
    %906 = arith.subi %c7_i32_535, %c7_i32_533 : i32
    %c8_i32_536 = arith.constant 8 : i32
    %907 = arith.muli %906, %c8_i32_536 : i32
    %908 = tpu.assume_multiple %907, 8 : i32
    %909 = arith.index_cast %905 : i32 to index
    %c0_537 = arith.constant 0 : index
    %910 = vector.load %arg16[%909, %c0_537] : memref<64x128xf32, #tpu.memory_space<vmem>>, vector<8x128xf32>
    %c0_538 = arith.constant 0 : index
    %c0_539 = arith.constant 0 : index
    %911 = vector.load %arg20[%c0_538, %c0_539] : memref<8x32xf32, #tpu.memory_space<vmem>>, vector<8x32xf32>
    %c0_540 = arith.constant 0 : index
    %c0_541 = arith.constant 0 : index
    %912 = vector.load %arg8[%c0_540, %c0_541] : memref<32x128xf32, #tpu.memory_space<vmem>>, vector<32x128xf32>
    %cst_542 = arith.constant dense<0.000000e+00> : vector<8x128xf32>
    %913 = tpu.matmul %911, %912, %cst_542 {dimension_numbers = #tpu.dot_dimension_numbers<[1], [0], [0], [1], [0, 0, 1, 1], [], []>} : vector<8x32xf32>, vector<32x128xf32>, vector<8x128xf32> -> vector<8x128xf32>
    %914 = arith.addf %910, %913 : vector<8x128xf32>
    %c0_543 = arith.constant 0 : index
    %c0_544 = arith.constant 0 : index
    %915 = vector.load %arg21[%c0_543, %c0_544] : memref<8x32xf32, #tpu.memory_space<vmem>>, vector<8x32xf32>
    %916 = arith.negf %914 : vector<8x128xf32>
    %917 = math.exp %916 : vector<8x128xf32>
    %cst_545 = arith.constant 1.000000e+00 : f32
    %918 = vector.broadcast %cst_545 : f32 to vector<8x128xf32>
    %919 = arith.addf %918, %917 : vector<8x128xf32>
    %920 = arith.divf %918, %919 : vector<8x128xf32>
    %921 = math.tanh %914 : vector<8x128xf32>
    %922 = vector.extract_strided_slice %920 {offsets = [0, 0], sizes = [8, 32], strides = [1, 1]} : vector<8x128xf32> to vector<8x32xf32>
    %923 = vector.extract_strided_slice %920 {offsets = [0, 32], sizes = [8, 32], strides = [1, 1]} : vector<8x128xf32> to vector<8x32xf32>
    %924 = vector.extract_strided_slice %921 {offsets = [0, 64], sizes = [8, 32], strides = [1, 1]} : vector<8x128xf32> to vector<8x32xf32>
    %925 = vector.extract_strided_slice %920 {offsets = [0, 96], sizes = [8, 32], strides = [1, 1]} : vector<8x128xf32> to vector<8x32xf32>
    %926 = arith.mulf %923, %915 : vector<8x32xf32>
    %927 = arith.mulf %922, %924 : vector<8x32xf32>
    %928 = arith.addf %926, %927 : vector<8x32xf32>
    %929 = math.tanh %928 : vector<8x32xf32>
    %930 = arith.mulf %925, %929 : vector<8x32xf32>
    %c0_546 = arith.constant 0 : index
    %c0_547 = arith.constant 0 : index
    %931 = vector.load %arg20[%c0_546, %c0_547] : memref<8x32xf32, #tpu.memory_space<vmem>>, vector<8x32xf32>
    tpu.vector_store %arg20[%c0_546, %c0_547], %930 {strides = array<i32>} : memref<8x32xf32, #tpu.memory_space<vmem>>, vector<8x32xf32>,
    %c0_548 = arith.constant 0 : index
    %c0_549 = arith.constant 0 : index
    %932 = vector.load %arg21[%c0_548, %c0_549] : memref<8x32xf32, #tpu.memory_space<vmem>>, vector<8x32xf32>
    tpu.vector_store %arg21[%c0_548, %c0_549], %928 {strides = array<i32>} : memref<8x32xf32, #tpu.memory_space<vmem>>, vector<8x32xf32>,
    %933 = arith.index_cast %905 : i32 to index
    %c0_550 = arith.constant 0 : index
    %934 = vector.load %arg18[%933, %c0_550] : memref<64x32xf32, #tpu.memory_space<vmem>>, vector<8x32xf32>
    tpu.vector_store %arg18[%933, %c0_550], %930 {strides = array<i32>} : memref<64x32xf32, #tpu.memory_space<vmem>>, vector<8x32xf32>,
    %935 = arith.index_cast %908 : i32 to index
    %c0_551 = arith.constant 0 : index
    %936 = vector.load %arg17[%935, %c0_551] : memref<64x128xf32, #tpu.memory_space<vmem>>, vector<8x128xf32>
    %c0_552 = arith.constant 0 : index
    %c0_553 = arith.constant 0 : index
    %937 = vector.load %arg22[%c0_552, %c0_553] : memref<8x32xf32, #tpu.memory_space<vmem>>, vector<8x32xf32>
    %c0_554 = arith.constant 0 : index
    %c0_555 = arith.constant 0 : index
    %938 = vector.load %arg11[%c0_554, %c0_555] : memref<32x128xf32, #tpu.memory_space<vmem>>, vector<32x128xf32>
    %cst_556 = arith.constant dense<0.000000e+00> : vector<8x128xf32>
    %939 = tpu.matmul %937, %938, %cst_556 {dimension_numbers = #tpu.dot_dimension_numbers<[1], [0], [0], [1], [0, 0, 1, 1], [], []>} : vector<8x32xf32>, vector<32x128xf32>, vector<8x128xf32> -> vector<8x128xf32>
    %940 = arith.addf %936, %939 : vector<8x128xf32>
    %c0_557 = arith.constant 0 : index
    %c0_558 = arith.constant 0 : index
    %941 = vector.load %arg23[%c0_557, %c0_558] : memref<8x32xf32, #tpu.memory_space<vmem>>, vector<8x32xf32>
    %942 = arith.negf %940 : vector<8x128xf32>
    %943 = math.exp %942 : vector<8x128xf32>
    %cst_559 = arith.constant 1.000000e+00 : f32
    %944 = vector.broadcast %cst_559 : f32 to vector<8x128xf32>
    %945 = arith.addf %944, %943 : vector<8x128xf32>
    %946 = arith.divf %944, %945 : vector<8x128xf32>
    %947 = math.tanh %940 : vector<8x128xf32>
    %948 = vector.extract_strided_slice %946 {offsets = [0, 0], sizes = [8, 32], strides = [1, 1]} : vector<8x128xf32> to vector<8x32xf32>
    %949 = vector.extract_strided_slice %946 {offsets = [0, 32], sizes = [8, 32], strides = [1, 1]} : vector<8x128xf32> to vector<8x32xf32>
    %950 = vector.extract_strided_slice %947 {offsets = [0, 64], sizes = [8, 32], strides = [1, 1]} : vector<8x128xf32> to vector<8x32xf32>
    %951 = vector.extract_strided_slice %946 {offsets = [0, 96], sizes = [8, 32], strides = [1, 1]} : vector<8x128xf32> to vector<8x32xf32>
    %952 = arith.mulf %949, %941 : vector<8x32xf32>
    %953 = arith.mulf %948, %950 : vector<8x32xf32>
    %954 = arith.addf %952, %953 : vector<8x32xf32>
    %955 = math.tanh %954 : vector<8x32xf32>
    %956 = arith.mulf %951, %955 : vector<8x32xf32>
    %c0_560 = arith.constant 0 : index
    %c0_561 = arith.constant 0 : index
    %957 = vector.load %arg22[%c0_560, %c0_561] : memref<8x32xf32, #tpu.memory_space<vmem>>, vector<8x32xf32>
    tpu.vector_store %arg22[%c0_560, %c0_561], %956 {strides = array<i32>} : memref<8x32xf32, #tpu.memory_space<vmem>>, vector<8x32xf32>,
    %c0_562 = arith.constant 0 : index
    %c0_563 = arith.constant 0 : index
    %958 = vector.load %arg23[%c0_562, %c0_563] : memref<8x32xf32, #tpu.memory_space<vmem>>, vector<8x32xf32>
    tpu.vector_store %arg23[%c0_562, %c0_563], %954 {strides = array<i32>} : memref<8x32xf32, #tpu.memory_space<vmem>>, vector<8x32xf32>,
    %959 = arith.index_cast %908 : i32 to index
    %c0_564 = arith.constant 0 : index
    %960 = vector.load %arg19[%959, %c0_564] : memref<64x32xf32, #tpu.memory_space<vmem>>, vector<8x32xf32>
    tpu.vector_store %arg19[%959, %c0_564], %956 {strides = array<i32>} : memref<64x32xf32, #tpu.memory_space<vmem>>, vector<8x32xf32>,
    %c8_i32_565 = arith.constant 8 : i32
    %c0_566 = arith.constant 0 : index
    %c0_567 = arith.constant 0 : index
    %961 = vector.load %arg18[%c0_566, %c0_567] : memref<64x32xf32, #tpu.memory_space<vmem>>, vector<64x32xf32>
    %c0_568 = arith.constant 0 : index
    %c0_569 = arith.constant 0 : index
    %962 = vector.load %arg13[%c0_568, %c0_569] : memref<64x128xf32, #tpu.memory_space<vmem>>, vector<32x128xf32>
    %cst_570 = arith.constant dense<0.000000e+00> : vector<64x128xf32>
    %963 = tpu.matmul %961, %962, %cst_570 {dimension_numbers = #tpu.dot_dimension_numbers<[1], [0], [0], [1], [0, 0, 1, 1], [], []>} : vector<64x32xf32>, vector<32x128xf32>, vector<64x128xf32> -> vector<64x128xf32>
    %c0_571 = arith.constant 0 : index
    %c0_572 = arith.constant 0 : index
    %964 = vector.load %arg19[%c0_571, %c0_572] : memref<64x32xf32, #tpu.memory_space<vmem>>, vector<64x32xf32>
    %c32_573 = arith.constant 32 : index
    %c0_574 = arith.constant 0 : index
    %965 = vector.load %arg13[%c32_573, %c0_574] : memref<64x128xf32, #tpu.memory_space<vmem>>, vector<32x128xf32>
    %cst_575 = arith.constant dense<0.000000e+00> : vector<64x128xf32>
    %966 = tpu.matmul %964, %965, %cst_575 {dimension_numbers = #tpu.dot_dimension_numbers<[1], [0], [0], [1], [0, 0, 1, 1], [], []>} : vector<64x32xf32>, vector<32x128xf32>, vector<64x128xf32> -> vector<64x128xf32>
    %967 = arith.addf %963, %966 : vector<64x128xf32>
    %c0_576 = arith.constant 0 : index
    %c0_577 = arith.constant 0 : index
    %968 = vector.load %arg14[%c0_576, %c0_577] : memref<1x128xf32, #tpu.memory_space<vmem>>, vector<1x128xf32>
    %969 = vector.broadcast %968 : vector<1x128xf32> to vector<64x128xf32>
    %970 = arith.addf %967, %969 : vector<64x128xf32>
    %c0_578 = arith.constant 0 : index
    %c0_579 = arith.constant 0 : index
    %971 = vector.load %arg15[%c0_578, %c0_579] : memref<64x128xf32, #tpu.memory_space<vmem>>, vector<64x128xf32>
    tpu.vector_store %arg15[%c0_578, %c0_579], %970 {strides = array<i32>} : memref<64x128xf32, #tpu.memory_space<vmem>>, vector<64x128xf32>,
    return
  }
}

</mosaic_0001>

<bundles_post_ra>
// kernel: tpu_custom_call.1
= control target key start
LH: loop header
LB: loop body
LE: loop exit
PB: predicated region body
PF: predicated region fallthrough
CT: control target
= control target key end

     0   :  { %20 = vsyncpa [#allocation11], 0  ;;  %s7868_s0 = inlined_call_operand.vmem [shape: f32[64,32], index: 0, kind: input, shape index: {}]   ;;  %s7869_s1 = inlined_call_operand.hbm [shape: f32[32,128], index: 1, kind: input, shape index: {}]   ;;  %s7870_s2 = inlined_call_operand.hbm [shape: f32[32,128], index: 2, kind: input, shape index: {}]   ;;  %s7871_s3 = inlined_call_operand.vmem [shape: f32[1,128], index: 3, kind: input, shape index: {}]   ;;  %s7872_s4 = inlined_call_operand.hbm [shape: f32[32,128], index: 4, kind: input, shape index: {}]   ;;  %s7873_s5 = inlined_call_operand.hbm [shape: f32[32,128], index: 5, kind: input, shape index: {}]   ;;  %s7874_s6 = inlined_call_operand.vmem [shape: f32[1,128], index: 6, kind: input, shape index: {}]   ;;  %s7875_s7 = inlined_call_operand.vmem [shape: f32[64,128], index: 7, kind: input, shape index: {}]   ;;  %s7876_s8 = inlined_call_operand.hbm [shape: f32[32,128], index: 8, kind: input, shape index: {}]   ;;  %s7877_s9 = inlined_call_operand.hbm [shape: f32[1,128], index: 9, kind: input, shape index: {}]   ;;  %s7878_s10 = inlined_call_operand.vmem [shape: f32[64,128], index: 10, kind: input, shape index: {}]   ;;  %s7879_s11 = inlined_call_operand.hbm [shape: f32[32,128], index: 11, kind: input, shape index: {}]   ;;  %s7880_s12 = inlined_call_operand.vmem [shape: f32[1,128], index: 12, kind: input, shape index: {}]   ;;  %s7881_s13 = inlined_call_operand.hbm [shape: f32[64,128], index: 13, kind: input, shape index: {}]   ;;  %s7882_s14 = inlined_call_operand.vmem [shape: f32[1,128], index: 14, kind: input, shape index: {}]   ;;  %s7883_s15 = inlined_call_operand.hbm [shape: f32[64,128], index: 15, kind: output, shape index: {}]  }
   0x1   :  { %21 = vsyncpa [#allocation14], 0 }
   0x2   :  { %22 = vsyncpa [#allocation17], 0 }
   0x3   :  { %23 = vsyncpa [#allocation20], 0 }
   0x4   :  { %24 = vsyncpa [#allocation23], 0 }
   0x5   :  { %25 = vsyncpa [#allocation12], 0  ;;  %s6851_s18 = smov [#allocation13]   ;;  %s6852_s20 = smov [#allocation16]  }
   0x6   :  { %s45_s19 = sshll.u32 %s6851_s18, 4  ;;  %s71_s21 = sshll.u32 %s6852_s20, 4  ;;  %s46_s19 = int_to_ptr.vmem [resolvable:$true] %s45_s19  ;;  %s6948_s21 = int_to_ptr.vmem [resolvable:$true] %s71_s21 }
   0x7   :  { %s6641_s24 = scalar_lea.hbm %s7870_s2, 512 }
   0x8   :  { %p6642_p0 = scmp.ne.s32.totalorder %s7870_s2, %s6641_s24  ;;  %p6645_p1 = scmp.lt.u32.totalorder %s6641_s24, %s7870_s2 }
   0xa   :  { %p6647_p2 = pnand %p6645_p1, %p6642_p0 }
   0xc   :  { %6650 = shalt.err (!%p6647_p2)
}
   0xd   :  { %s6651_s29 = scalar_lea.vmem %s46_s19, 512  ;;  %p6656_p4 = scmp.lt.s32.totalorder %s46_s19, %s46_s19 }
   0xe   :  { %p6652_p3 = scmp.ne.s32.totalorder %s46_s19, %s6651_s29  ;;  %p6657_p5 = scmp.lt.s32.totalorder %s6651_s29, %s6651_s29 }
  0x10   :  { %p6658_p6 = por %p6657_p5, %p6656_p4 }
  0x12   :  { %p6659_p7 = pnand %p6658_p6, %p6652_p3 }
  0x14   :  { %6662 = shalt.err (!%p6659_p7)
}
  0x15   :  { %s6853_s30 = smov 128   ;;  %s6854_s16 = smov 8  }
  0x16   :  { %51 = dma.hbm_to_vmem [thread:$0]  %s7870_s2, 512, %s46_s19, [#allocation14], %s6853_s30, %s6853_s30, %s6854_s16  }
  0x17   :  { %s6663_s23 = scalar_lea.hbm %s7873_s5, 512 }
  0x18   :  { %p6664_p8 = scmp.ne.s32.totalorder %s7873_s5, %s6663_s23  ;;  %p6667_p9 = scmp.lt.u32.totalorder %s6663_s23, %s7873_s5 }
  0x1a   :  { %p6669_p10 = pnand %p6667_p9, %p6664_p8 }
  0x1c   :  { %6672 = shalt.err (!%p6669_p10)
}
  0x1d   :  { %s6673_s28 = scalar_lea.vmem %s6948_s21, 512  ;;  %p6678_p12 = scmp.lt.s32.totalorder %s6948_s21, %s6948_s21 }
  0x1e   :  { %p6674_p11 = scmp.ne.s32.totalorder %s6948_s21, %s6673_s28  ;;  %p6679_p13 = scmp.lt.s32.totalorder %s6673_s28, %s6673_s28 }
  0x20   :  { %p6680_p0 = por %p6679_p13, %p6678_p12 }
  0x22   :  { %p6681_p1 = pnand %p6680_p0, %p6674_p11 }
  0x24   :  { %6684 = shalt.err (!%p6681_p1)
}
  0x25   :  { %77 = dma.hbm_to_vmem [thread:$0]  %s7873_s5, 512, %s6948_s21, [#allocation17], %s6853_s30, %s6853_s30, %s6854_s16  }
  0x26   :  { %s6855_s29 = smov [#allocation19]   ;;  %s6856_s18 = smov [#allocation10]  }
  0x27   :  { %s100_s17 = sshll.u32 %s6855_s29, 4  ;;  %s33_s20 = sshll.u32 %s6856_s18, 4  ;;  %s101_s17 = int_to_ptr.vmem [resolvable:$true] %s100_s17  ;;  %s6985_s20 = int_to_ptr.vmem [resolvable:$true] %s33_s20 }
  0x28   :  { %s6685_s24 = scalar_lea.hbm %s7877_s9, 16 }
  0x29   :  { %p6686_p2 = scmp.ne.s32.totalorder %s7877_s9, %s6685_s24  ;;  %p6689_p3 = scmp.lt.u32.totalorder %s6685_s24, %s7877_s9 }
  0x2b   :  { %p6691_p4 = pnand %p6689_p3, %p6686_p2 }
  0x2d   :  { %6694 = shalt.err (!%p6691_p4)
}
  0x2e   :  { %s6695_s5 = scalar_lea.vmem %s101_s17, 16  ;;  %s6699_s21 = scalar_lea.vmem %s101_s17, 32 }
  0x2f   :  { %p6696_p5 = scmp.ne.s32.totalorder %s101_s17, %s6695_s5  ;;  %p6700_p6 = scmp.lt.s32.totalorder %s101_s17, %s101_s17 }
  0x30   :  { %p6701_p7 = scmp.lt.s32.totalorder %s6699_s21, %s6695_s5 }
  0x32   :  { %p6702_p8 = por %p6701_p7, %p6700_p6 }
  0x34   :  { %p6703_p9 = pnand %p6702_p8, %p6696_p5 }
  0x36   :  { %6706 = shalt.err (!%p6703_p9)
}
  0x37   :  { %103 = dma.hbm_to_vmem [thread:$0]  %s7877_s9, 16, %s101_s17, [#allocation20]  }
  0x38   :  { %s6707_s22 = scalar_lea.hbm %s7869_s1, 512 }
  0x39   :  { %p6708_p10 = scmp.ne.s32.totalorder %s7869_s1, %s6707_s22  ;;  %p6711_p11 = scmp.lt.u32.totalorder %s6707_s22, %s7869_s1 }
  0x3b   :  { %p6713_p12 = pnand %p6711_p11, %p6708_p10 }
  0x3d   :  { %6716 = shalt.err (!%p6713_p12)
}
  0x3e   :  { %s6717_s27 = scalar_lea.vmem %s6985_s20, 512  ;;  %p6722_p0 = scmp.lt.s32.totalorder %s6985_s20, %s6985_s20 }
  0x3f   :  { %p6718_p13 = scmp.ne.s32.totalorder %s6985_s20, %s6717_s27  ;;  %p6723_p1 = scmp.lt.s32.totalorder %s6717_s27, %s6717_s27 }
  0x41   :  { %p6724_p2 = por %p6723_p1, %p6722_p0 }
  0x43   :  { %p6725_p3 = pnand %p6724_p2, %p6718_p13 }
  0x45   :  { %6728 = shalt.err (!%p6725_p3)
}
  0x46   :  { %39 = dma.hbm_to_vmem [thread:$0]  %s7869_s1, 512, %s6985_s20, [#allocation11], %s6853_s30, %s6853_s30, %s6854_s16  }
  0x47   :  { %s6857_s28 = smov [#allocation15]   ;;  %s6858_s21 = smov [#allocation18]  }
  0x48   :  { %s59_s5 = sshll.u32 %s6857_s28, 4  ;;  %s87_s2 = sshll.u32 %s6858_s21, 4  ;;  %s60_s5 = int_to_ptr.vmem [resolvable:$true] %s59_s5  ;;  %s7019_s2 = int_to_ptr.vmem [resolvable:$true] %s87_s2 }
  0x49   :  { %s6729_s18 = scalar_lea.hbm %s7872_s4, 512 }
  0x4a   :  { %p6730_p4 = scmp.ne.s32.totalorder %s7872_s4, %s6729_s18  ;;  %p6733_p5 = scmp.lt.u32.totalorder %s6729_s18, %s7872_s4 }
  0x4c   :  { %p6735_p6 = pnand %p6733_p5, %p6730_p4 }
  0x4e   :  { %6738 = shalt.err (!%p6735_p6)
}
  0x4f   :  { %s6739_s1 = scalar_lea.vmem %s60_s5, 512  ;;  %p6744_p8 = scmp.lt.s32.totalorder %s60_s5, %s60_s5 }
  0x50   :  { %p6740_p7 = scmp.ne.s32.totalorder %s60_s5, %s6739_s1  ;;  %p6745_p9 = scmp.lt.s32.totalorder %s6739_s1, %s6739_s1 }
  0x52   :  { %p6746_p10 = por %p6745_p9, %p6744_p8 }
  0x54   :  { %p6747_p11 = pnand %p6746_p10, %p6740_p7 }
  0x56   :  { %6750 = shalt.err (!%p6747_p11)
}
  0x57   :  { %65 = dma.hbm_to_vmem [thread:$0]  %s7872_s4, 512, %s60_s5, [#allocation14], %s6853_s30, %s6853_s30, %s6854_s16  }
  0x58   :  { %s6751_s17 = scalar_lea.hbm %s7876_s8, 512 }
  0x59   :  { %p6752_p12 = scmp.ne.s32.totalorder %s7876_s8, %s6751_s17  ;;  %p6755_p13 = scmp.lt.u32.totalorder %s6751_s17, %s7876_s8 }
  0x5b   :  { %p6757_p0 = pnand %p6755_p13, %p6752_p12 }
  0x5d   :  { %6760 = shalt.err (!%p6757_p0)
}
  0x5e   :  { %s6761_s18 = scalar_lea.vmem %s7019_s2, 512  ;;  %p6766_p2 = scmp.lt.s32.totalorder %s7019_s2, %s7019_s2 }
  0x5f   :  { %p6762_p1 = scmp.ne.s32.totalorder %s7019_s2, %s6761_s18  ;;  %p6767_p3 = scmp.lt.s32.totalorder %s6761_s18, %s6761_s18 }
  0x61   :  { %p6768_p4 = por %p6767_p3, %p6766_p2 }
  0x63   :  { %p6769_p5 = pnand %p6768_p4, %p6762_p1 }
  0x65   :  { %6772 = shalt.err (!%p6769_p5)
}
  0x66   :  { %93 = dma.hbm_to_vmem [thread:$0]  %s7876_s8, 512, %s7019_s2, [#allocation17], %s6853_s30, %s6853_s30, %s6854_s16  }
  0x67   :  { %s6859_s22 = smov [#allocation21]   ;;  %s6860_s24 = smov [#allocation22]  }
  0x68   :  { %s111_s23 = sshll.u32 %s6859_s22, 4  ;;  %s125_s25 = sshll.u32 %s6860_s24, 4  ;;  %s112_s23 = int_to_ptr.vmem [resolvable:$true] %s111_s23  ;;  %s7056_s25 = int_to_ptr.vmem [resolvable:$true] %s125_s25 }
  0x69   :  { %s6773_s26 = scalar_lea.hbm %s7879_s11, 512 }
  0x6a   :  { %p6774_p6 = scmp.ne.s32.totalorder %s7879_s11, %s6773_s26  ;;  %p6777_p7 = scmp.lt.u32.totalorder %s6773_s26, %s7879_s11 }
  0x6c   :  { %p6779_p8 = pnand %p6777_p7, %p6774_p6 }
  0x6e   :  { %6782 = shalt.err (!%p6779_p8)
}
  0x6f   :  { %s6783_s8 = scalar_lea.vmem %s112_s23, 512  ;;  %p6788_p10 = scmp.lt.s32.totalorder %s112_s23, %s112_s23 }
  0x70   :  { %p6784_p9 = scmp.ne.s32.totalorder %s112_s23, %s6783_s8  ;;  %p6789_p11 = scmp.lt.s32.totalorder %s6783_s8, %s6783_s8 }
  0x72   :  { %p6790_p12 = por %p6789_p11, %p6788_p10 }
  0x74   :  { %p6791_p13 = pnand %p6790_p12, %p6784_p9 }
  0x76   :  { %6794 = shalt.err (!%p6791_p13)
}
  0x77   :  { %117 = dma.hbm_to_vmem [thread:$0]  %s7879_s11, 512, %s112_s23, [#allocation20], %s6853_s30, %s6853_s30, %s6854_s16  }
  0x78   :  { %s6795_s18 = scalar_lea.hbm %s7881_s13, 1024 }
  0x79   :  { %p6796_p0 = scmp.ne.s32.totalorder %s7881_s13, %s6795_s18  ;;  %p6799_p1 = scmp.lt.u32.totalorder %s6795_s18, %s7881_s13 }
  0x7b   :  { %p6801_p2 = pnand %p6799_p1, %p6796_p0 }
  0x7d   :  { %6804 = shalt.err (!%p6801_p2)
}
  0x7e   :  { %s6805_s1 = scalar_lea.vmem %s7056_s25, 1024  ;;  %p6810_p4 = scmp.lt.s32.totalorder %s7056_s25, %s7056_s25 }
  0x7f   :  { %p6806_p3 = scmp.ne.s32.totalorder %s7056_s25, %s6805_s1  ;;  %p6811_p5 = scmp.lt.s32.totalorder %s6805_s1, %s6805_s1 }
  0x81   :  { %p6812_p6 = por %p6811_p5, %p6810_p4 }
  0x83   :  { %p6813_p7 = pnand %p6812_p6, %p6806_p3 }
  0x85   :  { %6816 = shalt.err (!%p6813_p7)
}
  0x86   :  { %131 = dma.hbm_to_vmem [thread:$0]  %s7881_s13, 1024, %s7056_s25, [#allocation23], %s6853_s30, %s6853_s30, %s6854_s16  }
  0x87   :  { %6839 = dma.done.wait [#allocation11], 512  }
  0x88   :  { %6840 = vsyncadd [#allocation11], 4294966784 }
  0x89   :  { %6841 = dma.done.wait [#allocation14], 1024  }
  0x8a   :  { %6842 = vsyncadd [#allocation14], 4294966272 }
  0x8b   :  { %6843 = dma.done.wait [#allocation17], 1024  }
  0x8c   :  { %6844 = vsyncadd [#allocation17], 4294966272 }
  0x8d   :  { %6845 = dma.done.wait [#allocation20], 528  }
  0x8e   :  { %6846 = vsyncadd [#allocation20], 4294966768 }
  0x8f   :  { %6847 = dma.done.wait [#allocation23], 1024  }
  0x90   :  { %6848 = vsyncadd [#allocation23], 4294966272  ;;  %vm177_vm0 = vcmask 261120   ;;  %v6861_v0 = vmov 0.0|0.0   ;;  %vm6862_vm1 = vmmov 0   ;;  %v6863_v1 = vmov 0.0  }
  0x91   :  { %6104 = vmatprep.subr.bf16.mxu0 %v6861_v0  ;;  %5624 = vmatprep.mubr.msk.f32.mxu0 %vm6862_vm1, %v6863_v1  ;;  %439 = vst.msk [vmem:[#allocation6] sm:$0xff] %vm177_vm0, %v6863_v1  ;;  %440 = vst.msk [vmem:[#allocation7] sm:$0xff] %vm177_vm0, %v6863_v1  ;;  %v166_v2 = vld [vmem:[#allocation10] sm:$0xff]  ;;  %v167_v3 = vld [vmem:[#allocation10 + $0x8] sm:$0xff]  ;;  %s6864_s17 = smov 32   ;;  %s6866_s11 = smov 96  }
  0x92   :  { %441 = vst.msk [vmem:[#allocation8] sm:$0xff] %vm177_vm0, %v6863_v1  ;;  %442 = vst.msk [vmem:[#allocation9] sm:$0xff] %vm177_vm0, %v6863_v1  ;;  %v168_v4 = vld [vmem:[#allocation10 + $0x10] sm:$0xff]  ;;  %v6088_v5 = vpack.c.bf16 %v167_v3, %v166_v2  ;;  %v169_v6 = vld [vmem:[#allocation10 + $0x18] sm:$0xff] }
  0x93   :  { %v445_v7 = vld [vmem:[#allocation13] sm:$0xff]  ;;  %v446_v8 = vld [vmem:[#allocation13 + $0x8] sm:$0xff]  ;;  %v6092_v9 = vpack.c.bf16 %v169_v6, %v168_v4  ;;  %v447_v14 = vld [vmem:[#allocation13 + $0x10] sm:$0xff] }
  0x94   :  { %v7104_v10 = vpack.c.bf16 %v446_v8, %v445_v7  ;;  %v158_v11 = vld [vmem:[%s7868_s0] sm:$0xff]  ;;  %6089 = vmatprep.subr.bf16.mxu1 %v6088_v5  ;;  %v316_v13 = vld [vmem:[#allocation15 + $0x8] sm:$0xff]  ;;  %v448_v15 = vld [vmem:[#allocation13 + $0x18] sm:$0xff] }
  0x95   :  { %v315_v12 = vld [vmem:[#allocation15] sm:$0xff]  ;;  %5584 = vmatprep.mubr.msk.f32.mxu1 %vm177_vm0, %v158_v11  ;;  %6091 = vmatpush3.bf16.msra.mxu1 %v6088_v5  ;;  %v7111_v16 = vpack.c.bf16 %v448_v15, %v447_v14  ;;  %v317_v18 = vld [vmem:[#allocation15 + $0x10] sm:$0xff]  ;;  %v318_v19 = vld [vmem:[#allocation15 + $0x18] sm:$0xff] }
  0x96   :  { %6106 = vmatpush3.bf16.msra.mxu0 %v7104_v10  ;;  %6093 = vmatprep.subr.bf16.mxu1 %v6092_v9  ;;  %v6096_v17 = vpack.c.bf16 %v316_v13, %v315_v12  ;;  %v159_v20 = vld [vmem:[%s7868_s0 + $0x8] sm:$0xff]  ;;  %v160_v23 = vld [vmem:[%s7868_s0 + $0x10] sm:$0xff]  ;;  %v6100_v24 = vpack.c.bf16 %v318_v19, %v317_v18  ;;  %v161_v25 = vld [vmem:[%s7868_s0 + $0x18] sm:$0xff] }
  0x97   :  { %6107 = vmatprep.subr.bf16.mxu0 %v6861_v0  ;;  %v162_v26 = vld [vmem:[%s7868_s0 + $0x20] sm:$0xff]  ;;  %v163_v27 = vld [vmem:[%s7868_s0 + $0x28] sm:$0xff]  ;;  %v164_v28 = vld [vmem:[%s7868_s0 + $0x30] sm:$0xff] }
  0x98   :  { %v444_v21 = vld [vmem:[#allocation6] sm:$0xff]  ;;  %v165_v29 = vld [vmem:[%s7868_s0 + $0x38] sm:$0xff]  ;;  %v567_v31 = vld [vmem:[#allocation16 + $0x8] sm:$0xff] }
  0x99   :  { %6095 = vmatpush3.bf16.msra.mxu1 %v6092_v9  ;;  %v644_v22 = vld [vmem:[#allocation9] sm:$0xff]  ;;  %v566_v30 = vld [vmem:[#allocation16] sm:$0xff]  ;;  %v568_v33 = vld [vmem:[#allocation16 + $0x10] sm:$0xff] }
  0x9a   :  { %6109 = vmatpush3.bf16.msra.mxu0 %v7111_v16  ;;  %6097 = vmatprep.subr.bf16.mxu1 %v6096_v17  ;;  %v7154_v32 = vpack.c.bf16 %v567_v31, %v566_v30  ;;  %v569_v34 = vld [vmem:[#allocation16 + $0x18] sm:$0xff]  ;;  %v565_v36 = vld [vmem:[#allocation8] sm:$0xff]  ;;  %v5187_v37 = vld [vmem:[%s7871_s3] ss:$0 sm:$0xff] }
  0x9b   :  { %653 = vrot.lane.b32.xlu1 %v644_v22, %s6864_s17  ;;  %6116 = vmatprep.subr.bf16.mxu0 %v6861_v0  ;;  %v7159_v35 = vpack.c.bf16 %v569_v34, %v568_v33  ;;  %v5196_v57 = vld [vmem:[%s7874_s6] ss:$0 sm:$0xff]  ;;  %s6865_s6 = smov 64   ;;  %v523_v19 = vld [vmem:[#allocation7] sm:$0xff] }
  0x9c   :  { %5585 = vmatmul.mubr.msk.f32.vlgmr.msra.gmra.mrb[0].mxu1 %vm177_vm0, %v159_v20 }
  0x9d   :  { %5625 = vmatmul.mubr.msk.f32.vlgmr.msra.gmra.mrb[0].mxu0 %vm177_vm0, %v444_v21  ;;  %6099 = vmatpush3.bf16.msra.mxu1 %v6096_v17 }
  0x9e   :  { %5587 = vmatprep.mubr.msk.f32.mxu1 %vm177_vm0, %v160_v23  ;;  %6101 = vmatprep.subr.bf16.mxu1 %v6100_v24 }
  0x9f   :  { %6118 = vmatpush3.bf16.msra.mxu0 %v7104_v10  ;;  %5646 = vmatprep.mubr.msk.f32.mxu0 %vm6862_vm1, %v6863_v1 }
  0xa0   :  { %6119 = vmatprep.subr.bf16.mxu0 %v6861_v0  ;;  %5588 = vmatmul.mubr.msk.f32.gmra.mrb[2].mxu1 %vm177_vm0, %v161_v25 }
  0xa1   :  { %5590 = vmatprep.mubr.msk.f32.mxu1 %vm177_vm0, %v162_v26  ;;  %6103 = vmatpush3.bf16.msra.mxu1 %v6100_v24 }
  0xa2   :  { %6110 = vmatprep.subr.bf16.mxu1 %v6861_v0 }
  0xa3   :  { %6121 = vmatpush3.bf16.msra.mxu0 %v7111_v16 }
  0xa4   :  { %6128 = vmatprep.subr.bf16.mxu0 %v6861_v0  ;;  %5591 = vmatmul.mubr.msk.f32.gmra.mrb[4].mxu1 %vm177_vm0, %v163_v27 }
  0xa5   :  { %5593 = vmatprep.mubr.msk.f32.mxu1 %vm177_vm0, %v164_v28 }
  0xa8   :  { %5594 = vmatmul.mubr.msk.f32.gmra.mrb[6].mxu1 %vm177_vm0, %v165_v29 }
  0xa9   :  { %5604 = vmatprep.mubr.msk.f32.mxu1 %vm177_vm0, %v158_v11 }
  0xac   :  { %5605 = vmatmul.mubr.msk.f32.vlgmr.msra.gmra.mrb[8].mxu1 %vm177_vm0, %v159_v20 }
  0xad   :  { %6112 = vmatpush3.bf16.msra.mxu1 %v7154_v32  ;;  %5607 = vmatprep.mubr.msk.f32.mxu1 %vm177_vm0, %v160_v23 }
  0xae   :  { %6113 = vmatprep.subr.bf16.mxu1 %v6861_v0 }
  0xb0   :  { %5608 = vmatmul.mubr.msk.f32.gmra.mrb[10].mxu1 %vm177_vm0, %v161_v25 }
  0xb1   :  { %5610 = vmatprep.mubr.msk.f32.mxu1 %vm177_vm0, %v162_v26  ;;  %6115 = vmatpush3.bf16.msra.mxu1 %v7159_v35 }
  0xb2   :  { %6122 = vmatprep.subr.bf16.mxu1 %v6861_v0 }
  0xb4   :  { %5611 = vmatmul.mubr.msk.f32.gmra.mrb[12].mxu1 %vm177_vm0, %v163_v27 }
  0xb5   :  { %5613 = vmatprep.mubr.msk.f32.mxu1 %vm177_vm0, %v164_v28 }
  0xb8   :  { %5614 = vmatmul.mubr.msk.f32.gmra.mrb[14].mxu1 %vm177_vm0, %v165_v29 }
  0xb9   :  { %5635 = vmatprep.mubr.msk.f32.mxu1 %vm6862_vm1, %v6863_v1 }
  0xbc   :  { %5636 = vmatmul.mubr.msk.f32.vlgmr.msra.gmra.mrb[16].mxu1 %vm177_vm0, %v565_v36 }
  0xbd   :  { %6124 = vmatpush3.bf16.msra.mxu1 %v7154_v32  ;;  %5657 = vmatprep.mubr.msk.f32.mxu1 %vm6862_vm1, %v6863_v1 }
  0xbe   :  { %6125 = vmatprep.subr.bf16.mxu1 %v6861_v0 }
  0xc1   :  { %6127 = vmatpush3.bf16.msra.mxu1 %v7159_v35 }
  0xc2   :  { %6134 = vmatprep.subr.bf16.mxu1 %v6861_v0 }
 0x10d   :  { %v654_v33 = vpop.permute.xlu1 %653 }
 0x16f   :  { %v5586_v38 = vpop.f32.mrb[0].mxu1 }
 0x170   :  { %v518_v39 = vpop.f32.mrb[0].mxu0  ;;  %v7181_v40 = vadd.f32 %v5586_v38, %v5187_v37  ;;  %v268_v41 = vpop.f32.mrb[1].mxu1 }
 0x171   :  { %v5626_v42 = vpop.f32.mrb[1].mxu0  ;;  %v269_v43 = vadd.f32 %v5187_v37, %v268_v41 }
 0x173   :  { %v522_v44 = vadd.f32 %v518_v39, %v269_v43  ;;  %v5589_v45 = vpop.f32.mrb[2].mxu1 }
 0x174   :  { %v7183_v46 = vadd.f32 %v5589_v45, %v5187_v37  ;;  %v278_v47 = vpop.f32.mrb[3].mxu1 }
 0x175   :  { %v7185_v48 = vadd.f32 %v5187_v37, %v278_v47  ;;  %v5206_v21 = vmul.f32 -1.442695, %v522_v44 }
 0x177   :  { %v5592_v49 = vpop.f32.mrb[4].mxu1 }
 0x178   :  { %v7187_v50 = vadd.f32 %v5592_v49, %v5187_v37  ;;  %v288_v51 = vpop.f32.mrb[5].mxu1 }
 0x179   :  { %v7189_v52 = vadd.f32 %v5187_v37, %v288_v51 }
 0x17b   :  { %v5595_v53 = vpop.f32.mrb[6].mxu1 }
 0x17c   :  { %v7191_v54 = vadd.f32 %v5595_v53, %v5187_v37  ;;  %v298_v55 = vpop.f32.mrb[7].mxu1 }
 0x17d   :  { %v7193_v56 = vadd.f32 %v5187_v37, %v298_v55 }
 0x17f   :  { %v5606_v58 = vpop.f32.mrb[8].mxu1 }
 0x180   :  { %v7198_v59 = vadd.f32 %v5606_v58, %v5196_v57  ;;  %v392_v60 = vpop.f32.mrb[9].mxu1 }
 0x181   :  { %v7200_v61 = vadd.f32 %v5196_v57, %v392_v60 }
 0x183   :  { %v5609_v62 = vpop.f32.mrb[10].mxu1 }
 0x184   :  { %v7202_v63 = vadd.f32 %v5609_v62, %v5196_v57  ;;  %v402_v2 = vpop.f32.mrb[11].mxu1 }
 0x185   :  { %v7204_v3 = vadd.f32 %v5196_v57, %v402_v2 }
 0x187   :  { %v5612_v4 = vpop.f32.mrb[12].mxu1 }
 0x188   :  { %v7206_v5 = vadd.f32 %v5612_v4, %v5196_v57  ;;  %v412_v6 = vpop.f32.mrb[13].mxu1 }
 0x189   :  { %v7208_v7 = vadd.f32 %v5196_v57, %v412_v6 }
 0x18b   :  { %v5615_v8 = vpop.f32.mrb[14].mxu1 }
 0x18c   :  { %v422_v9 = vpop.f32.mrb[15].mxu1  ;;  %v428_v12 = vadd.f32 %v5615_v8, %v5196_v57 }
 0x18d   :  { %v7210_v11 = vadd.f32 %v5196_v57, %v422_v9 }
 0x18f   :  { %v639_v13 = vpop.f32.mrb[16].mxu1 }
 0x190   :  { %v643_v14 = vadd.f32 %v639_v13, %v428_v12  ;;  %v5637_v15 = vpop.f32.mrb[17].mxu1 }
 0x192   :  { %6385 = vtanh.f32 %v643_v14  ;;  %v5208_v20 = vmul.f32 -1.442695, %v643_v14 }
 0x193   :  { %6387 = vtanh.f32 %v522_v44 }
 0x194   :  { %6389 = vpow2.f32 %v5208_v20 }
 0x195   :  { %6391 = vpow2.f32 %v5206_v21 }
 0x19c   :  { %v6386_v17 = vpop.eup %6385 }
 0x19d   :  { %658 = vrot.lane.b32.xlu0 %v6386_v17, %s6865_s6  ;;  %v6388_v18 = vpop.eup %6387 }
 0x19e   :  { %v6390_v22 = vpop.eup %6389 }
 0x19f   :  { %v648_v23 = vadd.f32 1.0, %v6390_v22  ;;  %v6392_v24 = vpop.eup %6391 }
 0x1a0   :  { %v527_v25 = vadd.f32 1.0, %v6392_v24 }
 0x1a1   :  { %537 = vrot.lane.b32.xlu0 %v6388_v18, %s6865_s6  ;;  %6393 = vrcp.f32 %v648_v23 }
 0x1a2   :  { %6395 = vrcp.f32 %v527_v25 }
 0x1a5   :  { %532 = vrot.lane.b32.xlu0 %v523_v19, %s6864_s17 }
 0x1ab   :  { %v6394_v26 = vpop.eup %6393 }
 0x1ac   :  { %v6396_v29 = vpop.eup %6395  ;;  %v656_v34 = vmul.f32 %v6394_v26, %v654_v33 }
 0x20f   :  { %v659_v27 = vpop.permute.xlu0 %658 }
 0x210   :  { %v661_v28 = vmul.f32 %v6394_v26, %v659_v27 }
 0x212   :  { %663 = vrot.lane.b32.xlu1 %v661_v28, %s6864_s17 }
 0x213   :  { %v538_v30 = vpop.permute.xlu0 %537 }
 0x214   :  { %v540_v31 = vmul.f32 %v6396_v29, %v538_v30 }
 0x216   :  { %542 = vrot.lane.b32.xlu1 %v540_v31, %s6864_s17 }
 0x217   :  { %v533_v36 = vpop.permute.xlu0 %532 }
 0x218   :  { %v535_v39 = vmul.f32 %v6396_v29, %v533_v36 }
 0x284   :  { %v664_v37 = vpop.permute.xlu1 %663 }
 0x285   :  { %v666_v38 = vadd.f32 %v664_v37, %v656_v34 }
 0x287   :  { %6397 = vtanh.f32 %v666_v38 }
 0x288   :  { %v543_v41 = vpop.permute.xlu1 %542 }
 0x289   :  { %v545_v42 = vadd.f32 %v543_v41, %v535_v39 }
 0x28b   :  { %6399 = vtanh.f32 %v545_v42 }
 0x291   :  { %v6398_v43 = vpop.eup %6397 }
 0x292   :  { %669 = vrot.lane.b32.xlu0 %v6398_v43, %s6865_s6 }
 0x295   :  { %v6400_v44 = vpop.eup %6399 }
 0x296   :  { %548 = vrot.lane.b32.xlu1 %v6400_v44, %s6865_s6 }
 0x304   :  { %v670_v45 = vpop.permute.xlu0 %669 }
 0x305   :  { %v672_v47 = vmul.f32 %v6394_v26, %v670_v45 }
 0x307   :  { %674 = vrot.lane.b32.xlu0 %v672_v47, %s6864_s17 }
 0x308   :  { %v549_v49 = vpop.permute.xlu1 %548 }
 0x309   :  { %v551_v51 = vmul.f32 %v6396_v29, %v549_v49 }
 0x30b   :  { %679 = vrot.lane.b32.xlu0 %v666_v38, %s6866_s11  ;;  %553 = vrot.lane.b32.xlu1 %v551_v51, %s6864_s17 }
 0x30f   :  { %558 = vrot.lane.b32.xlu0 %v545_v42, %s6866_s11 }
 0x379   :  { %v675_v53 = vpop.permute.xlu0 %674 }
 0x37a   :  { %677 = vst.msk [vmem:[#allocation8] sm:$0xff] %vm177_vm0, %v675_v53  ;;  %684 = vst.msk [vmem:[#allocation5 + $0x38] sm:$0xff] %vm177_vm0, %v675_v53 }
 0x37d   :  { %v680_v55 = vpop.permute.xlu0 %679  ;;  %v554_v57 = vpop.permute.xlu1 %553 }
 0x37e   :  { %682 = vst.msk [vmem:[#allocation9] sm:$0xff] %vm177_vm0, %v680_v55  ;;  %556 = vst.msk [vmem:[#allocation6] sm:$0xff] %vm177_vm0, %v554_v57 }
 0x37f   :  { %562 = vst.msk [vmem:[#allocation4] sm:$0xff] %vm177_vm0, %v554_v57 }
 0x381   :  { %v559_v58 = vpop.permute.xlu0 %558  ;;  %v809_v60 = vld [vmem:[#allocation8] sm:$0xff] }
 0x382   :  { %561 = vst.msk [vmem:[#allocation7] sm:$0xff] %vm177_vm0, %v559_v58  ;;  %5658 = vmatmul.mubr.msk.f32.vlgmr.msra.gmra.mrb[18].mxu1 %vm177_vm0, %v809_v60 }
 0x383   :  { %6136 = vmatpush3.bf16.msra.mxu1 %v7154_v32  ;;  %5679 = vmatprep.mubr.msk.f32.mxu1 %vm6862_vm1, %v6863_v1 }
 0x384   :  { %6137 = vmatprep.subr.bf16.mxu1 %v6861_v0 }
 0x385   :  { %v888_v62 = vld [vmem:[#allocation9] sm:$0xff]  ;;  %v687_v2 = vld [vmem:[#allocation6] sm:$0xff] }
 0x386   :  { %897 = vrot.lane.b32.xlu0 %v888_v62, %s6864_s17  ;;  %5647 = vmatmul.mubr.msk.f32.vlgmr.msra.gmra.mrb[2].mxu0 %vm177_vm0, %v687_v2 }
 0x387   :  { %6130 = vmatpush3.bf16.msra.mxu0 %v7104_v10  ;;  %6139 = vmatpush3.bf16.msra.mxu1 %v7159_v35 }
 0x388   :  { %6131 = vmatprep.subr.bf16.mxu0 %v6861_v0  ;;  %5668 = vmatprep.mubr.msk.f32.mxu0 %vm6862_vm1, %v6863_v1 }
 0x389   :  { %v766_v4 = vld [vmem:[#allocation7] sm:$0xff]  ;;  %6146 = vmatprep.subr.bf16.mxu1 %v6861_v0 }
 0x38a   :  { %775 = vrot.lane.b32.xlu0 %v766_v4, %s6864_s17 }
 0x38b   :  { %6133 = vmatpush3.bf16.msra.mxu0 %v7111_v16 }
 0x38c   :  { %6140 = vmatprep.subr.bf16.mxu0 %v6861_v0 }
 0x3f8   :  { %v898_v28 = vpop.permute.xlu0 %897 }
 0x3fc   :  { %v776_v33 = vpop.permute.xlu0 %775 }
 0x455   :  { %v883_v6 = vpop.f32.mrb[18].mxu1 }
 0x456   :  { %v887_v8 = vadd.f32 %v883_v6, %v7210_v11  ;;  %v5659_v9 = vpop.f32.mrb[19].mxu1 }
 0x458   :  { %6401 = vtanh.f32 %v887_v8  ;;  %v5212_v18 = vmul.f32 -1.442695, %v887_v8 }
 0x459   :  { %v761_v12 = vpop.f32.mrb[2].mxu0 }
 0x45a   :  { %v765_v13 = vadd.f32 %v761_v12, %v7181_v40  ;;  %v5648_v14 = vpop.f32.mrb[3].mxu0 }
 0x45c   :  { %6403 = vtanh.f32 %v765_v13  ;;  %v5210_v19 = vmul.f32 -1.442695, %v765_v13 }
 0x45d   :  { %6405 = vpow2.f32 %v5212_v18 }
 0x45e   :  { %6407 = vpow2.f32 %v5210_v19 }
 0x462   :  { %v6402_v15 = vpop.eup %6401 }
 0x463   :  { %902 = vrot.lane.b32.xlu1 %v6402_v15, %s6865_s6 }
 0x466   :  { %v6404_v17 = vpop.eup %6403 }
 0x467   :  { %780 = vrot.lane.b32.xlu1 %v6404_v17, %s6865_s6  ;;  %v6406_v20 = vpop.eup %6405 }
 0x468   :  { %v892_v21 = vadd.f32 1.0, %v6406_v20  ;;  %v6408_v11 = vpop.eup %6407 }
 0x469   :  { %v770_v22 = vadd.f32 1.0, %v6408_v11 }
 0x46a   :  { %6409 = vrcp.f32 %v892_v21 }
 0x46b   :  { %6411 = vrcp.f32 %v770_v22 }
 0x474   :  { %v6410_v23 = vpop.eup %6409 }
 0x475   :  { %v6412_v25 = vpop.eup %6411  ;;  %v900_v29 = vmul.f32 %v6410_v23, %v898_v28 }
 0x476   :  { %v778_v34 = vmul.f32 %v6412_v25, %v776_v33 }
 0x4d5   :  { %v903_v40 = vpop.permute.xlu1 %902 }
 0x4d6   :  { %v905_v24 = vmul.f32 %v6410_v23, %v903_v40 }
 0x4d8   :  { %907 = vrot.lane.b32.xlu1 %v905_v24, %s6864_s17 }
 0x4d9   :  { %v781_v26 = vpop.permute.xlu1 %780 }
 0x4da   :  { %v783_v27 = vmul.f32 %v6412_v25, %v781_v26 }
 0x4dc   :  { %785 = vrot.lane.b32.xlu1 %v783_v27, %s6864_s17 }
 0x54a   :  { %v908_v30 = vpop.permute.xlu1 %907 }
 0x54b   :  { %v910_v31 = vadd.f32 %v908_v30, %v900_v29 }
 0x54d   :  { %6413 = vtanh.f32 %v910_v31 }
 0x54e   :  { %v786_v36 = vpop.permute.xlu1 %785 }
 0x54f   :  { %v788_v37 = vadd.f32 %v786_v36, %v778_v34 }
 0x551   :  { %6415 = vtanh.f32 %v788_v37 }
 0x557   :  { %v6414_v38 = vpop.eup %6413 }
 0x558   :  { %913 = vrot.lane.b32.xlu0 %v6414_v38, %s6865_s6 }
 0x55b   :  { %v6416_v39 = vpop.eup %6415 }
 0x55c   :  { %791 = vrot.lane.b32.xlu1 %v6416_v39, %s6865_s6 }
 0x5ca   :  { %v914_v41 = vpop.permute.xlu0 %913 }
 0x5cb   :  { %v916_v42 = vmul.f32 %v6410_v23, %v914_v41 }
 0x5cd   :  { %918 = vrot.lane.b32.xlu0 %v916_v42, %s6864_s17 }
 0x5ce   :  { %v792_v43 = vpop.permute.xlu1 %791 }
 0x5cf   :  { %v794_v44 = vmul.f32 %v6412_v25, %v792_v43 }
 0x5d1   :  { %923 = vrot.lane.b32.xlu0 %v910_v31, %s6866_s11  ;;  %796 = vrot.lane.b32.xlu1 %v794_v44, %s6864_s17 }
 0x5d5   :  { %801 = vrot.lane.b32.xlu0 %v788_v37, %s6866_s11 }
 0x63f   :  { %v919_v45 = vpop.permute.xlu0 %918 }
 0x640   :  { %921 = vst.msk [vmem:[#allocation8] sm:$0xff] %vm177_vm0, %v919_v45  ;;  %928 = vst.msk [vmem:[#allocation5 + $0x30] sm:$0xff] %vm177_vm0, %v919_v45 }
 0x643   :  { %v924_v47 = vpop.permute.xlu0 %923  ;;  %v797_v49 = vpop.permute.xlu1 %796 }
 0x644   :  { %926 = vst.msk [vmem:[#allocation9] sm:$0xff] %vm177_vm0, %v924_v47  ;;  %799 = vst.msk [vmem:[#allocation6] sm:$0xff] %vm177_vm0, %v797_v49 }
 0x645   :  { %806 = vst.msk [vmem:[#allocation4 + $0x8] sm:$0xff] %vm177_vm0, %v797_v49 }
 0x647   :  { %v802_v51 = vpop.permute.xlu0 %801  ;;  %v1053_v53 = vld [vmem:[#allocation8] sm:$0xff] }
 0x648   :  { %804 = vst.msk [vmem:[#allocation7] sm:$0xff] %vm177_vm0, %v802_v51  ;;  %5680 = vmatmul.mubr.msk.f32.vlgmr.msra.gmra.mrb[20].mxu1 %vm177_vm0, %v1053_v53 }
 0x649   :  { %6148 = vmatpush3.bf16.msra.mxu1 %v7154_v32  ;;  %5701 = vmatprep.mubr.msk.f32.mxu1 %vm6862_vm1, %v6863_v1 }
 0x64a   :  { %6149 = vmatprep.subr.bf16.mxu1 %v6861_v0 }
 0x64b   :  { %v1132_v55 = vld [vmem:[#allocation9] sm:$0xff]  ;;  %v931_v57 = vld [vmem:[#allocation6] sm:$0xff] }
 0x64c   :  { %1141 = vrot.lane.b32.xlu0 %v1132_v55, %s6864_s17  ;;  %5669 = vmatmul.mubr.msk.f32.vlgmr.msra.gmra.mrb[4].mxu0 %vm177_vm0, %v931_v57 }
 0x64d   :  { %6142 = vmatpush3.bf16.msra.mxu0 %v7104_v10  ;;  %6151 = vmatpush3.bf16.msra.mxu1 %v7159_v35 }
 0x64e   :  { %6143 = vmatprep.subr.bf16.mxu0 %v6861_v0  ;;  %5690 = vmatprep.mubr.msk.f32.mxu0 %vm6862_vm1, %v6863_v1 }
 0x64f   :  { %v1010_v58 = vld [vmem:[#allocation7] sm:$0xff]  ;;  %6158 = vmatprep.subr.bf16.mxu1 %v6861_v0 }
 0x650   :  { %1019 = vrot.lane.b32.xlu0 %v1010_v58, %s6864_s17 }
 0x651   :  { %6145 = vmatpush3.bf16.msra.mxu0 %v7111_v16 }
 0x652   :  { %6152 = vmatprep.subr.bf16.mxu0 %v6861_v0 }
 0x6be   :  { %v1142_v23 = vpop.permute.xlu0 %1141 }
 0x6c2   :  { %v1020_v26 = vpop.permute.xlu0 %1019 }
 0x71b   :  { %v1127_v60 = vpop.f32.mrb[20].mxu1 }
 0x71c   :  { %v1131_v62 = vadd.f32 %v1127_v60, %v7206_v5  ;;  %v5681_v2 = vpop.f32.mrb[21].mxu1 }
 0x71e   :  { %6417 = vtanh.f32 %v1131_v62  ;;  %v5216_v13 = vmul.f32 -1.442695, %v1131_v62 }
 0x71f   :  { %v1005_v4 = vpop.f32.mrb[4].mxu0 }
 0x720   :  { %v1009_v6 = vadd.f32 %v1005_v4, %v7185_v48  ;;  %v5670_v8 = vpop.f32.mrb[5].mxu0 }
 0x722   :  { %6419 = vtanh.f32 %v1009_v6  ;;  %v5214_v14 = vmul.f32 -1.442695, %v1009_v6 }
 0x723   :  { %6421 = vpow2.f32 %v5216_v13 }
 0x724   :  { %6423 = vpow2.f32 %v5214_v14 }
 0x728   :  { %v6418_v9 = vpop.eup %6417 }
 0x729   :  { %1146 = vrot.lane.b32.xlu1 %v6418_v9, %s6865_s6 }
 0x72c   :  { %v6420_v12 = vpop.eup %6419 }
 0x72d   :  { %1024 = vrot.lane.b32.xlu1 %v6420_v12, %s6865_s6  ;;  %v6422_v15 = vpop.eup %6421 }
 0x72e   :  { %v1136_v17 = vadd.f32 1.0, %v6422_v15  ;;  %v6424_v5 = vpop.eup %6423 }
 0x72f   :  { %v1014_v18 = vadd.f32 1.0, %v6424_v5 }
 0x730   :  { %6425 = vrcp.f32 %v1136_v17 }
 0x731   :  { %6427 = vrcp.f32 %v1014_v18 }
 0x73a   :  { %v6426_v19 = vpop.eup %6425 }
 0x73b   :  { %v6428_v21 = vpop.eup %6427  ;;  %v1144_v40 = vmul.f32 %v6426_v19, %v1142_v23 }
 0x73c   :  { %v1022_v27 = vmul.f32 %v6428_v21, %v1020_v26 }
 0x79b   :  { %v1147_v48 = vpop.permute.xlu1 %1146 }
 0x79c   :  { %v1149_v20 = vmul.f32 %v6426_v19, %v1147_v48 }
 0x79e   :  { %1151 = vrot.lane.b32.xlu1 %v1149_v20, %s6864_s17 }
 0x79f   :  { %v1025_v11 = vpop.permute.xlu1 %1024 }
 0x7a0   :  { %v1027_v22 = vmul.f32 %v6428_v21, %v1025_v11 }
 0x7a2   :  { %1029 = vrot.lane.b32.xlu1 %v1027_v22, %s6864_s17 }
 0x810   :  { %v1152_v24 = vpop.permute.xlu1 %1151 }
 0x811   :  { %v1154_v25 = vadd.f32 %v1152_v24, %v1144_v40 }
 0x813   :  { %6429 = vtanh.f32 %v1154_v25 }
 0x814   :  { %v1030_v28 = vpop.permute.xlu1 %1029 }
 0x815   :  { %v1032_v29 = vadd.f32 %v1030_v28, %v1022_v27 }
 0x817   :  { %6431 = vtanh.f32 %v1032_v29 }
 0x81d   :  { %v6430_v30 = vpop.eup %6429 }
 0x81e   :  { %1157 = vrot.lane.b32.xlu0 %v6430_v30, %s6865_s6 }
 0x821   :  { %v6432_v31 = vpop.eup %6431 }
 0x822   :  { %1035 = vrot.lane.b32.xlu1 %v6432_v31, %s6865_s6 }
 0x890   :  { %v1158_v33 = vpop.permute.xlu0 %1157 }
 0x891   :  { %v1160_v34 = vmul.f32 %v6426_v19, %v1158_v33 }
 0x893   :  { %1162 = vrot.lane.b32.xlu0 %v1160_v34, %s6864_s17 }
 0x894   :  { %v1036_v36 = vpop.permute.xlu1 %1035 }
 0x895   :  { %v1038_v37 = vmul.f32 %v6428_v21, %v1036_v36 }
 0x897   :  { %1167 = vrot.lane.b32.xlu0 %v1154_v25, %s6866_s11  ;;  %1040 = vrot.lane.b32.xlu1 %v1038_v37, %s6864_s17 }
 0x89b   :  { %1045 = vrot.lane.b32.xlu0 %v1032_v29, %s6866_s11 }
 0x905   :  { %v1163_v38 = vpop.permute.xlu0 %1162 }
 0x906   :  { %1165 = vst.msk [vmem:[#allocation8] sm:$0xff] %vm177_vm0, %v1163_v38  ;;  %1172 = vst.msk [vmem:[#allocation5 + $0x28] sm:$0xff] %vm177_vm0, %v1163_v38 }
 0x909   :  { %v1168_v39 = vpop.permute.xlu0 %1167  ;;  %v1041_v41 = vpop.permute.xlu1 %1040 }
 0x90a   :  { %1170 = vst.msk [vmem:[#allocation9] sm:$0xff] %vm177_vm0, %v1168_v39  ;;  %1043 = vst.msk [vmem:[#allocation6] sm:$0xff] %vm177_vm0, %v1041_v41 }
 0x90b   :  { %1050 = vst.msk [vmem:[#allocation4 + $0x10] sm:$0xff] %vm177_vm0, %v1041_v41 }
 0x90d   :  { %v1046_v42 = vpop.permute.xlu0 %1045  ;;  %v1297_v43 = vld [vmem:[#allocation8] sm:$0xff] }
 0x90e   :  { %1048 = vst.msk [vmem:[#allocation7] sm:$0xff] %vm177_vm0, %v1046_v42  ;;  %5702 = vmatmul.mubr.msk.f32.vlgmr.msra.gmra.mrb[22].mxu1 %vm177_vm0, %v1297_v43 }
 0x90f   :  { %6160 = vmatpush3.bf16.msra.mxu1 %v7154_v32  ;;  %5723 = vmatprep.mubr.msk.f32.mxu1 %vm6862_vm1, %v6863_v1 }
 0x910   :  { %6161 = vmatprep.subr.bf16.mxu1 %v6861_v0 }
 0x911   :  { %v1376_v44 = vld [vmem:[#allocation9] sm:$0xff]  ;;  %v1175_v45 = vld [vmem:[#allocation6] sm:$0xff] }
 0x912   :  { %1385 = vrot.lane.b32.xlu0 %v1376_v44, %s6864_s17  ;;  %5691 = vmatmul.mubr.msk.f32.vlgmr.msra.gmra.mrb[6].mxu0 %vm177_vm0, %v1175_v45 }
 0x913   :  { %6154 = vmatpush3.bf16.msra.mxu0 %v7104_v10  ;;  %6163 = vmatpush3.bf16.msra.mxu1 %v7159_v35 }
 0x914   :  { %6155 = vmatprep.subr.bf16.mxu0 %v6861_v0  ;;  %5712 = vmatprep.mubr.msk.f32.mxu0 %vm6862_vm1, %v6863_v1 }
 0x915   :  { %v1254_v47 = vld [vmem:[#allocation7] sm:$0xff]  ;;  %6170 = vmatprep.subr.bf16.mxu1 %v6861_v0 }
 0x916   :  { %1263 = vrot.lane.b32.xlu0 %v1254_v47, %s6864_s17 }
 0x917   :  { %6157 = vmatpush3.bf16.msra.mxu0 %v7111_v16 }
 0x918   :  { %6164 = vmatprep.subr.bf16.mxu0 %v6861_v0 }
 0x984   :  { %v1386_v5 = vpop.permute.xlu0 %1385 }
 0x988   :  { %v1264_v20 = vpop.permute.xlu0 %1263 }
 0x9e1   :  { %v1371_v49 = vpop.f32.mrb[22].mxu1 }
 0x9e2   :  { %v1375_v51 = vadd.f32 %v1371_v49, %v7208_v7  ;;  %v5703_v53 = vpop.f32.mrb[23].mxu1 }
 0x9e4   :  { %6433 = vtanh.f32 %v1375_v51  ;;  %v5220_v2 = vmul.f32 -1.442695, %v1375_v51 }
 0x9e5   :  { %v1249_v55 = vpop.f32.mrb[6].mxu0 }
 0x9e6   :  { %v1253_v57 = vadd.f32 %v1249_v55, %v7183_v46  ;;  %v5692_v58 = vpop.f32.mrb[7].mxu0 }
 0x9e8   :  { %6435 = vtanh.f32 %v1253_v57  ;;  %v5218_v4 = vmul.f32 -1.442695, %v1253_v57 }
 0x9e9   :  { %6437 = vpow2.f32 %v5220_v2 }
 0x9ea   :  { %6439 = vpow2.f32 %v5218_v4 }
 0x9ee   :  { %v6434_v60 = vpop.eup %6433 }
 0x9ef   :  { %1390 = vrot.lane.b32.xlu1 %v6434_v60, %s6865_s6 }
 0x9f2   :  { %v6436_v62 = vpop.eup %6435 }
 0x9f3   :  { %1268 = vrot.lane.b32.xlu1 %v6436_v62, %s6865_s6  ;;  %v6438_v6 = vpop.eup %6437 }
 0x9f4   :  { %v1380_v8 = vadd.f32 1.0, %v6438_v6  ;;  %v6440_v7 = vpop.eup %6439 }
 0x9f5   :  { %v1258_v9 = vadd.f32 1.0, %v6440_v7 }
 0x9f6   :  { %6441 = vrcp.f32 %v1380_v8 }
 0x9f7   :  { %6443 = vrcp.f32 %v1258_v9 }
 0xa00   :  { %v6442_v12 = vpop.eup %6441 }
 0xa01   :  { %v6444_v14 = vpop.eup %6443  ;;  %v1388_v18 = vmul.f32 %v6442_v12, %v1386_v5 }
 0xa02   :  { %v1266_v21 = vmul.f32 %v6444_v14, %v1264_v20 }
 0xa61   :  { %v1391_v46 = vpop.permute.xlu1 %1390 }
 0xa62   :  { %v1393_v13 = vmul.f32 %v6442_v12, %v1391_v46 }
 0xa64   :  { %1395 = vrot.lane.b32.xlu1 %v1393_v13, %s6864_s17 }
 0xa65   :  { %v1269_v15 = vpop.permute.xlu1 %1268 }
 0xa66   :  { %v1271_v17 = vmul.f32 %v6444_v14, %v1269_v15 }
 0xa68   :  { %1273 = vrot.lane.b32.xlu1 %v1271_v17, %s6864_s17 }
 0xad6   :  { %v1396_v19 = vpop.permute.xlu1 %1395 }
 0xad7   :  { %v1398_v48 = vadd.f32 %v1396_v19, %v1388_v18 }
 0xad9   :  { %6445 = vtanh.f32 %v1398_v48 }
 0xada   :  { %v1274_v11 = vpop.permute.xlu1 %1273 }
 0xadb   :  { %v1276_v22 = vadd.f32 %v1274_v11, %v1266_v21 }
 0xadd   :  { %6447 = vtanh.f32 %v1276_v22 }
 0xae3   :  { %v6446_v23 = vpop.eup %6445 }
 0xae4   :  { %1401 = vrot.lane.b32.xlu0 %v6446_v23, %s6865_s6 }
 0xae7   :  { %v6448_v40 = vpop.eup %6447 }
 0xae8   :  { %1279 = vrot.lane.b32.xlu1 %v6448_v40, %s6865_s6 }
 0xb56   :  { %v1402_v24 = vpop.permute.xlu0 %1401 }
 0xb57   :  { %v1404_v25 = vmul.f32 %v6442_v12, %v1402_v24 }
 0xb59   :  { %1406 = vrot.lane.b32.xlu0 %v1404_v25, %s6864_s17 }
 0xb5a   :  { %v1280_v26 = vpop.permute.xlu1 %1279 }
 0xb5b   :  { %v1282_v27 = vmul.f32 %v6444_v14, %v1280_v26 }
 0xb5d   :  { %1411 = vrot.lane.b32.xlu0 %v1398_v48, %s6866_s11  ;;  %1284 = vrot.lane.b32.xlu1 %v1282_v27, %s6864_s17 }
 0xb61   :  { %1289 = vrot.lane.b32.xlu0 %v1276_v22, %s6866_s11 }
 0xbcb   :  { %v1407_v28 = vpop.permute.xlu0 %1406 }
 0xbcc   :  { %1409 = vst.msk [vmem:[#allocation8] sm:$0xff] %vm177_vm0, %v1407_v28  ;;  %1416 = vst.msk [vmem:[#allocation5 + $0x20] sm:$0xff] %vm177_vm0, %v1407_v28 }
 0xbcf   :  { %v1412_v29 = vpop.permute.xlu0 %1411  ;;  %v1285_v30 = vpop.permute.xlu1 %1284 }
 0xbd0   :  { %1414 = vst.msk [vmem:[#allocation9] sm:$0xff] %vm177_vm0, %v1412_v29  ;;  %1287 = vst.msk [vmem:[#allocation6] sm:$0xff] %vm177_vm0, %v1285_v30 }
 0xbd1   :  { %1294 = vst.msk [vmem:[#allocation4 + $0x18] sm:$0xff] %vm177_vm0, %v1285_v30 }
 0xbd3   :  { %v1290_v31 = vpop.permute.xlu0 %1289  ;;  %v1541_v33 = vld [vmem:[#allocation8] sm:$0xff] }
 0xbd4   :  { %1292 = vst.msk [vmem:[#allocation7] sm:$0xff] %vm177_vm0, %v1290_v31  ;;  %5724 = vmatmul.mubr.msk.f32.vlgmr.msra.gmra.mrb[24].mxu1 %vm177_vm0, %v1541_v33 }
 0xbd5   :  { %6172 = vmatpush3.bf16.msra.mxu1 %v7154_v32  ;;  %5745 = vmatprep.mubr.msk.f32.mxu1 %vm6862_vm1, %v6863_v1 }
 0xbd6   :  { %6173 = vmatprep.subr.bf16.mxu1 %v6861_v0 }
 0xbd7   :  { %v1620_v34 = vld [vmem:[#allocation9] sm:$0xff]  ;;  %v1419_v36 = vld [vmem:[#allocation6] sm:$0xff] }
 0xbd8   :  { %1629 = vrot.lane.b32.xlu0 %v1620_v34, %s6864_s17  ;;  %5713 = vmatmul.mubr.msk.f32.vlgmr.msra.gmra.mrb[8].mxu0 %vm177_vm0, %v1419_v36 }
 0xbd9   :  { %6166 = vmatpush3.bf16.msra.mxu0 %v7104_v10  ;;  %6175 = vmatpush3.bf16.msra.mxu1 %v7159_v35 }
 0xbda   :  { %6167 = vmatprep.subr.bf16.mxu0 %v6861_v0  ;;  %5734 = vmatprep.mubr.msk.f32.mxu0 %vm6862_vm1, %v6863_v1 }
 0xbdb   :  { %v1498_v32 = vld [vmem:[#allocation7] sm:$0xff]  ;;  %6182 = vmatprep.subr.bf16.mxu1 %v6861_v0 }
 0xbdc   :  { %1507 = vrot.lane.b32.xlu0 %v1498_v32, %s6864_s17 }
 0xbdd   :  { %6169 = vmatpush3.bf16.msra.mxu0 %v7111_v16 }
 0xbde   :  { %6176 = vmatprep.subr.bf16.mxu0 %v6861_v0 }
 0xc4a   :  { %v1630_v60 = vpop.permute.xlu0 %1629 }
 0xc4e   :  { %v1508_v6 = vpop.permute.xlu0 %1507 }
 0xca7   :  { %v1615_v37 = vpop.f32.mrb[24].mxu1 }
 0xca8   :  { %v1619_v38 = vadd.f32 %v1615_v37, %v7202_v63  ;;  %v5725_v10 = vpop.f32.mrb[25].mxu1 }
 0xcaa   :  { %6449 = vtanh.f32 %v1619_v38  ;;  %v5224_v44 = vmul.f32 -1.442695, %v1619_v38 }
 0xcab   :  { %v1493_v35 = vpop.f32.mrb[8].mxu0 }
 0xcac   :  { %v1497_v39 = vadd.f32 %v1493_v35, %v7189_v52  ;;  %v5714_v41 = vpop.f32.mrb[9].mxu0 }
 0xcae   :  { %6451 = vtanh.f32 %v1497_v39  ;;  %v5222_v16 = vmul.f32 -1.442695, %v1497_v39 }
 0xcaf   :  { %6453 = vpow2.f32 %v5224_v44 }
 0xcb0   :  { %6455 = vpow2.f32 %v5222_v16 }
 0xcb4   :  { %v6450_v42 = vpop.eup %6449 }
 0xcb5   :  { %1634 = vrot.lane.b32.xlu1 %v6450_v42, %s6865_s6 }
 0xcb8   :  { %v6452_v43 = vpop.eup %6451 }
 0xcb9   :  { %1512 = vrot.lane.b32.xlu1 %v6452_v43, %s6865_s6  ;;  %v6454_v45 = vpop.eup %6453 }
 0xcba   :  { %v1624_v47 = vadd.f32 1.0, %v6454_v45  ;;  %v6456_v63 = vpop.eup %6455 }
 0xcbb   :  { %v1502_v49 = vadd.f32 1.0, %v6456_v63 }
 0xcbc   :  { %6457 = vrcp.f32 %v1624_v47 }
 0xcbd   :  { %6459 = vrcp.f32 %v1502_v49 }
 0xcc6   :  { %v6458_v51 = vpop.eup %6457 }
 0xcc7   :  { %v6460_v55 = vpop.eup %6459  ;;  %v1632_v62 = vmul.f32 %v6458_v51, %v1630_v60 }
 0xcc8   :  { %v1510_v8 = vmul.f32 %v6460_v55, %v1508_v6  ;;  %v1911_v6 = vld [vmem:[#allocation13 + $0x18] sm:$0xff] }
 0xd27   :  { %v1635_v52 = vpop.permute.xlu1 %1634 }
 0xd28   :  { %v1637_v53 = vmul.f32 %v6458_v51, %v1635_v52  ;;  %v2031_v52 = vld [vmem:[#allocation16 + $0x8] sm:$0xff] }
 0xd2a   :  { %1639 = vrot.lane.b32.xlu1 %v1637_v53, %s6864_s17 }
 0xd2b   :  { %v1513_v57 = vpop.permute.xlu1 %1512 }
 0xd2c   :  { %v1515_v58 = vmul.f32 %v6460_v55, %v1513_v57  ;;  %v1909_v57 = vld [vmem:[#allocation13 + $0x8] sm:$0xff] }
 0xd2e   :  { %1517 = vrot.lane.b32.xlu1 %v1515_v58, %s6864_s17  ;;  %v2032_v58 = vld [vmem:[#allocation16 + $0x10] sm:$0xff] }
 0xd9c   :  { %v1640_v2 = vpop.permute.xlu1 %1639 }
 0xd9d   :  { %v1642_v4 = vadd.f32 %v1640_v2, %v1632_v62  ;;  %v2033_v62 = vld [vmem:[#allocation16 + $0x18] sm:$0xff] }
 0xd9e   :  { %v6186_v2 = vpack.c.bf16 %v2033_v62, %v2032_v58 }
 0xd9f   :  { %6461 = vtanh.f32 %v1642_v4 }
 0xda0   :  { %v1518_v7 = vpop.permute.xlu1 %1517 }
 0xda1   :  { %v1520_v9 = vadd.f32 %v1518_v7, %v1510_v8 }
 0xda3   :  { %6463 = vtanh.f32 %v1520_v9 }
 0xda9   :  { %v6462_v12 = vpop.eup %6461 }
 0xdaa   :  { %1645 = vrot.lane.b32.xlu0 %v6462_v12, %s6865_s6 }
 0xdad   :  { %v6464_v46 = vpop.eup %6463 }
 0xdae   :  { %1523 = vrot.lane.b32.xlu1 %v6464_v46, %s6865_s6 }
 0xe1c   :  { %v1646_v13 = vpop.permute.xlu0 %1645 }
 0xe1d   :  { %v1648_v14 = vmul.f32 %v6458_v51, %v1646_v13  ;;  %v2030_v51 = vld [vmem:[#allocation16] sm:$0xff] }
 0xe1e   :  { %v6183_v53 = vpack.c.bf16 %v2031_v52, %v2030_v51 }
 0xe1f   :  { %1650 = vrot.lane.b32.xlu0 %v1648_v14, %s6864_s17 }
 0xe20   :  { %v1524_v15 = vpop.permute.xlu1 %1523 }
 0xe21   :  { %v1526_v17 = vmul.f32 %v6460_v55, %v1524_v15  ;;  %v1908_v55 = vld [vmem:[#allocation13] sm:$0xff] }
 0xe22   :  { %v6177_v60 = vpack.c.bf16 %v1909_v57, %v1908_v55 }
 0xe23   :  { %1655 = vrot.lane.b32.xlu0 %v1642_v4, %s6866_s11  ;;  %1528 = vrot.lane.b32.xlu1 %v1526_v17, %s6864_s17  ;;  %v1910_v4 = vld [vmem:[#allocation13 + $0x10] sm:$0xff] }
 0xe24   :  { %v6180_v8 = vpack.c.bf16 %v1911_v6, %v1910_v4 }
 0xe27   :  { %1533 = vrot.lane.b32.xlu0 %v1520_v9, %s6866_s11 }
 0xe91   :  { %v1651_v5 = vpop.permute.xlu0 %1650 }
 0xe92   :  { %1653 = vst.msk [vmem:[#allocation8] sm:$0xff] %vm177_vm0, %v1651_v5  ;;  %1660 = vst.msk [vmem:[#allocation5 + $0x18] sm:$0xff] %vm177_vm0, %v1651_v5 }
 0xe95   :  { %v1656_v18 = vpop.permute.xlu0 %1655  ;;  %v1529_v19 = vpop.permute.xlu1 %1528 }
 0xe96   :  { %1658 = vst.msk [vmem:[#allocation9] sm:$0xff] %vm177_vm0, %v1656_v18  ;;  %1531 = vst.msk [vmem:[#allocation6] sm:$0xff] %vm177_vm0, %v1529_v19 }
 0xe97   :  { %1538 = vst.msk [vmem:[#allocation4 + $0x20] sm:$0xff] %vm177_vm0, %v1529_v19 }
 0xe99   :  { %v1534_v48 = vpop.permute.xlu0 %1533  ;;  %v1785_v20 = vld [vmem:[#allocation8] sm:$0xff] }
 0xe9a   :  { %1536 = vst.msk [vmem:[#allocation7] sm:$0xff] %vm177_vm0, %v1534_v48  ;;  %5746 = vmatmul.mubr.msk.f32.vlgmr.msra.gmra.mrb[26].mxu1 %vm177_vm0, %v1785_v20 }
 0xe9b   :  { %5767 = vmatprep.mubr.msk.f32.mxu1 %vm6862_vm1, %v6863_v1  ;;  %6184 = vmatpush3.bf16.msra.mxu1 %v6183_v53 }
 0xe9c   :  { %6185 = vmatprep.subr.bf16.mxu1 %v6861_v0 }
 0xe9d   :  { %v1864_v21 = vld [vmem:[#allocation9] sm:$0xff]  ;;  %v1663_v11 = vld [vmem:[#allocation6] sm:$0xff] }
 0xe9e   :  { %1873 = vrot.lane.b32.xlu0 %v1864_v21, %s6864_s17  ;;  %5735 = vmatmul.mubr.msk.f32.vlgmr.msra.gmra.mrb[10].mxu0 %vm177_vm0, %v1663_v11 }
 0xe9f   :  { %5756 = vmatprep.mubr.msk.f32.mxu0 %vm6862_vm1, %v6863_v1  ;;  %6178 = vmatpush3.bf16.msra.mxu0 %v6177_v60 }
 0xea0   :  { %6187 = vmatpush3.bf16.msra.mxu1 %v6186_v2  ;;  %6179 = vmatprep.subr.bf16.mxu0 %v6861_v0 }
 0xea1   :  { %v1742_v22 = vld [vmem:[#allocation7] sm:$0xff]  ;;  %6194 = vmatprep.subr.bf16.mxu1 %v6861_v0 }
 0xea2   :  { %1751 = vrot.lane.b32.xlu0 %v1742_v22, %s6864_s17 }
 0xea3   :  { %6181 = vmatpush3.bf16.msra.mxu0 %v6180_v8 }
 0xea4   :  { %6188 = vmatprep.subr.bf16.mxu0 %v6861_v0 }
 0xf10   :  { %v1874_v39 = vpop.permute.xlu0 %1873 }
 0xf14   :  { %v1752_v44 = vpop.permute.xlu0 %1751 }
 0xf6d   :  { %v1859_v23 = vpop.f32.mrb[26].mxu1 }
 0xf6e   :  { %v1863_v40 = vadd.f32 %v1859_v23, %v7204_v3  ;;  %v5747_v24 = vpop.f32.mrb[27].mxu1 }
 0xf70   :  { %6465 = vtanh.f32 %v1863_v40  ;;  %v5228_v30 = vmul.f32 -1.442695, %v1863_v40 }
 0xf71   :  { %v1737_v25 = vpop.f32.mrb[10].mxu0 }
 0xf72   :  { %v1741_v26 = vadd.f32 %v1737_v25, %v7187_v50  ;;  %v5736_v27 = vpop.f32.mrb[11].mxu0 }
 0xf74   :  { %6467 = vtanh.f32 %v1741_v26  ;;  %v5226_v31 = vmul.f32 -1.442695, %v1741_v26 }
 0xf75   :  { %6469 = vpow2.f32 %v5228_v30 }
 0xf76   :  { %6471 = vpow2.f32 %v5226_v31 }
 0xf7a   :  { %v6466_v28 = vpop.eup %6465 }
 0xf7b   :  { %1878 = vrot.lane.b32.xlu1 %v6466_v28, %s6865_s6 }
 0xf7e   :  { %v6468_v29 = vpop.eup %6467 }
 0xf7f   :  { %1756 = vrot.lane.b32.xlu1 %v6468_v29, %s6865_s6  ;;  %v6470_v33 = vpop.eup %6469 }
 0xf80   :  { %v1868_v34 = vadd.f32 1.0, %v6470_v33  ;;  %v6472_v3 = vpop.eup %6471 }
 0xf81   :  { %v1746_v36 = vadd.f32 1.0, %v6472_v3 }
 0xf82   :  { %6473 = vrcp.f32 %v1868_v34 }
 0xf83   :  { %6475 = vrcp.f32 %v1746_v36 }
 0xf8c   :  { %v6474_v32 = vpop.eup %6473 }
 0xf8d   :  { %v6476_v38 = vpop.eup %6475  ;;  %v1876_v41 = vmul.f32 %v6474_v32, %v1874_v39 }
 0xf8e   :  { %v1754_v16 = vmul.f32 %v6476_v38, %v1752_v44 }
 0xfed   :  { %v1879_v50 = vpop.permute.xlu1 %1878 }
 0xfee   :  { %v1881_v37 = vmul.f32 %v6474_v32, %v1879_v50 }
 0xff0   :  { %1883 = vrot.lane.b32.xlu1 %v1881_v37, %s6864_s17 }
 0xff1   :  { %v1757_v10 = vpop.permute.xlu1 %1756 }
 0xff2   :  { %v1759_v35 = vmul.f32 %v6476_v38, %v1757_v10 }
 0xff4   :  { %1761 = vrot.lane.b32.xlu1 %v1759_v35, %s6864_s17 }
0x1062   :  { %v1884_v42 = vpop.permute.xlu1 %1883 }
0x1063   :  { %v1886_v43 = vadd.f32 %v1884_v42, %v1876_v41 }
0x1065   :  { %6477 = vtanh.f32 %v1886_v43 }
0x1066   :  { %v1762_v45 = vpop.permute.xlu1 %1761 }
0x1067   :  { %v1764_v47 = vadd.f32 %v1762_v45, %v1754_v16 }
0x1069   :  { %6479 = vtanh.f32 %v1764_v47 }
0x106f   :  { %v6478_v63 = vpop.eup %6477 }
0x1070   :  { %1889 = vrot.lane.b32.xlu0 %v6478_v63, %s6865_s6 }
0x1073   :  { %v6480_v49 = vpop.eup %6479 }
0x1074   :  { %1767 = vrot.lane.b32.xlu1 %v6480_v49, %s6865_s6 }
0x10e2   :  { %v1890_v7 = vpop.permute.xlu0 %1889 }
0x10e3   :  { %v1892_v9 = vmul.f32 %v6474_v32, %v1890_v7 }
0x10e5   :  { %1894 = vrot.lane.b32.xlu0 %v1892_v9, %s6864_s17 }
0x10e6   :  { %v1768_v12 = vpop.permute.xlu1 %1767 }
0x10e7   :  { %v1770_v46 = vmul.f32 %v6476_v38, %v1768_v12 }
0x10e9   :  { %1899 = vrot.lane.b32.xlu0 %v1886_v43, %s6866_s11  ;;  %1772 = vrot.lane.b32.xlu1 %v1770_v46, %s6864_s17 }
0x10ed   :  { %1777 = vrot.lane.b32.xlu0 %v1764_v47, %s6866_s11 }
0x1157   :  { %v1895_v13 = vpop.permute.xlu0 %1894 }
0x1158   :  { %1897 = vst.msk [vmem:[#allocation8] sm:$0xff] %vm177_vm0, %v1895_v13  ;;  %1904 = vst.msk [vmem:[#allocation5 + $0x10] sm:$0xff] %vm177_vm0, %v1895_v13 }
0x115b   :  { %v1900_v14 = vpop.permute.xlu0 %1899  ;;  %v1773_v15 = vpop.permute.xlu1 %1772 }
0x115c   :  { %1902 = vst.msk [vmem:[#allocation9] sm:$0xff] %vm177_vm0, %v1900_v14  ;;  %1775 = vst.msk [vmem:[#allocation6] sm:$0xff] %vm177_vm0, %v1773_v15 }
0x115d   :  { %1782 = vst.msk [vmem:[#allocation4 + $0x28] sm:$0xff] %vm177_vm0, %v1773_v15 }
0x115f   :  { %v1778_v17 = vpop.permute.xlu0 %1777  ;;  %v2029_v5 = vld [vmem:[#allocation8] sm:$0xff] }
0x1160   :  { %1780 = vst.msk [vmem:[#allocation7] sm:$0xff] %vm177_vm0, %v1778_v17  ;;  %5768 = vmatmul.mubr.msk.f32.vlgmr.msra.gmra.mrb[28].mxu1 %vm177_vm0, %v2029_v5 }
0x1161   :  { %6196 = vmatpush3.bf16.msra.mxu1 %v6183_v53  ;;  %5789 = vmatprep.mubr.msk.f32.mxu1 %vm6862_vm1, %v6863_v1 }
0x1162   :  { %6197 = vmatprep.subr.bf16.mxu1 %v6861_v0 }
0x1163   :  { %v2108_v18 = vld [vmem:[#allocation9] sm:$0xff]  ;;  %v1907_v19 = vld [vmem:[#allocation6] sm:$0xff] }
0x1164   :  { %2117 = vrot.lane.b32.xlu0 %v2108_v18, %s6864_s17  ;;  %5757 = vmatmul.mubr.msk.f32.vlgmr.msra.gmra.mrb[12].mxu0 %vm177_vm0, %v1907_v19 }
0x1165   :  { %6190 = vmatpush3.bf16.msra.mxu0 %v6177_v60  ;;  %6199 = vmatpush3.bf16.msra.mxu1 %v6186_v2 }
0x1166   :  { %6191 = vmatprep.subr.bf16.mxu0 %v6861_v0  ;;  %5778 = vmatprep.mubr.msk.f32.mxu0 %vm6862_vm1, %v6863_v1 }
0x1167   :  { %v1986_v48 = vld [vmem:[#allocation7] sm:$0xff] }
0x1168   :  { %1995 = vrot.lane.b32.xlu0 %v1986_v48, %s6864_s17 }
0x1169   :  { %6193 = vmatpush3.bf16.msra.mxu0 %v6180_v8 }
0x11d6   :  { %v2118_v32 = vpop.permute.xlu0 %2117 }
0x11da   :  { %v1996_v10 = vpop.permute.xlu0 %1995 }
0x1233   :  { %v2103_v20 = vpop.f32.mrb[28].mxu1 }
0x1234   :  { %v2107_v21 = vadd.f32 %v2103_v20, %v7198_v59  ;;  %v5769_v11 = vpop.f32.mrb[29].mxu1 }
0x1236   :  { %6481 = vtanh.f32 %v2107_v21  ;;  %v5232_v26 = vmul.f32 -1.442695, %v2107_v21 }
0x1237   :  { %v1981_v22 = vpop.f32.mrb[12].mxu0 }
0x1238   :  { %v1985_v23 = vadd.f32 %v1981_v22, %v7193_v56  ;;  %v5758_v40 = vpop.f32.mrb[13].mxu0 }
0x123a   :  { %6483 = vtanh.f32 %v1985_v23  ;;  %v5230_v27 = vmul.f32 -1.442695, %v1985_v23 }
0x123b   :  { %6485 = vpow2.f32 %v5232_v26 }
0x123c   :  { %6487 = vpow2.f32 %v5230_v27 }
0x1240   :  { %v6482_v24 = vpop.eup %6481 }
0x1241   :  { %2122 = vrot.lane.b32.xlu1 %v6482_v24, %s6865_s6 }
0x1244   :  { %v6484_v25 = vpop.eup %6483 }
0x1245   :  { %2000 = vrot.lane.b32.xlu1 %v6484_v25, %s6865_s6  ;;  %v6486_v28 = vpop.eup %6485 }
0x1246   :  { %v2112_v29 = vadd.f32 1.0, %v6486_v28  ;;  %v6488_v59 = vpop.eup %6487  ;;  %v2411_v28 = vld [vmem:[%s7875_s7 + $0x20] sm:$0xff] }
0x1247   :  { %v1990_v30 = vadd.f32 1.0, %v6488_v59  ;;  %v2700_v59 = vld [vmem:[%s7878_s10 + $0x20] sm:$0xff] }
0x1248   :  { %6489 = vrcp.f32 %v2112_v29  ;;  %v2412_v29 = vld [vmem:[%s7875_s7 + $0x28] sm:$0xff] }
0x1249   :  { %6491 = vrcp.f32 %v1990_v30  ;;  %v6200_v30 = vpack.c.bf16 %v2412_v29, %v2411_v28 }
0x124b   :  { %6201 = vmatprep.subr.bf16.mxu0 %v6200_v30 }
0x1252   :  { %v6490_v31 = vpop.eup %6489 }
0x1253   :  { %v6492_v34 = vpop.eup %6491  ;;  %v2120_v50 = vmul.f32 %v6490_v31, %v2118_v32  ;;  %v2703_v32 = vld [vmem:[%s7878_s10 + $0x38] sm:$0xff] }
0x1254   :  { %v1998_v35 = vmul.f32 %v6492_v34, %v1996_v10 }
0x12b3   :  { %v2123_v56 = vpop.permute.xlu1 %2122 }
0x12b4   :  { %v2125_v33 = vmul.f32 %v6490_v31, %v2123_v56 }
0x12b6   :  { %2127 = vrot.lane.b32.xlu1 %v2125_v33, %s6864_s17  ;;  %v2413_v33 = vld [vmem:[%s7875_s7 + $0x30] sm:$0xff] }
0x12b7   :  { %v2001_v3 = vpop.permute.xlu1 %2000 }
0x12b8   :  { %v2003_v36 = vmul.f32 %v6492_v34, %v2001_v3  ;;  %v2702_v3 = vld [vmem:[%s7878_s10 + $0x30] sm:$0xff] }
0x12ba   :  { %2005 = vrot.lane.b32.xlu1 %v2003_v36, %s6864_s17 }
0x1328   :  { %v2128_v37 = vpop.permute.xlu1 %2127 }
0x1329   :  { %v2130_v38 = vadd.f32 %v2128_v37, %v2120_v50  ;;  %v6220_v50 = vpack.c.bf16 %v2703_v32, %v2702_v3  ;;  %v2696_v37 = vld [vmem:[%s7878_s10] sm:$0xff] }
0x132b   :  { %6493 = vtanh.f32 %v2130_v38 }
0x132c   :  { %v2006_v39 = vpop.permute.xlu1 %2005 }
0x132d   :  { %v2008_v41 = vadd.f32 %v2006_v39, %v1998_v35 }
0x132f   :  { %6495 = vtanh.f32 %v2008_v41 }
0x1335   :  { %v6494_v42 = vpop.eup %6493 }
0x1336   :  { %2133 = vrot.lane.b32.xlu0 %v6494_v42, %s6865_s6  ;;  %v2407_v42 = vld [vmem:[%s7875_s7] sm:$0xff] }
0x1339   :  { %v6496_v43 = vpop.eup %6495 }
0x133a   :  { %2011 = vrot.lane.b32.xlu1 %v6496_v43, %s6865_s6  ;;  %v2408_v43 = vld [vmem:[%s7875_s7 + $0x8] sm:$0xff] }
0x13a8   :  { %v2134_v44 = vpop.permute.xlu0 %2133 }
0x13a9   :  { %v2136_v16 = vmul.f32 %v6490_v31, %v2134_v44  ;;  %v2701_v31 = vld [vmem:[%s7878_s10 + $0x28] sm:$0xff] }
0x13aa   :  { %v6216_v56 = vpack.c.bf16 %v2701_v31, %v2700_v59  ;;  %v5253_v59 = vld [vmem:[#allocation19] ss:$0 sm:$0xff] }
0x13ab   :  { %2138 = vrot.lane.b32.xlu0 %v2136_v16, %s6864_s17  ;;  %v6208_v16 = vpack.c.bf16 %v2408_v43, %v2407_v42 }
0x13ac   :  { %v2012_v45 = vpop.permute.xlu1 %2011  ;;  %6217 = vmatprep.subr.bf16.mxu1 %v6216_v56 }
0x13ad   :  { %v2014_v47 = vmul.f32 %v6492_v34, %v2012_v45  ;;  %v2414_v34 = vld [vmem:[%s7875_s7 + $0x38] sm:$0xff] }
0x13ae   :  { %v6204_v36 = vpack.c.bf16 %v2414_v34, %v2413_v33 }
0x13af   :  { %2143 = vrot.lane.b32.xlu0 %v2130_v38, %s6866_s11  ;;  %2016 = vrot.lane.b32.xlu1 %v2014_v47, %s6864_s17  ;;  %v2697_v38 = vld [vmem:[%s7878_s10 + $0x8] sm:$0xff] }
0x13b0   :  { %v6224_v35 = vpack.c.bf16 %v2697_v38, %v2696_v37 }
0x13b3   :  { %2021 = vrot.lane.b32.xlu0 %v2008_v41, %s6866_s11 }
0x141d   :  { %v2139_v63 = vpop.permute.xlu0 %2138 }
0x141e   :  { %2141 = vst.msk [vmem:[#allocation8] sm:$0xff] %vm177_vm0, %v2139_v63  ;;  %2148 = vst.msk [vmem:[#allocation5 + $0x8] sm:$0xff] %vm177_vm0, %v2139_v63 }
0x1421   :  { %v2144_v49 = vpop.permute.xlu0 %2143  ;;  %v2017_v51 = vpop.permute.xlu1 %2016 }
0x1422   :  { %2146 = vst.msk [vmem:[#allocation9] sm:$0xff] %vm177_vm0, %v2144_v49  ;;  %2019 = vst.msk [vmem:[#allocation6] sm:$0xff] %vm177_vm0, %v2017_v51  ;;  %v2698_v49 = vld [vmem:[%s7878_s10 + $0x10] sm:$0xff] }
0x1423   :  { %2026 = vst.msk [vmem:[#allocation4 + $0x30] sm:$0xff] %vm177_vm0, %v2017_v51  ;;  %v2699_v51 = vld [vmem:[%s7878_s10 + $0x18] sm:$0xff] }
0x1425   :  { %v2022_v52 = vpop.permute.xlu0 %2021  ;;  %v2272_v53 = vld [vmem:[#allocation8] sm:$0xff] }
0x1426   :  { %2024 = vst.msk [vmem:[#allocation7] sm:$0xff] %vm177_vm0, %v2022_v52  ;;  %5790 = vmatmul.mubr.msk.f32.vlgmr.msra.gmra.mrb[30].mxu1 %vm177_vm0, %v2272_v53  ;;  %v2409_v52 = vld [vmem:[%s7875_s7 + $0x10] sm:$0xff]  ;;  %v2410_v53 = vld [vmem:[%s7875_s7 + $0x18] sm:$0xff] }
0x1427   :  { %6219 = vmatpush3.bf16.msra.mxu1 %v6216_v56 }
0x1428   :  { %6221 = vmatprep.subr.bf16.mxu1 %v6220_v50 }
0x1429   :  { %v2351_v55 = vld [vmem:[#allocation9] sm:$0xff]  ;;  %v2151_v57 = vld [vmem:[#allocation6] sm:$0xff] }
0x142a   :  { %2360 = vrot.lane.b32.xlu0 %v2351_v55, %s6864_s17  ;;  %5779 = vmatmul.mubr.msk.f32.vlgmr.msra.gmra.mrb[14].mxu0 %vm177_vm0, %v2151_v57 }
0x142b   :  { %6203 = vmatpush3.bf16.msra.mxu0 %v6200_v30  ;;  %6223 = vmatpush3.bf16.msra.mxu1 %v6220_v50  ;;  %v5270_v30 = vld [vmem:[%s7880_s12] ss:$0 sm:$0xff] }
0x142c   :  { %6205 = vmatprep.subr.bf16.mxu0 %v6204_v36  ;;  %6225 = vmatprep.subr.bf16.mxu1 %v6224_v35 }
0x142d   :  { %v2230_v58 = vld [vmem:[#allocation7] sm:$0xff] }
0x142e   :  { %2239 = vrot.lane.b32.xlu0 %v2230_v58, %s6864_s17  ;;  %v2400_v58 = vld [vmem:[#allocation5 + $0x8] sm:$0xff] }
0x142f   :  { %6207 = vmatpush3.bf16.msra.mxu0 %v6204_v36 }
0x1430   :  { %6209 = vmatprep.subr.bf16.mxu0 %v6208_v16 }
0x149c   :  { %v2361_v20 = vpop.permute.xlu0 %2360 }
0x14a0   :  { %v2240_v23 = vpop.permute.xlu0 %2239 }
0x14f9   :  { %v2346_v60 = vpop.f32.mrb[30].mxu1 }
0x14fa   :  { %v2350_v62 = vadd.f32 %v2346_v60, %v7200_v61  ;;  %v5791_v2 = vpop.f32.mrb[31].mxu1  ;;  %v6228_v60 = vpack.c.bf16 %v2699_v51, %v2698_v49 }
0x14fb   :  { %v2401_v2 = vld [vmem:[#allocation5 + $0x10] sm:$0xff] }
0x14fc   :  { %6497 = vtanh.f32 %v2350_v62  ;;  %v5236_v12 = vmul.f32 -1.442695, %v2350_v62  ;;  %v6212_v62 = vpack.c.bf16 %v2410_v53, %v2409_v52 }
0x14fd   :  { %v2225_v4 = vpop.f32.mrb[14].mxu0 }
0x14fe   :  { %v2229_v6 = vadd.f32 %v2225_v4, %v7191_v54  ;;  %v5780_v8 = vpop.f32.mrb[15].mxu0  ;;  %v2402_v4 = vld [vmem:[#allocation5 + $0x18] sm:$0xff] }
0x14ff   :  { %v2404_v8 = vld [vmem:[#allocation5 + $0x28] sm:$0xff] }
0x1500   :  { %6499 = vtanh.f32 %v2229_v6  ;;  %v5234_v46 = vmul.f32 -1.442695, %v2229_v6  ;;  %v2403_v6 = vld [vmem:[#allocation5 + $0x20] sm:$0xff] }
0x1501   :  { %6501 = vpow2.f32 %v5236_v12  ;;  %v2406_v12 = vld [vmem:[#allocation5 + $0x38] sm:$0xff] }
0x1502   :  { %6503 = vpow2.f32 %v5234_v46  ;;  %v3063_v46 = vld [vmem:[#allocation21] sm:$0xff] }
0x1506   :  { %v6498_v7 = vpop.eup %6497 }
0x1507   :  { %2365 = vrot.lane.b32.xlu1 %v6498_v7, %s6865_s6 }
0x150a   :  { %v6500_v9 = vpop.eup %6499 }
0x150b   :  { %2244 = vrot.lane.b32.xlu1 %v6500_v9, %s6865_s6  ;;  %v6502_v13 = vpop.eup %6501  ;;  %v2405_v9 = vld [vmem:[#allocation5 + $0x30] sm:$0xff] }
0x150c   :  { %v2355_v14 = vadd.f32 1.0, %v6502_v13  ;;  %v6504_v61 = vpop.eup %6503  ;;  %v3064_v13 = vld [vmem:[#allocation21 + $0x8] sm:$0xff] }
0x150d   :  { %v2234_v15 = vadd.f32 1.0, %v6504_v61  ;;  %v2944_v61 = vld [vmem:[#allocation18 + $0x8] sm:$0xff] }
0x150e   :  { %6505 = vrcp.f32 %v2355_v14  ;;  %v2943_v14 = vld [vmem:[#allocation18] sm:$0xff] }
0x150f   :  { %6507 = vrcp.f32 %v2234_v15 }
0x1518   :  { %v6506_v17 = vpop.eup %6505 }
0x1519   :  { %v6508_v18 = vpop.eup %6507  ;;  %v2363_v21 = vmul.f32 %v6506_v17, %v2361_v20  ;;  %v2945_v20 = vld [vmem:[#allocation18 + $0x10] sm:$0xff] }
0x151a   :  { %v2242_v40 = vmul.f32 %v6508_v18, %v2240_v23 }
0x1579   :  { %v2366_v54 = vpop.permute.xlu1 %2365 }
0x157a   :  { %v2368_v5 = vmul.f32 %v6506_v17, %v2366_v54  ;;  %v2392_v54 = vld [vmem:[#allocation4 + $0x8] sm:$0xff] }
0x157c   :  { %2370 = vrot.lane.b32.xlu1 %v2368_v5, %s6864_s17  ;;  %v7522_v5 = vpack.c.bf16 %v3064_v13, %v3063_v46 }
0x157d   :  { %v2245_v19 = vpop.permute.xlu1 %2244 }
0x157e   :  { %v2247_v48 = vmul.f32 %v6508_v18, %v2245_v19  ;;  %v3065_v19 = vld [vmem:[#allocation21 + $0x10] sm:$0xff] }
0x1580   :  { %2249 = vrot.lane.b32.xlu1 %v2247_v48, %s6864_s17  ;;  %v3066_v48 = vld [vmem:[#allocation21 + $0x18] sm:$0xff] }
0x15ee   :  { %v2371_v11 = vpop.permute.xlu1 %2370 }
0x15ef   :  { %v2373_v22 = vadd.f32 %v2371_v11, %v2363_v21  ;;  %v2946_v21 = vld [vmem:[#allocation18 + $0x18] sm:$0xff]  ;;  %v2393_v11 = vld [vmem:[#allocation4 + $0x10] sm:$0xff] }
0x15f0   :  { %v7535_v23 = vpack.c.bf16 %v2946_v21, %v2945_v20 }
0x15f1   :  { %6509 = vtanh.f32 %v2373_v22 }
0x15f2   :  { %v2250_v24 = vpop.permute.xlu1 %2249 }
0x15f3   :  { %v2252_v25 = vadd.f32 %v2250_v24, %v2242_v40  ;;  %v2394_v40 = vld [vmem:[#allocation4 + $0x18] sm:$0xff]  ;;  %v2395_v24 = vld [vmem:[#allocation4 + $0x20] sm:$0xff] }
0x15f5   :  { %6511 = vtanh.f32 %v2252_v25 }
0x15fb   :  { %v6510_v26 = vpop.eup %6509 }
0x15fc   :  { %2376 = vrot.lane.b32.xlu0 %v6510_v26, %s6865_s6  ;;  %v2397_v26 = vld [vmem:[#allocation4 + $0x30] sm:$0xff] }
0x15ff   :  { %v6512_v27 = vpop.eup %6511 }
0x1600   :  { %2255 = vrot.lane.b32.xlu1 %v6512_v27, %s6865_s6 }
0x166e   :  { %v2377_v10 = vpop.permute.xlu0 %2376 }
0x166f   :  { %v2379_v39 = vmul.f32 %v6506_v17, %v2377_v10  ;;  %v2391_v17 = vld [vmem:[#allocation4] sm:$0xff] }
0x1671   :  { %2381 = vrot.lane.b32.xlu0 %v2379_v39, %s6864_s17 }
0x1672   :  { %v2256_v41 = vpop.permute.xlu1 %2255 }
0x1673   :  { %v2258_v44 = vmul.f32 %v6508_v18, %v2256_v41  ;;  %v7524_v18 = vpack.c.bf16 %v2944_v61, %v2943_v14 }
0x1675   :  { %2386 = vrot.lane.b32.xlu0 %v2373_v22, %s6866_s11  ;;  %2260 = vrot.lane.b32.xlu1 %v2258_v44, %s6864_s17  ;;  %v7533_v22 = vpack.c.bf16 %v3066_v48, %v3065_v19 }
0x1679   :  { %2265 = vrot.lane.b32.xlu0 %v2252_v25, %s6866_s11  ;;  %v2396_v25 = vld [vmem:[#allocation4 + $0x28] sm:$0xff] }
0x16e3   :  { %v2382_v45 = vpop.permute.xlu0 %2381 }
0x16e4   :  { %2384 = vst.msk [vmem:[#allocation8] sm:$0xff] %vm177_vm0, %v2382_v45  ;;  %2390 = vst.msk [vmem:[#allocation5] sm:$0xff] %vm177_vm0, %v2382_v45 }
0x16e5   :  { %2939 = vst.msk [vmem:[#allocation8] sm:$0xff] %vm177_vm0, %v6863_v1 }
0x16e7   :  { %v2387_v47 = vpop.permute.xlu0 %2386  ;;  %v2261_v63 = vpop.permute.xlu1 %2260 }
0x16e8   :  { %2389 = vst.msk [vmem:[#allocation9] sm:$0xff] %vm177_vm0, %v2387_v47  ;;  %2263 = vst.msk [vmem:[#allocation6] sm:$0xff] %vm177_vm0, %v2261_v63 }
0x16e9   :  { %2270 = vst.msk [vmem:[#allocation4 + $0x38] sm:$0xff] %vm177_vm0, %v2261_v63  ;;  %2940 = vst.msk [vmem:[#allocation9] sm:$0xff] %vm177_vm0, %v6863_v1 }
0x16ea   :  { %2937 = vst.msk [vmem:[#allocation6] sm:$0xff] %vm177_vm0, %v6863_v1 }
0x16eb   :  { %v2266_v55 = vpop.permute.xlu0 %2265  ;;  %v2399_v57 = vld [vmem:[#allocation5] sm:$0xff] }
0x16ec   :  { %2268 = vst.msk [vmem:[#allocation7] sm:$0xff] %vm177_vm0, %v2266_v55  ;;  %5800 = vmatprep.mubr.msk.f32.mxu0 %vm177_vm0, %v2399_v57  ;;  %5840 = vmatprep.mubr.msk.f32.mxu1 %vm177_vm0, %v2399_v57  ;;  %v3062_v29 = vld [vmem:[#allocation8] sm:$0xff] }
0x16ed   :  { %2938 = vst.msk [vmem:[#allocation7] sm:$0xff] %vm177_vm0, %v6863_v1  ;;  %5801 = vmatmul.mubr.msk.f32.vlgmr.msra.gmra.mrb[16].mxu0 %vm177_vm0, %v2400_v58  ;;  %5841 = vmatmul.mubr.msk.f32.vlgmr.msra.gmra.mrb[32].mxu1 %vm177_vm0, %v2400_v58 }
0x16ee   :  { %5803 = vmatprep.mubr.msk.f32.mxu0 %vm177_vm0, %v2401_v2  ;;  %5843 = vmatprep.mubr.msk.f32.mxu1 %vm177_vm0, %v2401_v2 }
0x16ef   :  { %6227 = vmatpush3.bf16.msra.mxu1 %v6224_v35  ;;  %6211 = vmatpush3.bf16.msra.mxu0 %v6208_v16 }
0x16f0   :  { %6229 = vmatprep.subr.bf16.mxu1 %v6228_v60  ;;  %6213 = vmatprep.subr.bf16.mxu0 %v6212_v62  ;;  %v3141_v7 = vld [vmem:[#allocation9] sm:$0xff] }
0x16f1   :  { %5804 = vmatmul.mubr.msk.f32.gmra.mrb[18].mxu0 %vm177_vm0, %v2402_v4  ;;  %5844 = vmatmul.mubr.msk.f32.gmra.mrb[34].mxu1 %vm177_vm0, %v2402_v4  ;;  %v2398_v27 = vld [vmem:[#allocation4 + $0x38] sm:$0xff]  ;;  %v2942_v28 = vld [vmem:[#allocation6] sm:$0xff] }
0x16f2   :  { %5806 = vmatprep.mubr.msk.f32.mxu0 %vm177_vm0, %v2403_v6  ;;  %5846 = vmatprep.mubr.msk.f32.mxu1 %vm177_vm0, %v2403_v6 }
0x16f3   :  { %6231 = vmatpush3.bf16.msra.mxu1 %v6228_v60  ;;  %6215 = vmatpush3.bf16.msra.mxu0 %v6212_v62 }
0x16f4   :  { %6238 = vmatprep.subr.bf16.mxu1 %v6861_v0  ;;  %6232 = vmatprep.subr.bf16.mxu0 %v6861_v0  ;;  %v3021_v15 = vld [vmem:[#allocation7] sm:$0xff] }
0x16f5   :  { %5807 = vmatmul.mubr.msk.f32.gmra.mrb[20].mxu0 %vm177_vm0, %v2404_v8  ;;  %5847 = vmatmul.mubr.msk.f32.gmra.mrb[36].mxu1 %vm177_vm0, %v2404_v8 }
0x16f6   :  { %5809 = vmatprep.mubr.msk.f32.mxu0 %vm177_vm0, %v2405_v9  ;;  %5849 = vmatprep.mubr.msk.f32.mxu1 %vm177_vm0, %v2405_v9 }
0x16f7   :  { %3150 = vrot.lane.b32.xlu0 %v3141_v7, %s6864_s17 }
0x16f9   :  { %5810 = vmatmul.mubr.msk.f32.gmra.mrb[22].mxu0 %vm177_vm0, %v2406_v12  ;;  %5850 = vmatmul.mubr.msk.f32.gmra.mrb[38].mxu1 %vm177_vm0, %v2406_v12 }
0x16fa   :  { %5820 = vmatprep.mubr.msk.f32.mxu0 %vm177_vm0, %v2391_v17  ;;  %5860 = vmatprep.mubr.msk.f32.mxu1 %vm177_vm0, %v2391_v17 }
0x16fb   :  { %3030 = vrot.lane.b32.xlu0 %v3021_v15, %s6864_s17 }
0x16fd   :  { %5821 = vmatmul.mubr.msk.f32.vlgmr.msra.gmra.mrb[16].mxu0 %vm177_vm0, %v2392_v54  ;;  %5861 = vmatmul.mubr.msk.f32.vlgmr.msra.gmra.mrb[32].mxu1 %vm177_vm0, %v2392_v54 }
0x16fe   :  { %5823 = vmatprep.mubr.msk.f32.mxu0 %vm177_vm0, %v2393_v11  ;;  %5863 = vmatprep.mubr.msk.f32.mxu1 %vm177_vm0, %v2393_v11 }
0x16ff   :  { %6240 = vmatpush3.bf16.msra.mxu1 %v7522_v5  ;;  %6234 = vmatpush3.bf16.msra.mxu0 %v7524_v18 }
0x1700   :  { %6241 = vmatprep.subr.bf16.mxu1 %v6861_v0  ;;  %6235 = vmatprep.subr.bf16.mxu0 %v6861_v0 }
0x1701   :  { %5824 = vmatmul.mubr.msk.f32.gmra.mrb[18].mxu0 %vm177_vm0, %v2394_v40  ;;  %5864 = vmatmul.mubr.msk.f32.gmra.mrb[34].mxu1 %vm177_vm0, %v2394_v40 }
0x1702   :  { %5826 = vmatprep.mubr.msk.f32.mxu0 %vm177_vm0, %v2395_v24  ;;  %5866 = vmatprep.mubr.msk.f32.mxu1 %vm177_vm0, %v2395_v24 }
0x1703   :  { %6243 = vmatpush3.bf16.msra.mxu1 %v7533_v22  ;;  %6237 = vmatpush3.bf16.msra.mxu0 %v7535_v23 }
0x1704   :  { %6250 = vmatprep.subr.bf16.mxu1 %v6861_v0  ;;  %6244 = vmatprep.subr.bf16.mxu0 %v6861_v0 }
0x1705   :  { %5827 = vmatmul.mubr.msk.f32.gmra.mrb[20].mxu0 %vm177_vm0, %v2396_v25  ;;  %5867 = vmatmul.mubr.msk.f32.gmra.mrb[36].mxu1 %vm177_vm0, %v2396_v25 }
0x1706   :  { %5829 = vmatprep.mubr.msk.f32.mxu0 %vm177_vm0, %v2397_v26  ;;  %5869 = vmatprep.mubr.msk.f32.mxu1 %vm177_vm0, %v2397_v26 }
0x1709   :  { %5830 = vmatmul.mubr.msk.f32.gmra.mrb[22].mxu0 %vm177_vm0, %v2398_v27  ;;  %5870 = vmatmul.mubr.msk.f32.gmra.mrb[38].mxu1 %vm177_vm0, %v2398_v27 }
0x170a   :  { %5880 = vmatprep.mubr.msk.f32.mxu0 %vm6862_vm1, %v6863_v1  ;;  %5891 = vmatprep.mubr.msk.f32.mxu1 %vm6862_vm1, %v6863_v1 }
0x170d   :  { %5881 = vmatmul.mubr.msk.f32.vlgmr.msra.gmra.mrb[24].mxu0 %vm177_vm0, %v2942_v28  ;;  %5892 = vmatmul.mubr.msk.f32.vlgmr.msra.gmra.mrb[40].mxu1 %vm177_vm0, %v3062_v29 }
0x170e   :  { %6252 = vmatpush3.bf16.msra.mxu1 %v7522_v5  ;;  %6246 = vmatpush3.bf16.msra.mxu0 %v7524_v18 }
0x170f   :  { %6253 = vmatprep.subr.bf16.mxu1 %v6861_v0  ;;  %5913 = vmatprep.mubr.msk.f32.mxu1 %vm6862_vm1, %v6863_v1 }
0x1710   :  { %6247 = vmatprep.subr.bf16.mxu0 %v6861_v0  ;;  %5902 = vmatprep.mubr.msk.f32.mxu0 %vm6862_vm1, %v6863_v1 }
0x1712   :  { %6255 = vmatpush3.bf16.msra.mxu1 %v7533_v22  ;;  %6249 = vmatpush3.bf16.msra.mxu0 %v7535_v23 }
0x1713   :  { %6262 = vmatprep.subr.bf16.mxu1 %v6861_v0  ;;  %6256 = vmatprep.subr.bf16.mxu0 %v6861_v0 }
0x1769   :  { %v3151_v26 = vpop.permute.xlu0 %3150 }
0x176d   :  { %v3031_v28 = vpop.permute.xlu0 %3030 }
0x17d0   :  { %v5822_v31 = vpop.f32.mrb[16].mxu0  ;;  %v5862_v56 = vpop.f32.mrb[32].mxu1 }
0x17d1   :  { %v7574_v33 = vadd.f32 %v5822_v31, %v5253_v59  ;;  %v7576_v34 = vadd.f32 %v5862_v56, %v5270_v30  ;;  %v2634_v3 = vpop.f32.mrb[17].mxu0  ;;  %v2875_v36 = vpop.f32.mrb[33].mxu1 }
0x17d2   :  { %v7578_v32 = vadd.f32 %v5270_v30, %v2875_v36  ;;  %v2680_v2 = vadd.f32 %v5253_v59, %v2634_v3 }
0x17d4   :  { %v5825_v50 = vpop.f32.mrb[18].mxu0  ;;  %v5865_v37 = vpop.f32.mrb[34].mxu1 }
0x17d5   :  { %v7580_v38 = vadd.f32 %v5825_v50, %v5253_v59  ;;  %v7582_v10 = vadd.f32 %v5865_v37, %v5270_v30  ;;  %v2644_v35 = vpop.f32.mrb[19].mxu0  ;;  %v2885_v39 = vpop.f32.mrb[35].mxu1 }
0x17d6   :  { %v7584_v41 = vadd.f32 %v5253_v59, %v2644_v35  ;;  %v7586_v42 = vadd.f32 %v5270_v30, %v2885_v39 }
0x17d8   :  { %v5828_v43 = vpop.f32.mrb[20].mxu0  ;;  %v5868_v44 = vpop.f32.mrb[36].mxu1 }
0x17d9   :  { %v7588_v16 = vadd.f32 %v5828_v43, %v5253_v59  ;;  %v7590_v45 = vadd.f32 %v5868_v44, %v5270_v30  ;;  %v2654_v47 = vpop.f32.mrb[21].mxu0  ;;  %v2895_v63 = vpop.f32.mrb[37].mxu1 }
0x17da   :  { %v7592_v49 = vadd.f32 %v5253_v59, %v2654_v47  ;;  %v7594_v51 = vadd.f32 %v5270_v30, %v2895_v63 }
0x17dc   :  { %v5831_v52 = vpop.f32.mrb[22].mxu0  ;;  %v5871_v53 = vpop.f32.mrb[38].mxu1 }
0x17dd   :  { %v7596_v55 = vadd.f32 %v5831_v52, %v5253_v59  ;;  %v2664_v57 = vpop.f32.mrb[23].mxu0  ;;  %v2905_v58 = vpop.f32.mrb[39].mxu1  ;;  %v2928_v4 = vadd.f32 %v5871_v53, %v5270_v30 }
0x17de   :  { %v7598_v60 = vadd.f32 %v5253_v59, %v2664_v57  ;;  %v7600_v62 = vadd.f32 %v5270_v30, %v2905_v58 }
0x17e0   :  { %v3016_v6 = vpop.f32.mrb[24].mxu0  ;;  %v3136_v8 = vpop.f32.mrb[40].mxu1 }
0x17e1   :  { %v3020_v7 = vadd.f32 %v3016_v6, %v2680_v2  ;;  %v3140_v9 = vadd.f32 %v3136_v8, %v2928_v4  ;;  %v5893_v12 = vpop.f32.mrb[41].mxu1  ;;  %v5882_v46 = vpop.f32.mrb[25].mxu0 }
0x17e3   :  { %6513 = vtanh.f32 %v3140_v9  ;;  %v5274_v61 = vmul.f32 -1.442695, %v3140_v9  ;;  %v5272_v15 = vmul.f32 -1.442695, %v3020_v7 }
0x17e4   :  { %6515 = vtanh.f32 %v3020_v7 }
0x17e5   :  { %6517 = vpow2.f32 %v5274_v61 }
0x17e6   :  { %6519 = vpow2.f32 %v5272_v15 }
0x17ed   :  { %v6514_v13 = vpop.eup %6513 }
0x17ee   :  { %3155 = vrot.lane.b32.xlu1 %v6514_v13, %s6865_s6  ;;  %v6516_v14 = vpop.eup %6515 }
0x17ef   :  { %v6518_v17 = vpop.eup %6517 }
0x17f0   :  { %v3145_v54 = vadd.f32 1.0, %v6518_v17  ;;  %v6520_v19 = vpop.eup %6519 }
0x17f1   :  { %v3025_v48 = vadd.f32 1.0, %v6520_v19 }
0x17f2   :  { %3035 = vrot.lane.b32.xlu1 %v6516_v14, %s6865_s6  ;;  %6521 = vrcp.f32 %v3145_v54 }
0x17f3   :  { %6523 = vrcp.f32 %v3025_v48 }
0x17fc   :  { %v6522_v20 = vpop.eup %6521 }
0x17fd   :  { %v6524_v40 = vpop.eup %6523  ;;  %v3153_v27 = vmul.f32 %v6522_v20, %v3151_v26 }
0x17fe   :  { %v3033_v30 = vmul.f32 %v6524_v40, %v3031_v28 }
0x1860   :  { %v3156_v21 = vpop.permute.xlu1 %3155 }
0x1861   :  { %v3158_v11 = vmul.f32 %v6522_v20, %v3156_v21 }
0x1863   :  { %3160 = vrot.lane.b32.xlu1 %v3158_v11, %s6864_s17 }
0x1864   :  { %v3036_v24 = vpop.permute.xlu1 %3035 }
0x1865   :  { %v3038_v25 = vmul.f32 %v6524_v40, %v3036_v24 }
0x1867   :  { %3040 = vrot.lane.b32.xlu1 %v3038_v25, %s6864_s17 }
0x18d5   :  { %v3161_v29 = vpop.permute.xlu1 %3160 }
0x18d6   :  { %v3163_v59 = vadd.f32 %v3161_v29, %v3153_v27 }
0x18d8   :  { %6525 = vtanh.f32 %v3163_v59 }
0x18d9   :  { %v3041_v31 = vpop.permute.xlu1 %3040 }
0x18da   :  { %v3043_v56 = vadd.f32 %v3041_v31, %v3033_v30 }
0x18dc   :  { %6527 = vtanh.f32 %v3043_v56 }
0x18e2   :  { %v6526_v3 = vpop.eup %6525 }
0x18e3   :  { %3166 = vrot.lane.b32.xlu0 %v6526_v3, %s6865_s6 }
0x18e6   :  { %v6528_v36 = vpop.eup %6527 }
0x18e7   :  { %3046 = vrot.lane.b32.xlu1 %v6528_v36, %s6865_s6 }
0x1955   :  { %v3167_v50 = vpop.permute.xlu0 %3166 }
0x1956   :  { %v3169_v37 = vmul.f32 %v6522_v20, %v3167_v50 }
0x1958   :  { %3171 = vrot.lane.b32.xlu0 %v3169_v37, %s6864_s17 }
0x1959   :  { %v3047_v35 = vpop.permute.xlu1 %3046 }
0x195a   :  { %v3049_v39 = vmul.f32 %v6524_v40, %v3047_v35 }
0x195c   :  { %3176 = vrot.lane.b32.xlu0 %v3163_v59, %s6866_s11  ;;  %3051 = vrot.lane.b32.xlu1 %v3049_v39, %s6864_s17 }
0x1960   :  { %3056 = vrot.lane.b32.xlu0 %v3043_v56, %s6866_s11 }
0x19ca   :  { %v3172_v43 = vpop.permute.xlu0 %3171 }
0x19cb   :  { %3174 = vst.msk [vmem:[#allocation8] sm:$0xff] %vm177_vm0, %v3172_v43  ;;  %3180 = vst.msk [vmem:[#allocation5 + $0x38] sm:$0xff] %vm177_vm0, %v3172_v43 }
0x19ce   :  { %v3177_v44 = vpop.permute.xlu0 %3176  ;;  %v3052_v47 = vpop.permute.xlu1 %3051 }
0x19cf   :  { %3179 = vst.msk [vmem:[#allocation9] sm:$0xff] %vm177_vm0, %v3177_v44  ;;  %3054 = vst.msk [vmem:[#allocation6] sm:$0xff] %vm177_vm0, %v3052_v47 }
0x19d0   :  { %3060 = vst.msk [vmem:[#allocation4] sm:$0xff] %vm177_vm0, %v3052_v47 }
0x19d2   :  { %v3057_v63 = vpop.permute.xlu0 %3056  ;;  %v3302_v52 = vld [vmem:[#allocation8] sm:$0xff] }
0x19d3   :  { %3059 = vst.msk [vmem:[#allocation7] sm:$0xff] %vm177_vm0, %v3057_v63  ;;  %5914 = vmatmul.mubr.msk.f32.vlgmr.msra.gmra.mrb[42].mxu1 %vm177_vm0, %v3302_v52 }
0x19d4   :  { %6264 = vmatpush3.bf16.msra.mxu1 %v7522_v5  ;;  %5935 = vmatprep.mubr.msk.f32.mxu1 %vm6862_vm1, %v6863_v1 }
0x19d5   :  { %6265 = vmatprep.subr.bf16.mxu1 %v6861_v0 }
0x19d6   :  { %v3381_v53 = vld [vmem:[#allocation9] sm:$0xff]  ;;  %v3182_v57 = vld [vmem:[#allocation6] sm:$0xff] }
0x19d7   :  { %3390 = vrot.lane.b32.xlu0 %v3381_v53, %s6864_s17  ;;  %5903 = vmatmul.mubr.msk.f32.vlgmr.msra.gmra.mrb[26].mxu0 %vm177_vm0, %v3182_v57 }
0x19d8   :  { %6258 = vmatpush3.bf16.msra.mxu0 %v7524_v18  ;;  %6267 = vmatpush3.bf16.msra.mxu1 %v7533_v22 }
0x19d9   :  { %6259 = vmatprep.subr.bf16.mxu0 %v6861_v0  ;;  %5924 = vmatprep.mubr.msk.f32.mxu0 %vm6862_vm1, %v6863_v1 }
0x19da   :  { %v3261_v58 = vld [vmem:[#allocation7] sm:$0xff]  ;;  %6274 = vmatprep.subr.bf16.mxu1 %v6861_v0 }
0x19db   :  { %3270 = vrot.lane.b32.xlu0 %v3261_v58, %s6864_s17 }
0x19dc   :  { %6261 = vmatpush3.bf16.msra.mxu0 %v7535_v23 }
0x19dd   :  { %6268 = vmatprep.subr.bf16.mxu0 %v6861_v0 }
0x1a49   :  { %v3391_v11 = vpop.permute.xlu0 %3390 }
0x1a4d   :  { %v3271_v26 = vpop.permute.xlu0 %3270 }
0x1aa6   :  { %v3376_v2 = vpop.f32.mrb[42].mxu1 }
0x1aa7   :  { %v3380_v4 = vadd.f32 %v3376_v2, %v7600_v62  ;;  %v5915_v6 = vpop.f32.mrb[43].mxu1 }
0x1aa9   :  { %6529 = vtanh.f32 %v3380_v4  ;;  %v5278_v13 = vmul.f32 -1.442695, %v3380_v4 }
0x1aaa   :  { %v3256_v8 = vpop.f32.mrb[26].mxu0 }
0x1aab   :  { %v3260_v7 = vadd.f32 %v3256_v8, %v7574_v33  ;;  %v5904_v9 = vpop.f32.mrb[27].mxu0 }
0x1aad   :  { %6531 = vtanh.f32 %v3260_v7  ;;  %v5276_v14 = vmul.f32 -1.442695, %v3260_v7 }
0x1aae   :  { %6533 = vpow2.f32 %v5278_v13 }
0x1aaf   :  { %6535 = vpow2.f32 %v5276_v14 }
0x1ab3   :  { %v6530_v12 = vpop.eup %6529 }
0x1ab4   :  { %3395 = vrot.lane.b32.xlu1 %v6530_v12, %s6865_s6 }
0x1ab7   :  { %v6532_v46 = vpop.eup %6531 }
0x1ab8   :  { %3275 = vrot.lane.b32.xlu1 %v6532_v46, %s6865_s6  ;;  %v6534_v61 = vpop.eup %6533 }
0x1ab9   :  { %v3385_v15 = vadd.f32 1.0, %v6534_v61  ;;  %v6536_v62 = vpop.eup %6535 }
0x1aba   :  { %v3265_v17 = vadd.f32 1.0, %v6536_v62 }
0x1abb   :  { %6537 = vrcp.f32 %v3385_v15 }
0x1abc   :  { %6539 = vrcp.f32 %v3265_v17 }
0x1ac5   :  { %v6538_v54 = vpop.eup %6537 }
0x1ac6   :  { %v6540_v48 = vpop.eup %6539  ;;  %v3393_v40 = vmul.f32 %v6538_v54, %v3391_v11 }
0x1ac7   :  { %v3273_v27 = vmul.f32 %v6540_v48, %v3271_v26 }
0x1b26   :  { %v3396_v33 = vpop.permute.xlu1 %3395 }
0x1b27   :  { %v3398_v19 = vmul.f32 %v6538_v54, %v3396_v33 }
0x1b29   :  { %3400 = vrot.lane.b32.xlu1 %v3398_v19, %s6864_s17 }
0x1b2a   :  { %v3276_v20 = vpop.permute.xlu1 %3275 }
0x1b2b   :  { %v3278_v21 = vmul.f32 %v6540_v48, %v3276_v20 }
0x1b2d   :  { %3280 = vrot.lane.b32.xlu1 %v3278_v21, %s6864_s17 }
0x1b9b   :  { %v3401_v24 = vpop.permute.xlu1 %3400 }
0x1b9c   :  { %v3403_v25 = vadd.f32 %v3401_v24, %v3393_v40 }
0x1b9e   :  { %6541 = vtanh.f32 %v3403_v25 }
0x1b9f   :  { %v3281_v28 = vpop.permute.xlu1 %3280 }
0x1ba0   :  { %v3283_v29 = vadd.f32 %v3281_v28, %v3273_v27 }
0x1ba2   :  { %6543 = vtanh.f32 %v3283_v29 }
0x1ba8   :  { %v6542_v59 = vpop.eup %6541 }
0x1ba9   :  { %3406 = vrot.lane.b32.xlu0 %v6542_v59, %s6865_s6 }
0x1bac   :  { %v6544_v30 = vpop.eup %6543 }
0x1bad   :  { %3286 = vrot.lane.b32.xlu1 %v6544_v30, %s6865_s6 }
0x1c1b   :  { %v3407_v31 = vpop.permute.xlu0 %3406 }
0x1c1c   :  { %v3409_v56 = vmul.f32 %v6538_v54, %v3407_v31 }
0x1c1e   :  { %3411 = vrot.lane.b32.xlu0 %v3409_v56, %s6864_s17 }
0x1c1f   :  { %v3287_v3 = vpop.permute.xlu1 %3286 }
0x1c20   :  { %v3289_v36 = vmul.f32 %v6540_v48, %v3287_v3 }
0x1c22   :  { %3416 = vrot.lane.b32.xlu0 %v3403_v25, %s6866_s11  ;;  %3291 = vrot.lane.b32.xlu1 %v3289_v36, %s6864_s17 }
0x1c26   :  { %3296 = vrot.lane.b32.xlu0 %v3283_v29, %s6866_s11 }
0x1c90   :  { %v3412_v50 = vpop.permute.xlu0 %3411 }
0x1c91   :  { %3414 = vst.msk [vmem:[#allocation8] sm:$0xff] %vm177_vm0, %v3412_v50  ;;  %3420 = vst.msk [vmem:[#allocation5 + $0x30] sm:$0xff] %vm177_vm0, %v3412_v50 }
0x1c94   :  { %v3417_v37 = vpop.permute.xlu0 %3416  ;;  %v3292_v35 = vpop.permute.xlu1 %3291 }
0x1c95   :  { %3419 = vst.msk [vmem:[#allocation9] sm:$0xff] %vm177_vm0, %v3417_v37  ;;  %3294 = vst.msk [vmem:[#allocation6] sm:$0xff] %vm177_vm0, %v3292_v35 }
0x1c96   :  { %3300 = vst.msk [vmem:[#allocation4 + $0x8] sm:$0xff] %vm177_vm0, %v3292_v35 }
0x1c98   :  { %v3297_v39 = vpop.permute.xlu0 %3296  ;;  %v3542_v43 = vld [vmem:[#allocation8] sm:$0xff] }
0x1c99   :  { %3299 = vst.msk [vmem:[#allocation7] sm:$0xff] %vm177_vm0, %v3297_v39  ;;  %5936 = vmatmul.mubr.msk.f32.vlgmr.msra.gmra.mrb[44].mxu1 %vm177_vm0, %v3542_v43 }
0x1c9a   :  { %6276 = vmatpush3.bf16.msra.mxu1 %v7522_v5  ;;  %5957 = vmatprep.mubr.msk.f32.mxu1 %vm6862_vm1, %v6863_v1 }
0x1c9b   :  { %6277 = vmatprep.subr.bf16.mxu1 %v6861_v0 }
0x1c9c   :  { %v3621_v44 = vld [vmem:[#allocation9] sm:$0xff]  ;;  %v3422_v47 = vld [vmem:[#allocation6] sm:$0xff] }
0x1c9d   :  { %3630 = vrot.lane.b32.xlu0 %v3621_v44, %s6864_s17  ;;  %5925 = vmatmul.mubr.msk.f32.vlgmr.msra.gmra.mrb[28].mxu0 %vm177_vm0, %v3422_v47 }
0x1c9e   :  { %6270 = vmatpush3.bf16.msra.mxu0 %v7524_v18  ;;  %6279 = vmatpush3.bf16.msra.mxu1 %v7533_v22 }
0x1c9f   :  { %6271 = vmatprep.subr.bf16.mxu0 %v6861_v0  ;;  %5946 = vmatprep.mubr.msk.f32.mxu0 %vm6862_vm1, %v6863_v1 }
0x1ca0   :  { %v3501_v63 = vld [vmem:[#allocation7] sm:$0xff]  ;;  %6286 = vmatprep.subr.bf16.mxu1 %v6861_v0 }
0x1ca1   :  { %3510 = vrot.lane.b32.xlu0 %v3501_v63, %s6864_s17 }
0x1ca2   :  { %6273 = vmatpush3.bf16.msra.mxu0 %v7535_v23 }
0x1ca3   :  { %6280 = vmatprep.subr.bf16.mxu0 %v6861_v0 }
0x1d0f   :  { %v3631_v54 = vpop.permute.xlu0 %3630 }
0x1d13   :  { %v3511_v20 = vpop.permute.xlu0 %3510 }
0x1d6c   :  { %v3616_v52 = vpop.f32.mrb[44].mxu1 }
0x1d6d   :  { %v3620_v53 = vadd.f32 %v3616_v52, %v7590_v45  ;;  %v5937_v57 = vpop.f32.mrb[45].mxu1 }
0x1d6f   :  { %6545 = vtanh.f32 %v3620_v53  ;;  %v5282_v7 = vmul.f32 -1.442695, %v3620_v53 }
0x1d70   :  { %v3496_v58 = vpop.f32.mrb[28].mxu0 }
0x1d71   :  { %v3500_v2 = vadd.f32 %v3496_v58, %v7584_v41  ;;  %v5926_v4 = vpop.f32.mrb[29].mxu0 }
0x1d73   :  { %6547 = vtanh.f32 %v3500_v2  ;;  %v5280_v9 = vmul.f32 -1.442695, %v3500_v2 }
0x1d74   :  { %6549 = vpow2.f32 %v5282_v7 }
0x1d75   :  { %6551 = vpow2.f32 %v5280_v9 }
0x1d79   :  { %v6546_v6 = vpop.eup %6545 }
0x1d7a   :  { %3635 = vrot.lane.b32.xlu1 %v6546_v6, %s6865_s6 }
0x1d7d   :  { %v6548_v8 = vpop.eup %6547 }
0x1d7e   :  { %3515 = vrot.lane.b32.xlu1 %v6548_v8, %s6865_s6  ;;  %v6550_v12 = vpop.eup %6549 }
0x1d7f   :  { %v3625_v46 = vadd.f32 1.0, %v6550_v12  ;;  %v6552_v45 = vpop.eup %6551 }
0x1d80   :  { %v3505_v13 = vadd.f32 1.0, %v6552_v45 }
0x1d81   :  { %6553 = vrcp.f32 %v3625_v46 }
0x1d82   :  { %6555 = vrcp.f32 %v3505_v13 }
0x1d8b   :  { %v6554_v14 = vpop.eup %6553 }
0x1d8c   :  { %v6556_v15 = vpop.eup %6555  ;;  %v3633_v33 = vmul.f32 %v6554_v14, %v3631_v54 }
0x1d8d   :  { %v3513_v21 = vmul.f32 %v6556_v15, %v3511_v20 }
0x1dec   :  { %v3636_v41 = vpop.permute.xlu1 %3635 }
0x1ded   :  { %v3638_v61 = vmul.f32 %v6554_v14, %v3636_v41 }
0x1def   :  { %3640 = vrot.lane.b32.xlu1 %v3638_v61, %s6864_s17 }
0x1df0   :  { %v3516_v62 = vpop.permute.xlu1 %3515 }
0x1df1   :  { %v3518_v17 = vmul.f32 %v6556_v15, %v3516_v62 }
0x1df3   :  { %3520 = vrot.lane.b32.xlu1 %v3518_v17, %s6864_s17 }
0x1e61   :  { %v3641_v19 = vpop.permute.xlu1 %3640 }
0x1e62   :  { %v3643_v48 = vadd.f32 %v3641_v19, %v3633_v33 }
0x1e64   :  { %6557 = vtanh.f32 %v3643_v48 }
0x1e65   :  { %v3521_v11 = vpop.permute.xlu1 %3520 }
0x1e66   :  { %v3523_v40 = vadd.f32 %v3521_v11, %v3513_v21 }
0x1e68   :  { %6559 = vtanh.f32 %v3523_v40 }
0x1e6e   :  { %v6558_v24 = vpop.eup %6557 }
0x1e6f   :  { %3646 = vrot.lane.b32.xlu0 %v6558_v24, %s6865_s6 }
0x1e72   :  { %v6560_v25 = vpop.eup %6559 }
0x1e73   :  { %3526 = vrot.lane.b32.xlu1 %v6560_v25, %s6865_s6 }
0x1ee1   :  { %v3647_v26 = vpop.permute.xlu0 %3646 }
0x1ee2   :  { %v3649_v27 = vmul.f32 %v6554_v14, %v3647_v26 }
0x1ee4   :  { %3651 = vrot.lane.b32.xlu0 %v3649_v27, %s6864_s17 }
0x1ee5   :  { %v3527_v28 = vpop.permute.xlu1 %3526 }
0x1ee6   :  { %v3529_v29 = vmul.f32 %v6556_v15, %v3527_v28 }
0x1ee8   :  { %3656 = vrot.lane.b32.xlu0 %v3643_v48, %s6866_s11  ;;  %3531 = vrot.lane.b32.xlu1 %v3529_v29, %s6864_s17 }
0x1eec   :  { %3536 = vrot.lane.b32.xlu0 %v3523_v40, %s6866_s11 }
0x1f56   :  { %v3652_v59 = vpop.permute.xlu0 %3651 }
0x1f57   :  { %3654 = vst.msk [vmem:[#allocation8] sm:$0xff] %vm177_vm0, %v3652_v59  ;;  %3660 = vst.msk [vmem:[#allocation5 + $0x28] sm:$0xff] %vm177_vm0, %v3652_v59 }
0x1f5a   :  { %v3657_v30 = vpop.permute.xlu0 %3656  ;;  %v3532_v31 = vpop.permute.xlu1 %3531 }
0x1f5b   :  { %3659 = vst.msk [vmem:[#allocation9] sm:$0xff] %vm177_vm0, %v3657_v30  ;;  %3534 = vst.msk [vmem:[#allocation6] sm:$0xff] %vm177_vm0, %v3532_v31 }
0x1f5c   :  { %3540 = vst.msk [vmem:[#allocation4 + $0x10] sm:$0xff] %vm177_vm0, %v3532_v31 }
0x1f5e   :  { %v3537_v56 = vpop.permute.xlu0 %3536  ;;  %v3782_v3 = vld [vmem:[#allocation8] sm:$0xff] }
0x1f5f   :  { %3539 = vst.msk [vmem:[#allocation7] sm:$0xff] %vm177_vm0, %v3537_v56  ;;  %5958 = vmatmul.mubr.msk.f32.vlgmr.msra.gmra.mrb[46].mxu1 %vm177_vm0, %v3782_v3 }
0x1f60   :  { %6288 = vmatpush3.bf16.msra.mxu1 %v7522_v5  ;;  %5979 = vmatprep.mubr.msk.f32.mxu1 %vm6862_vm1, %v6863_v1 }
0x1f61   :  { %6289 = vmatprep.subr.bf16.mxu1 %v6861_v0 }
0x1f62   :  { %v3861_v36 = vld [vmem:[#allocation9] sm:$0xff]  ;;  %v3662_v50 = vld [vmem:[#allocation6] sm:$0xff] }
0x1f63   :  { %3870 = vrot.lane.b32.xlu0 %v3861_v36, %s6864_s17  ;;  %5947 = vmatmul.mubr.msk.f32.vlgmr.msra.gmra.mrb[30].mxu0 %vm177_vm0, %v3662_v50 }
0x1f64   :  { %6282 = vmatpush3.bf16.msra.mxu0 %v7524_v18  ;;  %6291 = vmatpush3.bf16.msra.mxu1 %v7533_v22 }
0x1f65   :  { %6283 = vmatprep.subr.bf16.mxu0 %v6861_v0  ;;  %5968 = vmatprep.mubr.msk.f32.mxu0 %vm6862_vm1, %v6863_v1 }
0x1f66   :  { %v3741_v37 = vld [vmem:[#allocation7] sm:$0xff]  ;;  %6298 = vmatprep.subr.bf16.mxu1 %v6861_v0 }
0x1f67   :  { %3750 = vrot.lane.b32.xlu0 %v3741_v37, %s6864_s17 }
0x1f68   :  { %6285 = vmatpush3.bf16.msra.mxu0 %v7535_v23 }
0x1f69   :  { %6292 = vmatprep.subr.bf16.mxu0 %v6861_v0 }
0x1fd5   :  { %v3871_v45 = vpop.permute.xlu0 %3870 }
0x1fd9   :  { %v3751_v61 = vpop.permute.xlu0 %3750 }
0x2032   :  { %v3856_v35 = vpop.f32.mrb[46].mxu1 }
0x2033   :  { %v3860_v39 = vadd.f32 %v3856_v35, %v7594_v51  ;;  %v5959_v43 = vpop.f32.mrb[47].mxu1 }
0x2035   :  { %6561 = vtanh.f32 %v3860_v39  ;;  %v5286_v57 = vmul.f32 -1.442695, %v3860_v39 }
0x2036   :  { %v3736_v44 = vpop.f32.mrb[30].mxu0 }
0x2037   :  { %v3740_v47 = vadd.f32 %v3736_v44, %v7580_v38  ;;  %v5948_v63 = vpop.f32.mrb[31].mxu0 }
0x2039   :  { %6563 = vtanh.f32 %v3740_v47  ;;  %v5284_v58 = vmul.f32 -1.442695, %v3740_v47 }
0x203a   :  { %6565 = vpow2.f32 %v5286_v57 }
0x203b   :  { %6567 = vpow2.f32 %v5284_v58 }
0x203f   :  { %v6562_v52 = vpop.eup %6561 }
0x2040   :  { %3875 = vrot.lane.b32.xlu1 %v6562_v52, %s6865_s6 }
0x2043   :  { %v6564_v53 = vpop.eup %6563 }
0x2044   :  { %3755 = vrot.lane.b32.xlu1 %v6564_v53, %s6865_s6  ;;  %v6566_v2 = vpop.eup %6565 }
0x2045   :  { %v3865_v4 = vadd.f32 1.0, %v6566_v2  ;;  %v6568_v51 = vpop.eup %6567 }
0x2046   :  { %v3745_v6 = vadd.f32 1.0, %v6568_v51 }
0x2047   :  { %6569 = vrcp.f32 %v3865_v4 }
0x2048   :  { %6571 = vrcp.f32 %v3745_v6 }
0x2051   :  { %v6570_v8 = vpop.eup %6569 }
0x2052   :  { %v6572_v9 = vpop.eup %6571  ;;  %v3873_v13 = vmul.f32 %v6570_v8, %v3871_v45 }
0x2053   :  { %v3753_v15 = vmul.f32 %v6572_v9, %v3751_v61 }
0x20b2   :  { %v3876_v38 = vpop.permute.xlu1 %3875 }
0x20b3   :  { %v3878_v7 = vmul.f32 %v6570_v8, %v3876_v38 }
0x20b5   :  { %3880 = vrot.lane.b32.xlu1 %v3878_v7, %s6864_s17 }
0x20b6   :  { %v3756_v12 = vpop.permute.xlu1 %3755 }
0x20b7   :  { %v3758_v46 = vmul.f32 %v6572_v9, %v3756_v12 }
0x20b9   :  { %3760 = vrot.lane.b32.xlu1 %v3758_v46, %s6864_s17 }
0x2127   :  { %v3881_v14 = vpop.permute.xlu1 %3880 }
0x2128   :  { %v3883_v41 = vadd.f32 %v3881_v14, %v3873_v13 }
0x212a   :  { %6573 = vtanh.f32 %v3883_v41 }
0x212b   :  { %v3761_v62 = vpop.permute.xlu1 %3760 }
0x212c   :  { %v3763_v17 = vadd.f32 %v3761_v62, %v3753_v15 }
0x212e   :  { %6575 = vtanh.f32 %v3763_v17 }
0x2134   :  { %v6574_v54 = vpop.eup %6573 }
0x2135   :  { %3886 = vrot.lane.b32.xlu0 %v6574_v54, %s6865_s6 }
0x2138   :  { %v6576_v33 = vpop.eup %6575 }
0x2139   :  { %3766 = vrot.lane.b32.xlu1 %v6576_v33, %s6865_s6 }
0x21a7   :  { %v3887_v19 = vpop.permute.xlu0 %3886 }
0x21a8   :  { %v3889_v48 = vmul.f32 %v6570_v8, %v3887_v19 }
0x21aa   :  { %3891 = vrot.lane.b32.xlu0 %v3889_v48, %s6864_s17 }
0x21ab   :  { %v3767_v20 = vpop.permute.xlu1 %3766 }
0x21ac   :  { %v3769_v21 = vmul.f32 %v6572_v9, %v3767_v20 }
0x21ae   :  { %3896 = vrot.lane.b32.xlu0 %v3883_v41, %s6866_s11  ;;  %3771 = vrot.lane.b32.xlu1 %v3769_v21, %s6864_s17 }
0x21b2   :  { %3776 = vrot.lane.b32.xlu0 %v3763_v17, %s6866_s11 }
0x221c   :  { %v3892_v11 = vpop.permute.xlu0 %3891 }
0x221d   :  { %3894 = vst.msk [vmem:[#allocation8] sm:$0xff] %vm177_vm0, %v3892_v11  ;;  %3900 = vst.msk [vmem:[#allocation5 + $0x20] sm:$0xff] %vm177_vm0, %v3892_v11 }
0x2220   :  { %v3897_v40 = vpop.permute.xlu0 %3896  ;;  %v3772_v24 = vpop.permute.xlu1 %3771 }
0x2221   :  { %3899 = vst.msk [vmem:[#allocation9] sm:$0xff] %vm177_vm0, %v3897_v40  ;;  %3774 = vst.msk [vmem:[#allocation6] sm:$0xff] %vm177_vm0, %v3772_v24 }
0x2222   :  { %3780 = vst.msk [vmem:[#allocation4 + $0x18] sm:$0xff] %vm177_vm0, %v3772_v24 }
0x2224   :  { %v3777_v25 = vpop.permute.xlu0 %3776  ;;  %v4022_v26 = vld [vmem:[#allocation8] sm:$0xff] }
0x2225   :  { %3779 = vst.msk [vmem:[#allocation7] sm:$0xff] %vm177_vm0, %v3777_v25  ;;  %5980 = vmatmul.mubr.msk.f32.vlgmr.msra.gmra.mrb[48].mxu1 %vm177_vm0, %v4022_v26 }
0x2226   :  { %6300 = vmatpush3.bf16.msra.mxu1 %v7522_v5  ;;  %6001 = vmatprep.mubr.msk.f32.mxu1 %vm6862_vm1, %v6863_v1 }
0x2227   :  { %6301 = vmatprep.subr.bf16.mxu1 %v6861_v0 }
0x2228   :  { %v4101_v27 = vld [vmem:[#allocation9] sm:$0xff]  ;;  %v3902_v28 = vld [vmem:[#allocation6] sm:$0xff] }
0x2229   :  { %4110 = vrot.lane.b32.xlu0 %v4101_v27, %s6864_s17  ;;  %5969 = vmatmul.mubr.msk.f32.vlgmr.msra.gmra.mrb[32].mxu0 %vm177_vm0, %v3902_v28 }
0x222a   :  { %6294 = vmatpush3.bf16.msra.mxu0 %v7524_v18  ;;  %6303 = vmatpush3.bf16.msra.mxu1 %v7533_v22 }
0x222b   :  { %6295 = vmatprep.subr.bf16.mxu0 %v6861_v0  ;;  %5990 = vmatprep.mubr.msk.f32.mxu0 %vm6862_vm1, %v6863_v1 }
0x222c   :  { %v3981_v5 = vld [vmem:[#allocation7] sm:$0xff]  ;;  %6310 = vmatprep.subr.bf16.mxu1 %v6861_v0 }
0x222d   :  { %3990 = vrot.lane.b32.xlu0 %v3981_v5, %s6864_s17 }
0x222e   :  { %6297 = vmatpush3.bf16.msra.mxu0 %v7535_v23 }
0x222f   :  { %6304 = vmatprep.subr.bf16.mxu0 %v6861_v0 }
0x229b   :  { %v4111_v52 = vpop.permute.xlu0 %4110 }
0x229f   :  { %v3991_v2 = vpop.permute.xlu0 %3990 }
0x22f8   :  { %v4096_v29 = vpop.f32.mrb[48].mxu1 }
0x22f9   :  { %v4100_v59 = vadd.f32 %v4096_v29, %v7582_v10  ;;  %v5981_v18 = vpop.f32.mrb[49].mxu1 }
0x22fb   :  { %6577 = vtanh.f32 %v4100_v59  ;;  %v5290_v36 = vmul.f32 -1.442695, %v4100_v59 }
0x22fc   :  { %v3976_v22 = vpop.f32.mrb[32].mxu0 }
0x22fd   :  { %v3980_v30 = vadd.f32 %v3976_v22, %v7592_v49  ;;  %v5970_v31 = vpop.f32.mrb[33].mxu0 }
0x22ff   :  { %6579 = vtanh.f32 %v3980_v30  ;;  %v5288_v23 = vmul.f32 -1.442695, %v3980_v30 }
0x2300   :  { %6581 = vpow2.f32 %v5290_v36 }
0x2301   :  { %6583 = vpow2.f32 %v5288_v23 }
0x2305   :  { %v6578_v56 = vpop.eup %6577 }
0x2306   :  { %4115 = vrot.lane.b32.xlu1 %v6578_v56, %s6865_s6 }
0x2309   :  { %v6580_v3 = vpop.eup %6579 }
0x230a   :  { %3995 = vrot.lane.b32.xlu1 %v6580_v3, %s6865_s6  ;;  %v6582_v50 = vpop.eup %6581 }
0x230b   :  { %v4105_v37 = vadd.f32 1.0, %v6582_v50  ;;  %v6584_v10 = vpop.eup %6583 }
0x230c   :  { %v3985_v35 = vadd.f32 1.0, %v6584_v10 }
0x230d   :  { %6585 = vrcp.f32 %v4105_v37 }
0x230e   :  { %6587 = vrcp.f32 %v3985_v35 }
0x2317   :  { %v6586_v39 = vpop.eup %6585 }
0x2318   :  { %v6588_v44 = vpop.eup %6587  ;;  %v4113_v53 = vmul.f32 %v6586_v39, %v4111_v52 }
0x2319   :  { %v3993_v4 = vmul.f32 %v6588_v44, %v3991_v2  ;;  %v4386_v2 = vld [vmem:[#allocation18 + $0x18] sm:$0xff] }
0x2378   :  { %v4116_v49 = vpop.permute.xlu1 %4115 }
0x2379   :  { %v4118_v43 = vmul.f32 %v6586_v39, %v4116_v49  ;;  %v4504_v49 = vld [vmem:[#allocation21 + $0x8] sm:$0xff] }
0x237b   :  { %4120 = vrot.lane.b32.xlu1 %v4118_v43, %s6864_s17 }
0x237c   :  { %v3996_v47 = vpop.permute.xlu1 %3995 }
0x237d   :  { %v3998_v63 = vmul.f32 %v6588_v44, %v3996_v47  ;;  %v4384_v47 = vld [vmem:[#allocation18 + $0x8] sm:$0xff] }
0x237f   :  { %4000 = vrot.lane.b32.xlu1 %v3998_v63, %s6864_s17  ;;  %v4505_v63 = vld [vmem:[#allocation21 + $0x10] sm:$0xff] }
0x23ed   :  { %v4121_v57 = vpop.permute.xlu1 %4120 }
0x23ee   :  { %v4123_v58 = vadd.f32 %v4121_v57, %v4113_v53  ;;  %v4506_v53 = vld [vmem:[#allocation21 + $0x18] sm:$0xff] }
0x23ef   :  { %v6314_v57 = vpack.c.bf16 %v4506_v53, %v4505_v63 }
0x23f0   :  { %6589 = vtanh.f32 %v4123_v58 }
0x23f1   :  { %v4001_v51 = vpop.permute.xlu1 %4000 }
0x23f2   :  { %v4003_v6 = vadd.f32 %v4001_v51, %v3993_v4 }
0x23f4   :  { %6591 = vtanh.f32 %v4003_v6 }
0x23fa   :  { %v6590_v8 = vpop.eup %6589 }
0x23fb   :  { %4126 = vrot.lane.b32.xlu0 %v6590_v8, %s6865_s6 }
0x23fe   :  { %v6592_v38 = vpop.eup %6591 }
0x23ff   :  { %4006 = vrot.lane.b32.xlu1 %v6592_v38, %s6865_s6 }
0x246d   :  { %v4127_v7 = vpop.permute.xlu0 %4126 }
0x246e   :  { %v4129_v9 = vmul.f32 %v6586_v39, %v4127_v7  ;;  %v4503_v39 = vld [vmem:[#allocation21] sm:$0xff] }
0x246f   :  { %v6311_v43 = vpack.c.bf16 %v4504_v49, %v4503_v39 }
0x2470   :  { %4131 = vrot.lane.b32.xlu0 %v4129_v9, %s6864_s17 }
0x2471   :  { %v4007_v12 = vpop.permute.xlu1 %4006 }
0x2472   :  { %v4009_v46 = vmul.f32 %v6588_v44, %v4007_v12  ;;  %v4383_v44 = vld [vmem:[#allocation18] sm:$0xff] }
0x2473   :  { %v6305_v52 = vpack.c.bf16 %v4384_v47, %v4383_v44 }
0x2474   :  { %4136 = vrot.lane.b32.xlu0 %v4123_v58, %s6866_s11  ;;  %4011 = vrot.lane.b32.xlu1 %v4009_v46, %s6864_s17  ;;  %v4385_v58 = vld [vmem:[#allocation18 + $0x10] sm:$0xff] }
0x2475   :  { %v6308_v4 = vpack.c.bf16 %v4386_v2, %v4385_v58 }
0x2478   :  { %4016 = vrot.lane.b32.xlu0 %v4003_v6, %s6866_s11 }
0x24e2   :  { %v4132_v45 = vpop.permute.xlu0 %4131 }
0x24e3   :  { %4134 = vst.msk [vmem:[#allocation8] sm:$0xff] %vm177_vm0, %v4132_v45  ;;  %4140 = vst.msk [vmem:[#allocation5 + $0x18] sm:$0xff] %vm177_vm0, %v4132_v45 }
0x24e6   :  { %v4137_v13 = vpop.permute.xlu0 %4136  ;;  %v4012_v14 = vpop.permute.xlu1 %4011 }
0x24e7   :  { %4139 = vst.msk [vmem:[#allocation9] sm:$0xff] %vm177_vm0, %v4137_v13  ;;  %4014 = vst.msk [vmem:[#allocation6] sm:$0xff] %vm177_vm0, %v4012_v14 }
0x24e8   :  { %4020 = vst.msk [vmem:[#allocation4 + $0x20] sm:$0xff] %vm177_vm0, %v4012_v14 }
0x24ea   :  { %v4017_v41 = vpop.permute.xlu0 %4016  ;;  %v4262_v61 = vld [vmem:[#allocation8] sm:$0xff] }
0x24eb   :  { %4019 = vst.msk [vmem:[#allocation7] sm:$0xff] %vm177_vm0, %v4017_v41  ;;  %6002 = vmatmul.mubr.msk.f32.vlgmr.msra.gmra.mrb[50].mxu1 %vm177_vm0, %v4262_v61 }
0x24ec   :  { %6023 = vmatprep.mubr.msk.f32.mxu1 %vm6862_vm1, %v6863_v1  ;;  %6312 = vmatpush3.bf16.msra.mxu1 %v6311_v43 }
0x24ed   :  { %6313 = vmatprep.subr.bf16.mxu1 %v6861_v0 }
0x24ee   :  { %v4341_v15 = vld [vmem:[#allocation9] sm:$0xff]  ;;  %v4142_v62 = vld [vmem:[#allocation6] sm:$0xff] }
0x24ef   :  { %4350 = vrot.lane.b32.xlu0 %v4341_v15, %s6864_s17  ;;  %5991 = vmatmul.mubr.msk.f32.vlgmr.msra.gmra.mrb[34].mxu0 %vm177_vm0, %v4142_v62 }
0x24f0   :  { %6012 = vmatprep.mubr.msk.f32.mxu0 %vm6862_vm1, %v6863_v1  ;;  %6306 = vmatpush3.bf16.msra.mxu0 %v6305_v52 }
0x24f1   :  { %6315 = vmatpush3.bf16.msra.mxu1 %v6314_v57  ;;  %6307 = vmatprep.subr.bf16.mxu0 %v6861_v0 }
0x24f2   :  { %v4221_v17 = vld [vmem:[#allocation7] sm:$0xff]  ;;  %6322 = vmatprep.subr.bf16.mxu1 %v6861_v0 }
0x24f3   :  { %4230 = vrot.lane.b32.xlu0 %v4221_v17, %s6864_s17 }
0x24f4   :  { %6309 = vmatpush3.bf16.msra.mxu0 %v6308_v4 }
0x24f5   :  { %6316 = vmatprep.subr.bf16.mxu0 %v6861_v0 }
0x2561   :  { %v4351_v30 = vpop.permute.xlu0 %4350 }
0x2565   :  { %v4231_v36 = vpop.permute.xlu0 %4230 }
0x25be   :  { %v4336_v54 = vpop.f32.mrb[50].mxu1 }
0x25bf   :  { %v4340_v33 = vadd.f32 %v4336_v54, %v7586_v42  ;;  %v6003_v19 = vpop.f32.mrb[51].mxu1 }
0x25c1   :  { %6593 = vtanh.f32 %v4340_v33  ;;  %v5294_v24 = vmul.f32 -1.442695, %v4340_v33 }
0x25c2   :  { %v4216_v48 = vpop.f32.mrb[34].mxu0 }
0x25c3   :  { %v4220_v20 = vadd.f32 %v4216_v48, %v7588_v16  ;;  %v5992_v21 = vpop.f32.mrb[35].mxu0 }
0x25c5   :  { %6595 = vtanh.f32 %v4220_v20  ;;  %v5292_v25 = vmul.f32 -1.442695, %v4220_v20 }
0x25c6   :  { %6597 = vpow2.f32 %v5294_v24 }
0x25c7   :  { %6599 = vpow2.f32 %v5292_v25 }
0x25cb   :  { %v6594_v11 = vpop.eup %6593 }
0x25cc   :  { %4355 = vrot.lane.b32.xlu1 %v6594_v11, %s6865_s6 }
0x25cf   :  { %v6596_v40 = vpop.eup %6595 }
0x25d0   :  { %4235 = vrot.lane.b32.xlu1 %v6596_v40, %s6865_s6  ;;  %v6598_v26 = vpop.eup %6597 }
0x25d1   :  { %v4345_v27 = vadd.f32 1.0, %v6598_v26  ;;  %v6600_v42 = vpop.eup %6599 }
0x25d2   :  { %v4225_v28 = vadd.f32 1.0, %v6600_v42 }
0x25d3   :  { %6601 = vrcp.f32 %v4345_v27 }
0x25d4   :  { %6603 = vrcp.f32 %v4225_v28 }
0x25dd   :  { %v6602_v5 = vpop.eup %6601 }
0x25de   :  { %v6604_v59 = vpop.eup %6603  ;;  %v4353_v31 = vmul.f32 %v6602_v5, %v4351_v30 }
0x25df   :  { %v4233_v23 = vmul.f32 %v6604_v59, %v4231_v36 }
0x263e   :  { %v4356_v16 = vpop.permute.xlu1 %4355 }
0x263f   :  { %v4358_v29 = vmul.f32 %v6602_v5, %v4356_v16 }
0x2641   :  { %4360 = vrot.lane.b32.xlu1 %v4358_v29, %s6864_s17 }
0x2642   :  { %v4236_v18 = vpop.permute.xlu1 %4235 }
0x2643   :  { %v4238_v22 = vmul.f32 %v6604_v59, %v4236_v18 }
0x2645   :  { %4240 = vrot.lane.b32.xlu1 %v4238_v22, %s6864_s17 }
0x26b3   :  { %v4361_v56 = vpop.permute.xlu1 %4360 }
0x26b4   :  { %v4363_v3 = vadd.f32 %v4361_v56, %v4353_v31 }
0x26b6   :  { %6605 = vtanh.f32 %v4363_v3 }
0x26b7   :  { %v4241_v50 = vpop.permute.xlu1 %4240 }
0x26b8   :  { %v4243_v37 = vadd.f32 %v4241_v50, %v4233_v23 }
0x26ba   :  { %6607 = vtanh.f32 %v4243_v37 }
0x26c0   :  { %v6606_v10 = vpop.eup %6605 }
0x26c1   :  { %4366 = vrot.lane.b32.xlu0 %v6606_v10, %s6865_s6 }
0x26c4   :  { %v6608_v35 = vpop.eup %6607 }
0x26c5   :  { %4246 = vrot.lane.b32.xlu1 %v6608_v35, %s6865_s6 }
0x2733   :  { %v4367_v51 = vpop.permute.xlu0 %4366 }
0x2734   :  { %v4369_v6 = vmul.f32 %v6602_v5, %v4367_v51 }
0x2736   :  { %4371 = vrot.lane.b32.xlu0 %v4369_v6, %s6864_s17 }
0x2737   :  { %v4247_v8 = vpop.permute.xlu1 %4246 }
0x2738   :  { %v4249_v38 = vmul.f32 %v6604_v59, %v4247_v8 }
0x273a   :  { %4376 = vrot.lane.b32.xlu0 %v4363_v3, %s6866_s11  ;;  %4251 = vrot.lane.b32.xlu1 %v4249_v38, %s6864_s17 }
0x273e   :  { %4256 = vrot.lane.b32.xlu0 %v4243_v37, %s6866_s11 }
0x27a8   :  { %v4372_v7 = vpop.permute.xlu0 %4371 }
0x27a9   :  { %4374 = vst.msk [vmem:[#allocation8] sm:$0xff] %vm177_vm0, %v4372_v7  ;;  %4380 = vst.msk [vmem:[#allocation5 + $0x10] sm:$0xff] %vm177_vm0, %v4372_v7 }
0x27ac   :  { %v4377_v9 = vpop.permute.xlu0 %4376  ;;  %v4252_v12 = vpop.permute.xlu1 %4251 }
0x27ad   :  { %4379 = vst.msk [vmem:[#allocation9] sm:$0xff] %vm177_vm0, %v4377_v9  ;;  %4254 = vst.msk [vmem:[#allocation6] sm:$0xff] %vm177_vm0, %v4252_v12 }
0x27ae   :  { %4260 = vst.msk [vmem:[#allocation4 + $0x28] sm:$0xff] %vm177_vm0, %v4252_v12 }
0x27b0   :  { %v4257_v46 = vpop.permute.xlu0 %4256  ;;  %v4502_v45 = vld [vmem:[#allocation8] sm:$0xff] }
0x27b1   :  { %4259 = vst.msk [vmem:[#allocation7] sm:$0xff] %vm177_vm0, %v4257_v46  ;;  %6024 = vmatmul.mubr.msk.f32.vlgmr.msra.gmra.mrb[52].mxu1 %vm177_vm0, %v4502_v45 }
0x27b2   :  { %6324 = vmatpush3.bf16.msra.mxu1 %v6311_v43  ;;  %6045 = vmatprep.mubr.msk.f32.mxu1 %vm6862_vm1, %v6863_v1 }
0x27b3   :  { %6325 = vmatprep.subr.bf16.mxu1 %v6861_v0 }
0x27b4   :  { %v4581_v13 = vld [vmem:[#allocation9] sm:$0xff]  ;;  %v4382_v14 = vld [vmem:[#allocation6] sm:$0xff] }
0x27b5   :  { %4590 = vrot.lane.b32.xlu0 %v4581_v13, %s6864_s17  ;;  %6013 = vmatmul.mubr.msk.f32.vlgmr.msra.gmra.mrb[36].mxu0 %vm177_vm0, %v4382_v14 }
0x27b6   :  { %6318 = vmatpush3.bf16.msra.mxu0 %v6305_v52  ;;  %6327 = vmatpush3.bf16.msra.mxu1 %v6314_v57 }
0x27b7   :  { %6319 = vmatprep.subr.bf16.mxu0 %v6861_v0  ;;  %6034 = vmatprep.mubr.msk.f32.mxu0 %vm6862_vm1, %v6863_v1 }
0x27b8   :  { %v4461_v41 = vld [vmem:[#allocation7] sm:$0xff] }
0x27b9   :  { %4470 = vrot.lane.b32.xlu0 %v4461_v41, %s6864_s17 }
0x27ba   :  { %6321 = vmatpush3.bf16.msra.mxu0 %v6308_v4 }
0x2827   :  { %v4591_v42 = vpop.permute.xlu0 %4590 }
0x282b   :  { %v4471_v29 = vpop.permute.xlu0 %4470 }
0x2884   :  { %v4576_v61 = vpop.f32.mrb[52].mxu1 }
0x2885   :  { %v4580_v15 = vadd.f32 %v4576_v61, %v7576_v34  ;;  %v6025_v62 = vpop.f32.mrb[53].mxu1 }
0x2887   :  { %6609 = vtanh.f32 %v4580_v15  ;;  %v5298_v1 = vmul.f32 -1.442695, %v4580_v15 }
0x2888   :  { %v4456_v17 = vpop.f32.mrb[36].mxu0 }
0x2889   :  { %v4460_v54 = vadd.f32 %v4456_v17, %v7598_v60  ;;  %v6014_v33 = vpop.f32.mrb[37].mxu0 }
0x288b   :  { %6611 = vtanh.f32 %v4460_v54  ;;  %v5296_v48 = vmul.f32 -1.442695, %v4460_v54 }
0x288c   :  { %6613 = vpow2.f32 %v5298_v1  ;;  %v4881_v1 = vld [vmem:[#allocation22 + $0x20] sm:$0xff] }
0x288d   :  { %6615 = vpow2.f32 %v5296_v48  ;;  %v4882_v48 = vld [vmem:[#allocation22 + $0x28] sm:$0xff] }
0x2891   :  { %v6610_v19 = vpop.eup %6609 }
0x2892   :  { %4595 = vrot.lane.b32.xlu1 %v6610_v19, %s6865_s6 }
0x2895   :  { %v6612_v0 = vpop.eup %6611 }
0x2896   :  { %4475 = vrot.lane.b32.xlu1 %v6612_v0, %s6865_s6  ;;  %v6614_v20 = vpop.eup %6613 }
0x2897   :  { %v4585_v21 = vadd.f32 1.0, %v6614_v20  ;;  %v6616_v34 = vpop.eup %6615  ;;  %v6328_v20 = vpack.c.bf16 %v4882_v48, %v4881_v1 }
0x2898   :  { %v4465_v11 = vadd.f32 1.0, %v6616_v34  ;;  %v4884_v34 = vld [vmem:[#allocation22 + $0x38] sm:$0xff] }
0x2899   :  { %6617 = vrcp.f32 %v4585_v21  ;;  %6329 = vmatprep.subr.bf16.mxu0 %v6328_v20  ;;  %v4883_v21 = vld [vmem:[#allocation22 + $0x30] sm:$0xff] }
0x289a   :  { %6619 = vrcp.f32 %v4465_v11  ;;  %v6332_v11 = vpack.c.bf16 %v4884_v34, %v4883_v21 }
0x28a3   :  { %v6618_v40 = vpop.eup %6617 }
0x28a4   :  { %v6620_v25 = vpop.eup %6619  ;;  %v4593_v28 = vmul.f32 %v6618_v40, %v4591_v42 }
0x28a5   :  { %v4473_v59 = vmul.f32 %v6620_v25, %v4471_v29  ;;  %v4871_v29 = vld [vmem:[#allocation22 + $0x10] sm:$0xff] }
0x2904   :  { %v4596_v60 = vpop.permute.xlu1 %4595 }
0x2905   :  { %v4598_v24 = vmul.f32 %v6618_v40, %v4596_v60  ;;  %v4870_v60 = vld [vmem:[#allocation22 + $0x8] sm:$0xff] }
0x2907   :  { %4600 = vrot.lane.b32.xlu1 %v4598_v24, %s6864_s17 }
0x2908   :  { %v4476_v26 = vpop.permute.xlu1 %4475 }
0x2909   :  { %v4478_v27 = vmul.f32 %v6620_v25, %v4476_v26 }
0x290b   :  { %4480 = vrot.lane.b32.xlu1 %v4478_v27, %s6864_s17 }
0x2979   :  { %v4601_v5 = vpop.permute.xlu1 %4600 }
0x297a   :  { %v4603_v16 = vadd.f32 %v4601_v5, %v4593_v28 }
0x297c   :  { %6621 = vtanh.f32 %v4603_v16 }
0x297d   :  { %v4481_v18 = vpop.permute.xlu1 %4480 }
0x297e   :  { %v4483_v22 = vadd.f32 %v4481_v18, %v4473_v59  ;;  %v4872_v59 = vld [vmem:[#allocation22 + $0x18] sm:$0xff] }
0x2980   :  { %6623 = vtanh.f32 %v4483_v22 }
0x2986   :  { %v6622_v30 = vpop.eup %6621 }
0x2987   :  { %4606 = vrot.lane.b32.xlu0 %v6622_v30, %s6865_s6  ;;  %v6340_v30 = vpack.c.bf16 %v4872_v59, %v4871_v29 }
0x298a   :  { %v6624_v31 = vpop.eup %6623 }
0x298b   :  { %4486 = vrot.lane.b32.xlu1 %v6624_v31, %s6865_s6 }
0x29f9   :  { %v4607_v56 = vpop.permute.xlu0 %4606 }
0x29fa   :  { %v4609_v3 = vmul.f32 %v6618_v40, %v4607_v56  ;;  %v4869_v40 = vld [vmem:[#allocation22] sm:$0xff]  ;;  %v4875_v56 = vld [vmem:[#allocation5 + $0x10] sm:$0xff] }
0x29fc   :  { %4611 = vrot.lane.b32.xlu0 %v4609_v3, %s6864_s17  ;;  %v4876_v3 = vld [vmem:[#allocation5 + $0x18] sm:$0xff] }
0x29fd   :  { %v4487_v36 = vpop.permute.xlu1 %4486 }
0x29fe   :  { %v4489_v23 = vmul.f32 %v6620_v25, %v4487_v36  ;;  %v6336_v25 = vpack.c.bf16 %v4870_v60, %v4869_v40  ;;  %v4877_v36 = vld [vmem:[#allocation5 + $0x20] sm:$0xff] }
0x2a00   :  { %4616 = vrot.lane.b32.xlu0 %v4603_v16, %s6866_s11  ;;  %4491 = vrot.lane.b32.xlu1 %v4489_v23, %s6864_s17  ;;  %v4878_v23 = vld [vmem:[#allocation5 + $0x28] sm:$0xff] }
0x2a04   :  { %4496 = vrot.lane.b32.xlu0 %v4483_v22, %s6866_s11 }
0x2a6e   :  { %v4612_v50 = vpop.permute.xlu0 %4611 }
0x2a6f   :  { %4614 = vst.msk [vmem:[#allocation8] sm:$0xff] %vm177_vm0, %v4612_v50  ;;  %4620 = vst.msk [vmem:[#allocation5 + $0x8] sm:$0xff] %vm177_vm0, %v4612_v50  ;;  %v4879_v50 = vld [vmem:[#allocation5 + $0x30] sm:$0xff] }
0x2a72   :  { %v4617_v37 = vpop.permute.xlu0 %4616  ;;  %v4492_v10 = vpop.permute.xlu1 %4491 }
0x2a73   :  { %4619 = vst.msk [vmem:[#allocation9] sm:$0xff] %vm177_vm0, %v4617_v37  ;;  %4494 = vst.msk [vmem:[#allocation6] sm:$0xff] %vm177_vm0, %v4492_v10  ;;  %v4880_v37 = vld [vmem:[#allocation5 + $0x38] sm:$0xff] }
0x2a74   :  { %4500 = vst.msk [vmem:[#allocation4 + $0x30] sm:$0xff] %vm177_vm0, %v4492_v10  ;;  %v4861_v10 = vld [vmem:[#allocation4] sm:$0xff] }
0x2a76   :  { %v4497_v35 = vpop.permute.xlu0 %4496  ;;  %v4742_v39 = vld [vmem:[#allocation8] sm:$0xff]  ;;  %v4874_v31 = vld [vmem:[#allocation5 + $0x8] sm:$0xff] }
0x2a77   :  { %4499 = vst.msk [vmem:[#allocation7] sm:$0xff] %vm177_vm0, %v4497_v35  ;;  %6046 = vmatmul.mubr.msk.f32.vlgmr.msra.gmra.mrb[54].mxu1 %vm177_vm0, %v4742_v39  ;;  %v4862_v35 = vld [vmem:[#allocation4 + $0x8] sm:$0xff]  ;;  %v4863_v39 = vld [vmem:[#allocation4 + $0x10] sm:$0xff] }
0x2a7a   :  { %v4821_v49 = vld [vmem:[#allocation9] sm:$0xff]  ;;  %v4622_v43 = vld [vmem:[#allocation6] sm:$0xff] }
0x2a7b   :  { %4830 = vrot.lane.b32.xlu0 %v4821_v49, %s6864_s17  ;;  %6035 = vmatmul.mubr.msk.f32.vlgmr.msra.gmra.mrb[38].mxu0 %vm177_vm0, %v4622_v43  ;;  %v4864_v49 = vld [vmem:[#allocation4 + $0x18] sm:$0xff]  ;;  %v4865_v43 = vld [vmem:[#allocation4 + $0x20] sm:$0xff] }
0x2a7c   :  { %6331 = vmatpush3.bf16.msra.mxu0 %v6328_v20 }
0x2a7d   :  { %6333 = vmatprep.subr.bf16.mxu0 %v6332_v11 }
0x2a7e   :  { %v4701_v44 = vld [vmem:[#allocation7] sm:$0xff] }
0x2a7f   :  { %4710 = vrot.lane.b32.xlu0 %v4701_v44, %s6864_s17  ;;  %v4866_v44 = vld [vmem:[#allocation4 + $0x28] sm:$0xff] }
0x2a80   :  { %6335 = vmatpush3.bf16.msra.mxu0 %v6332_v11 }
0x2a81   :  { %6337 = vmatprep.subr.bf16.mxu0 %v6336_v25 }
0x2aed   :  { %v4831_v14 = vpop.permute.xlu0 %4830 }
0x2af1   :  { %v4711_v62 = vpop.permute.xlu0 %4710 }
0x2b4a   :  { %v4816_v47 = vpop.f32.mrb[54].mxu1 }
0x2b4b   :  { %v4820_v63 = vadd.f32 %v4816_v47, %v7578_v32  ;;  %v6047_v52 = vpop.f32.mrb[55].mxu1  ;;  %v4867_v47 = vld [vmem:[#allocation4 + $0x30] sm:$0xff] }
0x2b4c   :  { %v5319_v52 = vld [vmem:[%s7882_s14] ss:$0 sm:$0xff] }
0x2b4d   :  { %6625 = vtanh.f32 %v4820_v63  ;;  %v5302_v51 = vmul.f32 -1.442695, %v4820_v63 }
0x2b4e   :  { %v4696_v53 = vpop.f32.mrb[38].mxu0 }
0x2b4f   :  { %v4700_v57 = vadd.f32 %v4696_v53, %v7596_v55  ;;  %v6036_v58 = vpop.f32.mrb[39].mxu0 }
0x2b51   :  { %6627 = vtanh.f32 %v4700_v57  ;;  %v5300_v6 = vmul.f32 -1.442695, %v4700_v57 }
0x2b52   :  { %6629 = vpow2.f32 %v5302_v51 }
0x2b53   :  { %6631 = vpow2.f32 %v5300_v6 }
0x2b57   :  { %v6626_v2 = vpop.eup %6625 }
0x2b58   :  { %4835 = vrot.lane.b32.xlu1 %v6626_v2, %s6865_s6 }
0x2b5b   :  { %v6628_v4 = vpop.eup %6627 }
0x2b5c   :  { %4715 = vrot.lane.b32.xlu1 %v6628_v4, %s6865_s6  ;;  %v6630_v8 = vpop.eup %6629 }
0x2b5d   :  { %v4825_v38 = vadd.f32 1.0, %v6630_v8  ;;  %v6632_v32 = vpop.eup %6631 }
0x2b5e   :  { %v4705_v7 = vadd.f32 1.0, %v6632_v32 }
0x2b5f   :  { %6633 = vrcp.f32 %v4825_v38 }
0x2b60   :  { %6635 = vrcp.f32 %v4705_v7 }
0x2b69   :  { %v6634_v9 = vpop.eup %6633 }
0x2b6a   :  { %v6636_v46 = vpop.eup %6635  ;;  %v4833_v41 = vmul.f32 %v6634_v9, %v4831_v14 }
0x2b6b   :  { %v4713_v17 = vmul.f32 %v6636_v46, %v4711_v62 }
0x2bca   :  { %v4836_v55 = vpop.permute.xlu1 %4835 }
0x2bcb   :  { %v4838_v12 = vmul.f32 %v6634_v9, %v4836_v55 }
0x2bcd   :  { %4840 = vrot.lane.b32.xlu1 %v4838_v12, %s6864_s17 }
0x2bce   :  { %v4716_v45 = vpop.permute.xlu1 %4715 }
0x2bcf   :  { %v4718_v13 = vmul.f32 %v6636_v46, %v4716_v45 }
0x2bd1   :  { %4720 = vrot.lane.b32.xlu1 %v4718_v13, %s6864_s17 }
0x2c3f   :  { %v4841_v61 = vpop.permute.xlu1 %4840 }
0x2c40   :  { %v4843_v15 = vadd.f32 %v4841_v61, %v4833_v41 }
0x2c42   :  { %6637 = vtanh.f32 %v4843_v15 }
0x2c43   :  { %v4721_v54 = vpop.permute.xlu1 %4720 }
0x2c44   :  { %v4723_v33 = vadd.f32 %v4721_v54, %v4713_v17 }
0x2c46   :  { %6639 = vtanh.f32 %v4723_v33 }
0x2c4c   :  { %v6638_v19 = vpop.eup %6637 }
0x2c4d   :  { %4846 = vrot.lane.b32.xlu0 %v6638_v19, %s6865_s6 }
0x2c50   :  { %v6640_v0 = vpop.eup %6639 }
0x2c51   :  { %4726 = vrot.lane.b32.xlu1 %v6640_v0, %s6865_s6  ;;  %s6867_s6 = smov [#allocation24]  }
0x2cbf   :  { %v4847_v24 = vpop.permute.xlu0 %4846 }
0x2cc0   :  { %v4849_v26 = vmul.f32 %v6634_v9, %v4847_v24 }
0x2cc2   :  { %4851 = vrot.lane.b32.xlu0 %v4849_v26, %s6864_s17 }
0x2cc3   :  { %v4727_v27 = vpop.permute.xlu1 %4726 }
0x2cc4   :  { %v4729_v42 = vmul.f32 %v6636_v46, %v4727_v27 }
0x2cc6   :  { %4736 = vrot.lane.b32.xlu0 %v4723_v33, %s6866_s11  ;;  %4731 = vrot.lane.b32.xlu1 %v4729_v42, %s6864_s17 }
0x2cca   :  { %4856 = vrot.lane.b32.xlu1 %v4843_v15, %s6866_s11  ;;  %s5171_s11 = sshll.u32 %s6867_s6, 4  ;;  %s5172_s11 = int_to_ptr.vmem [resolvable:$true] %s5171_s11 }
0x2ccb   :  { %s6817_s14 = scalar_lea.vmem %s5172_s11, 1024  ;;  %p6822_p9 = scmp.lt.s32.totalorder %s5172_s11, %s5172_s11 }
0x2ccc   :  { %p6818_p8 = scmp.ne.s32.totalorder %s5172_s11, %s6817_s14  ;;  %p6823_p10 = scmp.lt.s32.totalorder %s6817_s14, %s6817_s14 }
0x2cce   :  { %p6824_p11 = por %p6823_p10, %p6822_p9 }
0x2cd0   :  { %p6825_p12 = pnand %p6824_p11, %p6818_p8 }
0x2d34   :  { %v4852_v28 = vpop.permute.xlu0 %4851 }
0x2d35   :  { %4854 = vst.msk [vmem:[#allocation8] sm:$0xff] %vm177_vm0, %v4852_v28  ;;  %4860 = vst.msk [vmem:[#allocation5] sm:$0xff] %vm177_vm0, %v4852_v28 }
0x2d38   :  { %v4737_v5 = vpop.permute.xlu0 %4736  ;;  %v4732_v16 = vpop.permute.xlu1 %4731 }
0x2d39   :  { %4739 = vst.msk [vmem:[#allocation7] sm:$0xff] %vm177_vm0, %v4737_v5  ;;  %4734 = vst.msk [vmem:[#allocation6] sm:$0xff] %vm177_vm0, %v4732_v16 }
0x2d3a   :  { %4740 = vst.msk [vmem:[#allocation4 + $0x38] sm:$0xff] %vm177_vm0, %v4732_v16 }
0x2d3c   :  { %v4857_v18 = vpop.permute.xlu1 %4856  ;;  %v4873_v22 = vld [vmem:[#allocation5] sm:$0xff] }
0x2d3d   :  { %4859 = vst.msk [vmem:[#allocation9] sm:$0xff] %vm177_vm0, %v4857_v18  ;;  %6056 = vmatprep.mubr.msk.f32.mxu0 %vm177_vm0, %v4873_v22 }
0x2d3e   :  { %6057 = vmatmul.mubr.msk.f32.vlgmr.msra.gmra.mrb[40].mxu0 %vm177_vm0, %v4874_v31 }
0x2d3f   :  { %6059 = vmatprep.mubr.msk.f32.mxu0 %vm177_vm0, %v4875_v56  ;;  %6339 = vmatpush3.bf16.msra.mxu0 %v6336_v25 }
0x2d40   :  { %6341 = vmatprep.subr.bf16.mxu0 %v6340_v30 }
0x2d41   :  { %v4868_v63 = vld [vmem:[#allocation4 + $0x38] sm:$0xff] }
0x2d42   :  { %6060 = vmatmul.mubr.msk.f32.gmra.mrb[42].mxu0 %vm177_vm0, %v4876_v3 }
0x2d43   :  { %6062 = vmatprep.mubr.msk.f32.mxu0 %vm177_vm0, %v4877_v36  ;;  %6343 = vmatpush3.bf16.msra.mxu0 %v6340_v30 }
0x2d46   :  { %6063 = vmatmul.mubr.msk.f32.gmra.mrb[44].mxu0 %vm177_vm0, %v4878_v23 }
0x2d47   :  { %6065 = vmatprep.mubr.msk.f32.mxu0 %vm177_vm0, %v4879_v50 }
0x2d4a   :  { %6066 = vmatmul.mubr.msk.f32.gmra.mrb[46].mxu0 %vm177_vm0, %v4880_v37 }
0x2d4b   :  { %6076 = vmatprep.mubr.msk.f32.mxu0 %vm177_vm0, %v4861_v10 }
0x2d4e   :  { %6077 = vmatmul.mubr.msk.f32.vlgmr.msra.gmra.mrb[40].mxu0 %vm177_vm0, %v4862_v35 }
0x2d4f   :  { %6079 = vmatprep.mubr.msk.f32.mxu0 %vm177_vm0, %v4863_v39 }
0x2d52   :  { %6080 = vmatmul.mubr.msk.f32.gmra.mrb[42].mxu0 %vm177_vm0, %v4864_v49 }
0x2d53   :  { %6082 = vmatprep.mubr.msk.f32.mxu0 %vm177_vm0, %v4865_v43 }
0x2d56   :  { %6083 = vmatmul.mubr.msk.f32.gmra.mrb[44].mxu0 %vm177_vm0, %v4866_v44 }
0x2d57   :  { %6085 = vmatprep.mubr.msk.f32.mxu0 %vm177_vm0, %v4867_v47 }
0x2d5a   :  { %6086 = vmatmul.mubr.msk.f32.gmra.mrb[46].mxu0 %vm177_vm0, %v4868_v63 }
0x2e21   :  { %v6078_v53 = vpop.f32.mrb[40].mxu0 }
0x2e22   :  { %v5151_v57 = vadd.f32 %v6078_v53, %v5319_v52  ;;  %v5104_v58 = vpop.f32.mrb[41].mxu0 }
0x2e23   :  { %v5150_v2 = vadd.f32 %v5319_v52, %v5104_v58 }
0x2e24   :  { %5159 = vst [vmem:[#allocation24 + $0x8] sm:$0xff] %v5151_v57 }
0x2e25   :  { %5158 = vst [vmem:[#allocation24] sm:$0xff] %v5150_v2  ;;  %v6081_v4 = vpop.f32.mrb[42].mxu0 }
0x2e26   :  { %v5153_v51 = vadd.f32 %v6081_v4, %v5319_v52  ;;  %v5114_v6 = vpop.f32.mrb[43].mxu0 }
0x2e27   :  { %v5152_v8 = vadd.f32 %v5319_v52, %v5114_v6 }
0x2e28   :  { %5161 = vst [vmem:[#allocation24 + $0x18] sm:$0xff] %v5153_v51 }
0x2e29   :  { %5160 = vst [vmem:[#allocation24 + $0x10] sm:$0xff] %v5152_v8  ;;  %v6084_v38 = vpop.f32.mrb[44].mxu0 }
0x2e2a   :  { %v5155_v32 = vadd.f32 %v6084_v38, %v5319_v52  ;;  %v5124_v7 = vpop.f32.mrb[45].mxu0 }
0x2e2b   :  { %v5154_v9 = vadd.f32 %v5319_v52, %v5124_v7 }
0x2e2c   :  { %5163 = vst [vmem:[#allocation24 + $0x28] sm:$0xff] %v5155_v32 }
0x2e2d   :  { %5162 = vst [vmem:[#allocation24 + $0x20] sm:$0xff] %v5154_v9  ;;  %v6087_v55 = vpop.f32.mrb[46].mxu0 }
0x2e2e   :  { %v5157_v12 = vadd.f32 %v6087_v55, %v5319_v52  ;;  %v5134_v46 = vpop.f32.mrb[47].mxu0 }
0x2e2f   :  { %v5156_v45 = vadd.f32 %v5319_v52, %v5134_v46 }
0x2e30   :  { %5165 = vst [vmem:[#allocation24 + $0x38] sm:$0xff] %v5157_v12 }
0x2e31   :  { %5164 = vst [vmem:[#allocation24 + $0x30] sm:$0xff] %v5156_v45 }
0x2e32   :  { %6828 = shalt.err (!%p6825_p12)
}
0x2e33   :  { %s6829_s18 = scalar_lea.hbm %s7883_s15, 1024 }
0x2e34   :  { %p6830_p13 = scmp.ne.s32.totalorder %s7883_s15, %s6829_s18  ;;  %p6833_p0 = scmp.lt.u32.totalorder %s6829_s18, %s7883_s15 }
0x2e36   :  { %p6835_p1 = pnand %p6833_p0, %p6830_p13 }
0x2e38   :  { %6838 = shalt.err (!%p6835_p1)
}
0x2e39   :  { %5177 = dma.vmem_to_hbm [thread:$0]  %s5172_s11, 1024, %s7883_s15, [#allocation12], %s6853_s30, %s6853_s30, %s6854_s16  }
0x2e3a   :  { %6849 = dma.done.wait [#allocation12], 1024  }
0x2e3b   :  { %6850 = vsyncadd [#allocation12], 4294966272 }
0x2e3c   :  { %5181 = vsyncpa [#allocation11], 1 }
0x2e3d   :  { %5182 = vsyncpa [#allocation14], 1 }
0x2e3e   :  { %5183 = vsyncpa [#allocation17], 1 }
0x2e3f   :  { %5184 = vsyncpa [#allocation20], 1 }
0x2e40   :  { %5185 = vsyncpa [#allocation23], 1 }
0x2e41   :  { %5186 = vsyncpa [#allocation12], 1 }

</bundles_post_ra>
